<compile_context>
chip_gen: v7x
topology: tpu7x:2x2x1
jax: 0.10.0
libtpu: 0.0.40
codegen_flags: <defaults>
</compile_context>

<pallas_src>
import jax
import jax.numpy as jnp
from jax.experimental import pallas as pl
from jax.experimental.pallas import tpu as pltpu


_LEAD = 8  # leading zero rows of the height-padded conv1 buffer; >=1 required,
           # 8 keeps the bulk h1 store sublane-aligned when W % 8 == 0.


def _make_bottleneck_kernel(H, W, stride, has_downsample):
    s = stride
    Ho, Wo = H // s, W // s
    inv_pool = 1.0 / float(s * s)

    def kernel(*refs):
        if has_downsample:
            (x_ref, w1_ref, t1_ref, w2_ref, t2_ref, w3_ref, t3_ref,
             wd_ref, td_ref, o_ref) = refs[:10]
            scratch = refs[10:]
        else:
            (x_ref, w1_ref, t1_ref, w2_ref, t2_ref, w3_ref, t3_ref,
             o_ref) = refs[:8]
            scratch = refs[8:]
        if s > 1:
            h1p_ref, h2s_ref, wps_ref, p2s_ref, xws_ref, xps_ref = scratch
        else:
            (h1p_ref,) = scratch

        P = w1_ref.shape[1]

        # ---- conv1 (1x1, scale-folded) + bias + ReLU -----------------------
        x2 = x_ref[...]                                            # (H*W, Cin)
        h1 = jnp.dot(x2.astype(w1_ref.dtype), w1_ref[...],
                     preferred_element_type=jnp.float32)
        h1 = jnp.maximum(h1 + t1_ref[...], 0.0)                    # (H*W, P)

        # ---- height-padded flat buffer: 2 small zero stores + 1 bulk store --
        h1p_ref[pl.ds(0, _LEAD + W), :] = jnp.zeros((_LEAD + W, P), jnp.float32)
        h1p_ref[pl.ds(_LEAD + W, H * W), :] = h1
        h1p_ref[pl.ds(_LEAD + W + H * W, W + 8), :] = (
            jnp.zeros((W + 8, P), jnp.float32))

        # ---- conv2 (3x3, pad=1): 9 shifted matmuls grouped by kx ------------
        # Output row r = i*W + j of tap (ky,kx) reads buffer row
        # _LEAD - 1 + r + ky*W + kx (= input(i+ky-1, j+kx-1)); row wrap at the
        # left/right image edge is zeroed with one select per kx group.
        def tap(ky, kx):
            lhs = h1p_ref[pl.ds(_LEAD - 1 + ky * W + kx, H * W), :]
            return jnp.dot(lhs.astype(w2_ref.dtype), w2_ref[ky * 3 + kx],
                           preferred_element_type=jnp.float32)

        acc_m = tap(0, 1) + tap(1, 1) + tap(2, 1)
        acc_l = tap(0, 0) + tap(1, 0) + tap(2, 0)
        acc_r = tap(0, 2) + tap(1, 2) + tap(2, 2)
        col = jax.lax.broadcasted_iota(jnp.int32, (H * W, 1), 0) % W
        acc = (acc_m
               + jnp.where(col == 0, 0.0, acc_l)
               + jnp.where(col == W - 1, 0.0, acc_r))
        h2 = jnp.maximum(acc + t2_ref[...], 0.0)                   # (H*W, P)

        # ---- AvgPool2d(stride): width pass (strided), height pass (contig) --
        if s > 1:
            h2s_ref[...] = h2
            wsum = h2s_ref[pl.ds(0, H * Wo, stride=s), :]
            for dj in range(1, s):
                wsum = wsum + h2s_ref[pl.ds(dj, H * Wo, stride=s), :]
            wps_ref[...] = wsum                                    # (H*Wo, P)
            for io in range(Ho):
                row = wps_ref[pl.ds(io * s * Wo, Wo), :]
                for di in range(1, s):
                    row = row + wps_ref[pl.ds((io * s + di) * Wo, Wo), :]
                p2s_ref[pl.ds(io * Wo, Wo), :] = row * inv_pool
            p2 = p2s_ref[...]                                      # (Ho*Wo, P)
        else:
            p2 = h2

        # ---- conv3 (1x1, scale-folded) + bias --------------------------------
        out3 = jnp.dot(p2.astype(w3_ref.dtype), w3_ref[...],
                       preferred_element_type=jnp.float32) + t3_ref[...]

        # ---- identity / downsample branch ------------------------------------
        if has_downsample:
            if s > 1:
                xw = x_ref[pl.ds(0, H * Wo, stride=s), :].astype(jnp.float32)
                for dj in range(1, s):
                    xw = xw + x_ref[pl.ds(dj, H * Wo, stride=s),
                                    :].astype(jnp.float32)
                xws_ref[...] = xw
                for io in range(Ho):
                    row = xws_ref[pl.ds(io * s * Wo, Wo), :]
                    for di in range(1, s):
                        row = row + xws_ref[pl.ds((io * s + di) * Wo, Wo), :]
                    xps_ref[pl.ds(io * Wo, Wo), :] = row * inv_pool
                xp = xps_ref[...]
            else:
                xp = x_ref[...]
            ident = jnp.dot(xp.astype(wd_ref.dtype), wd_ref[...],
                            preferred_element_type=jnp.float32) + td_ref[...]
        else:
            # module guarantees Cin == 4*planes and stride == 1 here
            ident = x_ref[...].astype(jnp.float32)

        # ---- residual add + ReLU ---------------------------------------------
        o_ref[...] = jnp.maximum(out3 + ident, 0.0).astype(o_ref.dtype)

    return kernel


def bottleneck_forward(x_nhwc, params, *, stride=1, compute_dtype=None):
    """x_nhwc: (N, H, W, Cin). params: kernel-layout weights + folded BN.
    Returns (N, H//stride, W//stride, 4*planes) in NHWC."""
    N, H, W, Cin = x_nhwc.shape
    P = params["w1"].shape[1]
    C3 = params["w3"].shape[1]
    assert C3 == 4 * P
    assert H % stride == 0 and W % stride == 0
    has_downsample = (stride > 1) or (Cin != C3)
    if has_downsample:
        assert "wd" in params
    Ho, Wo = H // stride, W // stride

    def cvt(w):  # optional bf16 GEMM inputs (accumulation stays f32 in-kernel)
        return w.astype(compute_dtype) if compute_dtype is not None else w

    # Fold the BN scale (running-stats) into the conv weights host-side; only
    # the per-channel bias remains as an in-kernel add.
    w1f = cvt(params["w1"] * params["s1"])             # (Cin, P)
    w2f = cvt(params["w2"] * params["s2"][None])       # (9, P, P), scales Cout
    w3f = cvt(params["w3"] * params["s3"])             # (P, C3)

    x3 = x_nhwc.reshape(N, H * W, Cin)                 # channels on lane axis

    inputs = [x3, w1f, params["t1"], w2f, params["t2"], w3f, params["t3"]]
    # Weight/bias specs have constant index maps; the compiler keeps them
    # VMEM-resident across the batch grid (tiny for conv weights).
    in_specs = [
        pl.BlockSpec((None, H * W, Cin), lambda n: (n, 0, 0)),
        pl.BlockSpec((Cin, P), lambda n: (0, 0)),
        pl.BlockSpec((1, P), lambda n: (0, 0)),
        pl.BlockSpec((9, P, P), lambda n: (0, 0, 0)),
        pl.BlockSpec((1, P), lambda n: (0, 0)),
        pl.BlockSpec((P, C3), lambda n: (0, 0)),
        pl.BlockSpec((1, C3), lambda n: (0, 0)),
    ]
    if has_downsample:
        wdf = cvt(params["wd"] * params["sd"])
        inputs += [wdf, params["td"]]
        in_specs += [
            pl.BlockSpec((Cin, C3), lambda n: (0, 0)),
            pl.BlockSpec((1, C3), lambda n: (0, 0)),
        ]

    scratch_shapes = [
        pltpu.VMEM((_LEAD + (H + 2) * W + 8, P), jnp.float32),  # padded conv1
    ]
    if stride > 1:
        scratch_shapes += [
            pltpu.VMEM((H * W, P), jnp.float32),        # conv2 + BN + ReLU
            pltpu.VMEM((H * Wo, P), jnp.float32),       # width-pooled main
            pltpu.VMEM((Ho * Wo, P), jnp.float32),      # pooled main branch
            pltpu.VMEM((H * Wo, Cin), jnp.float32),     # width-pooled identity
            pltpu.VMEM((Ho * Wo, Cin), jnp.float32),    # pooled identity
        ]

    kernel = _make_bottleneck_kernel(H, W, stride, has_downsample)

    out = pl.pallas_call(
        kernel,
        out_shape=jax.ShapeDtypeStruct((N, Ho * Wo, C3), x_nhwc.dtype),
        grid_spec=pltpu.PrefetchScalarGridSpec(
            num_scalar_prefetch=0,
            grid=(N,),
            in_specs=in_specs,
            out_specs=pl.BlockSpec((None, Ho * Wo, C3), lambda n: (n, 0, 0)),
            scratch_shapes=scratch_shapes,
        ),
        compiler_params=pltpu.CompilerParams(
            dimension_semantics=("parallel",)),
    )(*inputs)
    return out.reshape(N, Ho, Wo, C3)


# ------------------------- params / reference -------------------------------

def fold_bn(gamma, beta, mean, var, eps=1e-5):
    scale = gamma / jnp.sqrt(var + eps)
    bias = beta - mean * scale
    return scale.reshape(1, -1), bias.reshape(1, -1)


def init_params(key, inplanes, planes, stride, dtype=jnp.float32):
    expansion = 4
    c3 = planes * expansion
    has_downsample = (stride > 1) or (inplanes != c3)
    keys = jax.random.split(key, 8)

    def rand_w(k, shape, fan_in):
        lim = 1.0 / jnp.sqrt(fan_in)
        return jax.random.uniform(k, shape, dtype, -lim, lim)

    def rand_bn(k, c):
        k1, k2, k3, k4 = jax.random.split(k, 4)
        gamma = jax.random.uniform(k1, (c,), dtype, 0.5, 1.5)
        beta = 0.1 * jax.random.normal(k2, (c,), dtype)
        mean = 0.1 * jax.random.normal(k3, (c,), dtype)
        var = jax.random.uniform(k4, (c,), dtype, 0.5, 1.5)
        return fold_bn(gamma, beta, mean, var)

    p = {}
    p["w1"] = rand_w(keys[0], (inplanes, planes), inplanes)       # 1x1, [Cin, Cout]
    p["s1"], p["t1"] = rand_bn(keys[1], planes)
    p["w2"] = rand_w(keys[2], (9, planes, planes), 9 * planes)    # 3x3 taps [ky*3+kx, Cin, Cout]
    p["s2"], p["t2"] = rand_bn(keys[3], planes)
    p["w3"] = rand_w(keys[4], (planes, c3), planes)
    p["s3"], p["t3"] = rand_bn(keys[5], c3)
    if has_downsample:
        p["wd"] = rand_w(keys[6], (inplanes, c3), inplanes)
        p["sd"], p["td"] = rand_bn(keys[7], c3)
    return p


def bottleneck_ref(x, p, stride):
    """Plain-JAX NHWC reference of the eval-mode Bottleneck forward."""
    hi = jax.lax.Precision.HIGHEST

    def bn(y, scale, bias):
        return y * scale.reshape(1, 1, 1, -1) + bias.reshape(1, 1, 1, -1)

    def pool(y, s):
        if s == 1:
            return y
        n, h, w, c = y.shape
        return y.reshape(n, h // s, s, w // s, s, c).mean(axis=(2, 4))

    h = jax.nn.relu(bn(jnp.einsum("nhwc,co->nhwo", x, p["w1"], precision=hi),
                       p["s1"], p["t1"]))
    k = p["w2"].reshape(3, 3, p["w2"].shape[1], p["w2"].shape[2])   # HWIO
    h = jax.lax.conv_general_dilated(h, k, window_strides=(1, 1), padding="SAME",
                                     dimension_numbers=("NHWC", "HWIO", "NHWC"),
                                     precision=hi)
    h = jax.nn.relu(bn(h, p["s2"], p["t2"]))
    h = pool(h, stride)
    out = bn(jnp.einsum("nhwc,co->nhwo", h, p["w3"], precision=hi),
             p["s3"], p["t3"])
    if "wd" in p:
        ident = bn(jnp.einsum("nhwc,co->nhwo", pool(x, stride), p["wd"],
                              precision=hi), p["sd"], p["td"])
    else:
        ident = x
    return jax.nn.relu(out + ident)


if __name__ == "__main__":
    key = jax.random.PRNGKey(0)
    batch = 2

    # (inplanes, planes, stride, H, W): covers downsample+avgpool (stride=2),
    # downsample-only (stride=1, Cin != 4*planes), and pure identity skip.
    configs = [
        (16, 8, 2, 16, 16),
        (16, 8, 1, 16, 16),
        (32, 8, 1, 16, 16),
    ]

    for idx, (inplanes, planes, stride, H, W) in enumerate(configs):
        kx, kp = jax.random.split(jax.random.fold_in(key, idx))
        x = jax.random.normal(kx, (batch, H, W, inplanes), dtype=jnp.float32)
        params = init_params(kp, inplanes, planes, stride)

        out = bottleneck_forward(x, params, stride=stride)
        out = jax.block_until_ready(out)
        ref = bottleneck_ref(x, params, stride)
        assert out.shape == ref.shape
        err = float(jnp.max(jnp.abs(out - ref)))
        assert jnp.allclose(out, ref, atol=5e-3, rtol=5e-3), \
            f"config {idx}: max abs err {err}"

    # bf16-GEMM path (f32 accumulation) — looser tolerance.
    inplanes, planes, stride, H, W = configs[0]
    kx, kp = jax.random.split(jax.random.fold_in(key, 0))
    x = jax.random.normal(kx, (batch, H, W, inplanes), dtype=jnp.float32)
    params = init_params(kp, inplanes, planes, stride)
    out_bf16 = bottleneck_forward(x, params, stride=stride,
                                  compute_dtype=jnp.bfloat16)
    out_bf16 = jax.block_until_ready(out_bf16)
    ref = bottleneck_ref(x, params, stride)
    assert jnp.allclose(out_bf16, ref, atol=0.1, rtol=0.1), \
        f"bf16 path: max abs err {float(jnp.max(jnp.abs(out_bf16 - ref)))}"

    print("KERNEL_OK")
</pallas_src>

<mosaic_0001>
module attributes {stable_mosaic.version = 11 : i64} {
  func.func @kernel(%arg0: i32, %arg1: memref<1x256x16xf32, #tpu.memory_space<vmem>>, %arg2: memref<16x8xf32, #tpu.memory_space<vmem>>, %arg3: memref<1x8xf32, #tpu.memory_space<vmem>>, %arg4: memref<9x8x8xf32, #tpu.memory_space<vmem>>, %arg5: memref<1x8xf32, #tpu.memory_space<vmem>>, %arg6: memref<8x32xf32, #tpu.memory_space<vmem>>, %arg7: memref<1x32xf32, #tpu.memory_space<vmem>>, %arg8: memref<16x32xf32, #tpu.memory_space<vmem>>, %arg9: memref<1x32xf32, #tpu.memory_space<vmem>>, %arg10: memref<1x64x32xf32, #tpu.memory_space<vmem>>, %arg11: memref<304x8xf32, #tpu.memory_space<vmem>>, %arg12: memref<256x8xf32, #tpu.memory_space<vmem>>, %arg13: memref<128x8xf32, #tpu.memory_space<vmem>>, %arg14: memref<64x8xf32, #tpu.memory_space<vmem>>, %arg15: memref<128x16xf32, #tpu.memory_space<vmem>>, %arg16: memref<64x16xf32, #tpu.memory_space<vmem>>) attributes {dimension_semantics = [#tpu.dimension_semantics<parallel>], iteration_bounds = array<i64: 2>, scalar_prefetch = 0 : i64, scratch_operands = 6 : i64, tpu.core_type = #tpu.core_type<tc>, window_params = [{transform_indices = @transform_0, window_bounds = array<i64: 1, 256, 16>}, {pipeline_mode = #tpu.pipeline_mode<synchronous>, transform_indices = @transform_1, window_bounds = array<i64: 16, 8>}, {pipeline_mode = #tpu.pipeline_mode<synchronous>, transform_indices = @transform_2, window_bounds = array<i64: 1, 8>}, {pipeline_mode = #tpu.pipeline_mode<synchronous>, transform_indices = @transform_3, window_bounds = array<i64: 9, 8, 8>}, {pipeline_mode = #tpu.pipeline_mode<synchronous>, transform_indices = @transform_4, window_bounds = array<i64: 1, 8>}, {pipeline_mode = #tpu.pipeline_mode<synchronous>, transform_indices = @transform_5, window_bounds = array<i64: 8, 32>}, {pipeline_mode = #tpu.pipeline_mode<synchronous>, transform_indices = @transform_6, window_bounds = array<i64: 1, 32>}, {pipeline_mode = #tpu.pipeline_mode<synchronous>, transform_indices = @transform_7, window_bounds = array<i64: 16, 32>}, {pipeline_mode = #tpu.pipeline_mode<synchronous>, transform_indices = @transform_8, window_bounds = array<i64: 1, 32>}, {transform_indices = @transform_9, window_bounds = array<i64: 1, 64, 32>}]} {
    %c0 = arith.constant 0 : index
    %c0_0 = arith.constant 0 : index
    %c0_1 = arith.constant 0 : index
    %0 = vector.load %arg1[%c0, %c0_0, %c0_1] : memref<1x256x16xf32, #tpu.memory_space<vmem>>, vector<1x256x16xf32>
    %1 = vector.shape_cast %0 : vector<1x256x16xf32> to vector<256x16xf32>
    %c0_2 = arith.constant 0 : index
    %c0_3 = arith.constant 0 : index
    %2 = vector.load %arg2[%c0_2, %c0_3] : memref<16x8xf32, #tpu.memory_space<vmem>>, vector<16x8xf32>
    %cst = arith.constant dense<0.000000e+00> : vector<256x8xf32>
    %3 = tpu.matmul %1, %2, %cst {dimension_numbers = #tpu.dot_dimension_numbers<[1], [0], [0], [1], [0, 0, 1, 1], [], []>} : vector<256x16xf32>, vector<16x8xf32>, vector<256x8xf32> -> vector<256x8xf32>
    %c0_4 = arith.constant 0 : index
    %c0_5 = arith.constant 0 : index
    %4 = vector.load %arg3[%c0_4, %c0_5] : memref<1x8xf32, #tpu.memory_space<vmem>>, vector<1x8xf32>
    %5 = vector.broadcast %4 : vector<1x8xf32> to vector<256x8xf32>
    %6 = arith.addf %3, %5 : vector<256x8xf32>
    %cst_6 = arith.constant 0.000000e+00 : f32
    %7 = vector.broadcast %cst_6 : f32 to vector<256x8xf32>
    %8 = arith.maximumf %6, %7 : vector<256x8xf32>
    %cst_7 = arith.constant 0.000000e+00 : f32
    %9 = vector.broadcast %cst_7 : f32 to vector<24x8xf32>
    %c0_8 = arith.constant 0 : index
    %c0_9 = arith.constant 0 : index
    %10 = vector.load %arg11[%c0_8, %c0_9] : memref<304x8xf32, #tpu.memory_space<vmem>>, vector<24x8xf32>
    tpu.vector_store %arg11[%c0_8, %c0_9], %9 {strides = array<i32>} : memref<304x8xf32, #tpu.memory_space<vmem>>, vector<24x8xf32>,
    %c24 = arith.constant 24 : index
    %c0_10 = arith.constant 0 : index
    %11 = vector.load %arg11[%c24, %c0_10] : memref<304x8xf32, #tpu.memory_space<vmem>>, vector<256x8xf32>
    tpu.vector_store %arg11[%c24, %c0_10], %8 {strides = array<i32>} : memref<304x8xf32, #tpu.memory_space<vmem>>, vector<256x8xf32>,
    %cst_11 = arith.constant 0.000000e+00 : f32
    %12 = vector.broadcast %cst_11 : f32 to vector<24x8xf32>
    %c280 = arith.constant 280 : index
    %c0_12 = arith.constant 0 : index
    %13 = vector.load %arg11[%c280, %c0_12] : memref<304x8xf32, #tpu.memory_space<vmem>>, vector<24x8xf32>
    tpu.vector_store %arg11[%c280, %c0_12], %12 {strides = array<i32>} : memref<304x8xf32, #tpu.memory_space<vmem>>, vector<24x8xf32>,
    %c8 = arith.constant 8 : index
    %c0_13 = arith.constant 0 : index
    %14 = vector.load %arg11[%c8, %c0_13] : memref<304x8xf32, #tpu.memory_space<vmem>>, vector<256x8xf32>
    %c1 = arith.constant 1 : index
    %c0_14 = arith.constant 0 : index
    %c0_15 = arith.constant 0 : index
    %15 = vector.load %arg4[%c1, %c0_14, %c0_15] : memref<9x8x8xf32, #tpu.memory_space<vmem>>, vector<1x8x8xf32>
    %16 = vector.shape_cast %15 : vector<1x8x8xf32> to vector<8x8xf32>
    %cst_16 = arith.constant dense<0.000000e+00> : vector<256x8xf32>
    %17 = tpu.matmul %14, %16, %cst_16 {dimension_numbers = #tpu.dot_dimension_numbers<[1], [0], [0], [1], [0, 0, 1, 1], [], []>} : vector<256x8xf32>, vector<8x8xf32>, vector<256x8xf32> -> vector<256x8xf32>
    %c24_17 = arith.constant 24 : index
    %c0_18 = arith.constant 0 : index
    %18 = vector.load %arg11[%c24_17, %c0_18] : memref<304x8xf32, #tpu.memory_space<vmem>>, vector<256x8xf32>
    %c4 = arith.constant 4 : index
    %c0_19 = arith.constant 0 : index
    %c0_20 = arith.constant 0 : index
    %19 = vector.load %arg4[%c4, %c0_19, %c0_20] : memref<9x8x8xf32, #tpu.memory_space<vmem>>, vector<1x8x8xf32>
    %20 = vector.shape_cast %19 : vector<1x8x8xf32> to vector<8x8xf32>
    %cst_21 = arith.constant dense<0.000000e+00> : vector<256x8xf32>
    %21 = tpu.matmul %18, %20, %cst_21 {dimension_numbers = #tpu.dot_dimension_numbers<[1], [0], [0], [1], [0, 0, 1, 1], [], []>} : vector<256x8xf32>, vector<8x8xf32>, vector<256x8xf32> -> vector<256x8xf32>
    %22 = arith.addf %17, %21 : vector<256x8xf32>
    %c40 = arith.constant 40 : index
    %c0_22 = arith.constant 0 : index
    %23 = vector.load %arg11[%c40, %c0_22] : memref<304x8xf32, #tpu.memory_space<vmem>>, vector<256x8xf32>
    %c7 = arith.constant 7 : index
    %c0_23 = arith.constant 0 : index
    %c0_24 = arith.constant 0 : index
    %24 = vector.load %arg4[%c7, %c0_23, %c0_24] : memref<9x8x8xf32, #tpu.memory_space<vmem>>, vector<1x8x8xf32>
    %25 = vector.shape_cast %24 : vector<1x8x8xf32> to vector<8x8xf32>
    %cst_25 = arith.constant dense<0.000000e+00> : vector<256x8xf32>
    %26 = tpu.matmul %23, %25, %cst_25 {dimension_numbers = #tpu.dot_dimension_numbers<[1], [0], [0], [1], [0, 0, 1, 1], [], []>} : vector<256x8xf32>, vector<8x8xf32>, vector<256x8xf32> -> vector<256x8xf32>
    %27 = arith.addf %22, %26 : vector<256x8xf32>
    %c7_26 = arith.constant 7 : index
    %c0_27 = arith.constant 0 : index
    %28 = vector.load %arg11[%c7_26, %c0_27] : memref<304x8xf32, #tpu.memory_space<vmem>>, vector<256x8xf32>
    %c0_28 = arith.constant 0 : index
    %c0_29 = arith.constant 0 : index
    %c0_30 = arith.constant 0 : index
    %29 = vector.load %arg4[%c0_28, %c0_29, %c0_30] : memref<9x8x8xf32, #tpu.memory_space<vmem>>, vector<1x8x8xf32>
    %30 = vector.shape_cast %29 : vector<1x8x8xf32> to vector<8x8xf32>
    %cst_31 = arith.constant dense<0.000000e+00> : vector<256x8xf32>
    %31 = tpu.matmul %28, %30, %cst_31 {dimension_numbers = #tpu.dot_dimension_numbers<[1], [0], [0], [1], [0, 0, 1, 1], [], []>} : vector<256x8xf32>, vector<8x8xf32>, vector<256x8xf32> -> vector<256x8xf32>
    %c23 = arith.constant 23 : index
    %c0_32 = arith.constant 0 : index
    %32 = vector.load %arg11[%c23, %c0_32] : memref<304x8xf32, #tpu.memory_space<vmem>>, vector<256x8xf32>
    %c3 = arith.constant 3 : index
    %c0_33 = arith.constant 0 : index
    %c0_34 = arith.constant 0 : index
    %33 = vector.load %arg4[%c3, %c0_33, %c0_34] : memref<9x8x8xf32, #tpu.memory_space<vmem>>, vector<1x8x8xf32>
    %34 = vector.shape_cast %33 : vector<1x8x8xf32> to vector<8x8xf32>
    %cst_35 = arith.constant dense<0.000000e+00> : vector<256x8xf32>
    %35 = tpu.matmul %32, %34, %cst_35 {dimension_numbers = #tpu.dot_dimension_numbers<[1], [0], [0], [1], [0, 0, 1, 1], [], []>} : vector<256x8xf32>, vector<8x8xf32>, vector<256x8xf32> -> vector<256x8xf32>
    %36 = arith.addf %31, %35 : vector<256x8xf32>
    %c39 = arith.constant 39 : index
    %c0_36 = arith.constant 0 : index
    %37 = vector.load %arg11[%c39, %c0_36] : memref<304x8xf32, #tpu.memory_space<vmem>>, vector<256x8xf32>
    %c6 = arith.constant 6 : index
    %c0_37 = arith.constant 0 : index
    %c0_38 = arith.constant 0 : index
    %38 = vector.load %arg4[%c6, %c0_37, %c0_38] : memref<9x8x8xf32, #tpu.memory_space<vmem>>, vector<1x8x8xf32>
    %39 = vector.shape_cast %38 : vector<1x8x8xf32> to vector<8x8xf32>
    %cst_39 = arith.constant dense<0.000000e+00> : vector<256x8xf32>
    %40 = tpu.matmul %37, %39, %cst_39 {dimension_numbers = #tpu.dot_dimension_numbers<[1], [0], [0], [1], [0, 0, 1, 1], [], []>} : vector<256x8xf32>, vector<8x8xf32>, vector<256x8xf32> -> vector<256x8xf32>
    %41 = arith.addf %36, %40 : vector<256x8xf32>
    %c9 = arith.constant 9 : index
    %c0_40 = arith.constant 0 : index
    %42 = vector.load %arg11[%c9, %c0_40] : memref<304x8xf32, #tpu.memory_space<vmem>>, vector<256x8xf32>
    %c2 = arith.constant 2 : index
    %c0_41 = arith.constant 0 : index
    %c0_42 = arith.constant 0 : index
    %43 = vector.load %arg4[%c2, %c0_41, %c0_42] : memref<9x8x8xf32, #tpu.memory_space<vmem>>, vector<1x8x8xf32>
    %44 = vector.shape_cast %43 : vector<1x8x8xf32> to vector<8x8xf32>
    %cst_43 = arith.constant dense<0.000000e+00> : vector<256x8xf32>
    %45 = tpu.matmul %42, %44, %cst_43 {dimension_numbers = #tpu.dot_dimension_numbers<[1], [0], [0], [1], [0, 0, 1, 1], [], []>} : vector<256x8xf32>, vector<8x8xf32>, vector<256x8xf32> -> vector<256x8xf32>
    %c25 = arith.constant 25 : index
    %c0_44 = arith.constant 0 : index
    %46 = vector.load %arg11[%c25, %c0_44] : memref<304x8xf32, #tpu.memory_space<vmem>>, vector<256x8xf32>
    %c5 = arith.constant 5 : index
    %c0_45 = arith.constant 0 : index
    %c0_46 = arith.constant 0 : index
    %47 = vector.load %arg4[%c5, %c0_45, %c0_46] : memref<9x8x8xf32, #tpu.memory_space<vmem>>, vector<1x8x8xf32>
    %48 = vector.shape_cast %47 : vector<1x8x8xf32> to vector<8x8xf32>
    %cst_47 = arith.constant dense<0.000000e+00> : vector<256x8xf32>
    %49 = tpu.matmul %46, %48, %cst_47 {dimension_numbers = #tpu.dot_dimension_numbers<[1], [0], [0], [1], [0, 0, 1, 1], [], []>} : vector<256x8xf32>, vector<8x8xf32>, vector<256x8xf32> -> vector<256x8xf32>
    %50 = arith.addf %45, %49 : vector<256x8xf32>
    %c41 = arith.constant 41 : index
    %c0_48 = arith.constant 0 : index
    %51 = vector.load %arg11[%c41, %c0_48] : memref<304x8xf32, #tpu.memory_space<vmem>>, vector<256x8xf32>
    %c8_49 = arith.constant 8 : index
    %c0_50 = arith.constant 0 : index
    %c0_51 = arith.constant 0 : index
    %52 = vector.load %arg4[%c8_49, %c0_50, %c0_51] : memref<9x8x8xf32, #tpu.memory_space<vmem>>, vector<1x8x8xf32>
    %53 = vector.shape_cast %52 : vector<1x8x8xf32> to vector<8x8xf32>
    %cst_52 = arith.constant dense<0.000000e+00> : vector<256x8xf32>
    %54 = tpu.matmul %51, %53, %cst_52 {dimension_numbers = #tpu.dot_dimension_numbers<[1], [0], [0], [1], [0, 0, 1, 1], [], []>} : vector<256x8xf32>, vector<8x8xf32>, vector<256x8xf32> -> vector<256x8xf32>
    %55 = arith.addf %50, %54 : vector<256x8xf32>
    %56 = tpu.iota {dimensions = array<i32: 0>} : vector<256x1xi32>
    %c16_i32 = arith.constant 16 : i32
    %c0_i32 = arith.constant 0 : i32
    %57 = arith.cmpi eq, %c16_i32, %c0_i32 : i32
    %c1_i32 = arith.constant 1 : i32
    %58 = arith.select %57, %c1_i32, %c16_i32 : i32
    %59 = vector.broadcast %58 : i32 to vector<256x1xi32>
    %60 = arith.remsi %56, %59 : vector<256x1xi32>
    %c0_i32_53 = arith.constant 0 : i32
    %61 = vector.broadcast %c0_i32_53 : i32 to vector<256x1xi32>
    %62 = arith.cmpi ne, %60, %61 : vector<256x1xi32>
    %c0_i32_54 = arith.constant 0 : i32
    %63 = vector.broadcast %c0_i32_54 : i32 to vector<256x1xi32>
    %64 = arith.cmpi slt, %60, %63 : vector<256x1xi32>
    %c0_i32_55 = arith.constant 0 : i32
    %65 = arith.cmpi slt, %58, %c0_i32_55 : i32
    %66 = vector.broadcast %65 : i1 to vector<256x1xi1>
    %67 = vector.broadcast %66 : vector<256x1xi1> to vector<256x1xi1>
    %68 = arith.xori %64, %67 : vector<256x1xi1>
    %69 = arith.andi %68, %62 : vector<256x1xi1>
    %70 = vector.broadcast %58 : i32 to vector<256x1xi32>
    %71 = arith.addi %60, %70 : vector<256x1xi32>
    %72 = arith.select %69, %71, %60 : vector<256x1xi1>, vector<256x1xi32>
    %c0_i32_56 = arith.constant 0 : i32
    %73 = vector.broadcast %c0_i32_56 : i32 to vector<256x1xi32>
    %74 = arith.cmpi eq, %72, %73 : vector<256x1xi32>
    %cst_57 = arith.constant 0.000000e+00 : f32
    %75 = vector.shape_cast %74 : vector<256x1xi1> to vector<256x1xi1>
    %76 = vector.broadcast %75 : vector<256x1xi1> to vector<256x8xi1>
    %77 = vector.broadcast %cst_57 : f32 to vector<256x8xf32>
    %78 = arith.select %76, %77, %41 : vector<256x8xi1>, vector<256x8xf32>
    %79 = arith.addf %27, %78 : vector<256x8xf32>
    %c15_i32 = arith.constant 15 : i32
    %80 = vector.broadcast %c15_i32 : i32 to vector<256x1xi32>
    %81 = arith.cmpi eq, %72, %80 : vector<256x1xi32>
    %cst_58 = arith.constant 0.000000e+00 : f32
    %82 = vector.shape_cast %81 : vector<256x1xi1> to vector<256x1xi1>
    %83 = vector.broadcast %82 : vector<256x1xi1> to vector<256x8xi1>
    %84 = vector.broadcast %cst_58 : f32 to vector<256x8xf32>
    %85 = arith.select %83, %84, %55 : vector<256x8xi1>, vector<256x8xf32>
    %86 = arith.addf %79, %85 : vector<256x8xf32>
    %c0_59 = arith.constant 0 : index
    %c0_60 = arith.constant 0 : index
    %87 = vector.load %arg5[%c0_59, %c0_60] : memref<1x8xf32, #tpu.memory_space<vmem>>, vector<1x8xf32>
    %88 = vector.broadcast %87 : vector<1x8xf32> to vector<256x8xf32>
    %89 = arith.addf %86, %88 : vector<256x8xf32>
    %cst_61 = arith.constant 0.000000e+00 : f32
    %90 = vector.broadcast %cst_61 : f32 to vector<256x8xf32>
    %91 = arith.maximumf %89, %90 : vector<256x8xf32>
    %c0_62 = arith.constant 0 : index
    %c0_63 = arith.constant 0 : index
    %92 = vector.load %arg12[%c0_62, %c0_63] : memref<256x8xf32, #tpu.memory_space<vmem>>, vector<256x8xf32>
    tpu.vector_store %arg12[%c0_62, %c0_63], %91 {strides = array<i32>} : memref<256x8xf32, #tpu.memory_space<vmem>>, vector<256x8xf32>,
    %c0_64 = arith.constant 0 : index
    %c0_65 = arith.constant 0 : index
    %93 = tpu.strided_load %arg12[%c0_64, %c0_65] {strides = array<i32: 2, 1>} : memref<256x8xf32, #tpu.memory_space<vmem>>, vector<128x8xf32>
    %c1_66 = arith.constant 1 : index
    %c0_67 = arith.constant 0 : index
    %94 = tpu.strided_load %arg12[%c1_66, %c0_67] {strides = array<i32: 2, 1>} : memref<256x8xf32, #tpu.memory_space<vmem>>, vector<128x8xf32>
    %95 = arith.addf %93, %94 : vector<128x8xf32>
    %c0_68 = arith.constant 0 : index
    %c0_69 = arith.constant 0 : index
    %96 = vector.load %arg13[%c0_68, %c0_69] : memref<128x8xf32, #tpu.memory_space<vmem>>, vector<128x8xf32>
    tpu.vector_store %arg13[%c0_68, %c0_69], %95 {strides = array<i32>} : memref<128x8xf32, #tpu.memory_space<vmem>>, vector<128x8xf32>,
    %c0_70 = arith.constant 0 : index
    %c0_71 = arith.constant 0 : index
    %97 = vector.load %arg13[%c0_70, %c0_71] : memref<128x8xf32, #tpu.memory_space<vmem>>, vector<8x8xf32>
    %c8_72 = arith.constant 8 : index
    %c0_73 = arith.constant 0 : index
    %98 = vector.load %arg13[%c8_72, %c0_73] : memref<128x8xf32, #tpu.memory_space<vmem>>, vector<8x8xf32>
    %99 = arith.addf %97, %98 : vector<8x8xf32>
    %cst_74 = arith.constant 2.500000e-01 : f32
    %100 = vector.broadcast %cst_74 : f32 to vector<8x8xf32>
    %101 = arith.mulf %99, %100 : vector<8x8xf32>
    %c0_75 = arith.constant 0 : index
    %c0_76 = arith.constant 0 : index
    %102 = vector.load %arg14[%c0_75, %c0_76] : memref<64x8xf32, #tpu.memory_space<vmem>>, vector<8x8xf32>
    tpu.vector_store %arg14[%c0_75, %c0_76], %101 {strides = array<i32>} : memref<64x8xf32, #tpu.memory_space<vmem>>, vector<8x8xf32>,
    %c16 = arith.constant 16 : index
    %c0_77 = arith.constant 0 : index
    %103 = vector.load %arg13[%c16, %c0_77] : memref<128x8xf32, #tpu.memory_space<vmem>>, vector<8x8xf32>
    %c24_78 = arith.constant 24 : index
    %c0_79 = arith.constant 0 : index
    %104 = vector.load %arg13[%c24_78, %c0_79] : memref<128x8xf32, #tpu.memory_space<vmem>>, vector<8x8xf32>
    %105 = arith.addf %103, %104 : vector<8x8xf32>
    %cst_80 = arith.constant 2.500000e-01 : f32
    %106 = vector.broadcast %cst_80 : f32 to vector<8x8xf32>
    %107 = arith.mulf %105, %106 : vector<8x8xf32>
    %c8_81 = arith.constant 8 : index
    %c0_82 = arith.constant 0 : index
    %108 = vector.load %arg14[%c8_81, %c0_82] : memref<64x8xf32, #tpu.memory_space<vmem>>, vector<8x8xf32>
    tpu.vector_store %arg14[%c8_81, %c0_82], %107 {strides = array<i32>} : memref<64x8xf32, #tpu.memory_space<vmem>>, vector<8x8xf32>,
    %c32 = arith.constant 32 : index
    %c0_83 = arith.constant 0 : index
    %109 = vector.load %arg13[%c32, %c0_83] : memref<128x8xf32, #tpu.memory_space<vmem>>, vector<8x8xf32>
    %c40_84 = arith.constant 40 : index
    %c0_85 = arith.constant 0 : index
    %110 = vector.load %arg13[%c40_84, %c0_85] : memref<128x8xf32, #tpu.memory_space<vmem>>, vector<8x8xf32>
    %111 = arith.addf %109, %110 : vector<8x8xf32>
    %cst_86 = arith.constant 2.500000e-01 : f32
    %112 = vector.broadcast %cst_86 : f32 to vector<8x8xf32>
    %113 = arith.mulf %111, %112 : vector<8x8xf32>
    %c16_87 = arith.constant 16 : index
    %c0_88 = arith.constant 0 : index
    %114 = vector.load %arg14[%c16_87, %c0_88] : memref<64x8xf32, #tpu.memory_space<vmem>>, vector<8x8xf32>
    tpu.vector_store %arg14[%c16_87, %c0_88], %113 {strides = array<i32>} : memref<64x8xf32, #tpu.memory_space<vmem>>, vector<8x8xf32>,
    %c48 = arith.constant 48 : index
    %c0_89 = arith.constant 0 : index
    %115 = vector.load %arg13[%c48, %c0_89] : memref<128x8xf32, #tpu.memory_space<vmem>>, vector<8x8xf32>
    %c56 = arith.constant 56 : index
    %c0_90 = arith.constant 0 : index
    %116 = vector.load %arg13[%c56, %c0_90] : memref<128x8xf32, #tpu.memory_space<vmem>>, vector<8x8xf32>
    %117 = arith.addf %115, %116 : vector<8x8xf32>
    %cst_91 = arith.constant 2.500000e-01 : f32
    %118 = vector.broadcast %cst_91 : f32 to vector<8x8xf32>
    %119 = arith.mulf %117, %118 : vector<8x8xf32>
    %c24_92 = arith.constant 24 : index
    %c0_93 = arith.constant 0 : index
    %120 = vector.load %arg14[%c24_92, %c0_93] : memref<64x8xf32, #tpu.memory_space<vmem>>, vector<8x8xf32>
    tpu.vector_store %arg14[%c24_92, %c0_93], %119 {strides = array<i32>} : memref<64x8xf32, #tpu.memory_space<vmem>>, vector<8x8xf32>,
    %c64 = arith.constant 64 : index
    %c0_94 = arith.constant 0 : index
    %121 = vector.load %arg13[%c64, %c0_94] : memref<128x8xf32, #tpu.memory_space<vmem>>, vector<8x8xf32>
    %c72 = arith.constant 72 : index
    %c0_95 = arith.constant 0 : index
    %122 = vector.load %arg13[%c72, %c0_95] : memref<128x8xf32, #tpu.memory_space<vmem>>, vector<8x8xf32>
    %123 = arith.addf %121, %122 : vector<8x8xf32>
    %cst_96 = arith.constant 2.500000e-01 : f32
    %124 = vector.broadcast %cst_96 : f32 to vector<8x8xf32>
    %125 = arith.mulf %123, %124 : vector<8x8xf32>
    %c32_97 = arith.constant 32 : index
    %c0_98 = arith.constant 0 : index
    %126 = vector.load %arg14[%c32_97, %c0_98] : memref<64x8xf32, #tpu.memory_space<vmem>>, vector<8x8xf32>
    tpu.vector_store %arg14[%c32_97, %c0_98], %125 {strides = array<i32>} : memref<64x8xf32, #tpu.memory_space<vmem>>, vector<8x8xf32>,
    %c80 = arith.constant 80 : index
    %c0_99 = arith.constant 0 : index
    %127 = vector.load %arg13[%c80, %c0_99] : memref<128x8xf32, #tpu.memory_space<vmem>>, vector<8x8xf32>
    %c88 = arith.constant 88 : index
    %c0_100 = arith.constant 0 : index
    %128 = vector.load %arg13[%c88, %c0_100] : memref<128x8xf32, #tpu.memory_space<vmem>>, vector<8x8xf32>
    %129 = arith.addf %127, %128 : vector<8x8xf32>
    %cst_101 = arith.constant 2.500000e-01 : f32
    %130 = vector.broadcast %cst_101 : f32 to vector<8x8xf32>
    %131 = arith.mulf %129, %130 : vector<8x8xf32>
    %c40_102 = arith.constant 40 : index
    %c0_103 = arith.constant 0 : index
    %132 = vector.load %arg14[%c40_102, %c0_103] : memref<64x8xf32, #tpu.memory_space<vmem>>, vector<8x8xf32>
    tpu.vector_store %arg14[%c40_102, %c0_103], %131 {strides = array<i32>} : memref<64x8xf32, #tpu.memory_space<vmem>>, vector<8x8xf32>,
    %c96 = arith.constant 96 : index
    %c0_104 = arith.constant 0 : index
    %133 = vector.load %arg13[%c96, %c0_104] : memref<128x8xf32, #tpu.memory_space<vmem>>, vector<8x8xf32>
    %c104 = arith.constant 104 : index
    %c0_105 = arith.constant 0 : index
    %134 = vector.load %arg13[%c104, %c0_105] : memref<128x8xf32, #tpu.memory_space<vmem>>, vector<8x8xf32>
    %135 = arith.addf %133, %134 : vector<8x8xf32>
    %cst_106 = arith.constant 2.500000e-01 : f32
    %136 = vector.broadcast %cst_106 : f32 to vector<8x8xf32>
    %137 = arith.mulf %135, %136 : vector<8x8xf32>
    %c48_107 = arith.constant 48 : index
    %c0_108 = arith.constant 0 : index
    %138 = vector.load %arg14[%c48_107, %c0_108] : memref<64x8xf32, #tpu.memory_space<vmem>>, vector<8x8xf32>
    tpu.vector_store %arg14[%c48_107, %c0_108], %137 {strides = array<i32>} : memref<64x8xf32, #tpu.memory_space<vmem>>, vector<8x8xf32>,
    %c112 = arith.constant 112 : index
    %c0_109 = arith.constant 0 : index
    %139 = vector.load %arg13[%c112, %c0_109] : memref<128x8xf32, #tpu.memory_space<vmem>>, vector<8x8xf32>
    %c120 = arith.constant 120 : index
    %c0_110 = arith.constant 0 : index
    %140 = vector.load %arg13[%c120, %c0_110] : memref<128x8xf32, #tpu.memory_space<vmem>>, vector<8x8xf32>
    %141 = arith.addf %139, %140 : vector<8x8xf32>
    %cst_111 = arith.constant 2.500000e-01 : f32
    %142 = vector.broadcast %cst_111 : f32 to vector<8x8xf32>
    %143 = arith.mulf %141, %142 : vector<8x8xf32>
    %c56_112 = arith.constant 56 : index
    %c0_113 = arith.constant 0 : index
    %144 = vector.load %arg14[%c56_112, %c0_113] : memref<64x8xf32, #tpu.memory_space<vmem>>, vector<8x8xf32>
    tpu.vector_store %arg14[%c56_112, %c0_113], %143 {strides = array<i32>} : memref<64x8xf32, #tpu.memory_space<vmem>>, vector<8x8xf32>,
    %c0_114 = arith.constant 0 : index
    %c0_115 = arith.constant 0 : index
    %145 = vector.load %arg14[%c0_114, %c0_115] : memref<64x8xf32, #tpu.memory_space<vmem>>, vector<64x8xf32>
    %c0_116 = arith.constant 0 : index
    %c0_117 = arith.constant 0 : index
    %146 = vector.load %arg6[%c0_116, %c0_117] : memref<8x32xf32, #tpu.memory_space<vmem>>, vector<8x32xf32>
    %cst_118 = arith.constant dense<0.000000e+00> : vector<64x32xf32>
    %147 = tpu.matmul %145, %146, %cst_118 {dimension_numbers = #tpu.dot_dimension_numbers<[1], [0], [0], [1], [0, 0, 1, 1], [], []>} : vector<64x8xf32>, vector<8x32xf32>, vector<64x32xf32> -> vector<64x32xf32>
    %c0_119 = arith.constant 0 : index
    %c0_120 = arith.constant 0 : index
    %148 = vector.load %arg7[%c0_119, %c0_120] : memref<1x32xf32, #tpu.memory_space<vmem>>, vector<1x32xf32>
    %149 = vector.broadcast %148 : vector<1x32xf32> to vector<64x32xf32>
    %150 = arith.addf %147, %149 : vector<64x32xf32>
    %c0_121 = arith.constant 0 : index
    %c0_122 = arith.constant 0 : index
    %c0_123 = arith.constant 0 : index
    %151 = tpu.strided_load %arg1[%c0_121, %c0_122, %c0_123] {strides = array<i32: 1, 2, 1>} : memref<1x256x16xf32, #tpu.memory_space<vmem>>, vector<1x128x16xf32>
    %152 = vector.shape_cast %151 : vector<1x128x16xf32> to vector<128x16xf32>
    %c0_124 = arith.constant 0 : index
    %c1_125 = arith.constant 1 : index
    %c0_126 = arith.constant 0 : index
    %153 = tpu.strided_load %arg1[%c0_124, %c1_125, %c0_126] {strides = array<i32: 1, 2, 1>} : memref<1x256x16xf32, #tpu.memory_space<vmem>>, vector<1x128x16xf32>
    %154 = vector.shape_cast %153 : vector<1x128x16xf32> to vector<128x16xf32>
    %155 = arith.addf %152, %154 : vector<128x16xf32>
    %c0_127 = arith.constant 0 : index
    %c0_128 = arith.constant 0 : index
    %156 = vector.load %arg15[%c0_127, %c0_128] : memref<128x16xf32, #tpu.memory_space<vmem>>, vector<128x16xf32>
    tpu.vector_store %arg15[%c0_127, %c0_128], %155 {strides = array<i32>} : memref<128x16xf32, #tpu.memory_space<vmem>>, vector<128x16xf32>,
    %c0_129 = arith.constant 0 : index
    %c0_130 = arith.constant 0 : index
    %157 = vector.load %arg15[%c0_129, %c0_130] : memref<128x16xf32, #tpu.memory_space<vmem>>, vector<8x16xf32>
    %c8_131 = arith.constant 8 : index
    %c0_132 = arith.constant 0 : index
    %158 = vector.load %arg15[%c8_131, %c0_132] : memref<128x16xf32, #tpu.memory_space<vmem>>, vector<8x16xf32>
    %159 = arith.addf %157, %158 : vector<8x16xf32>
    %cst_133 = arith.constant 2.500000e-01 : f32
    %160 = vector.broadcast %cst_133 : f32 to vector<8x16xf32>
    %161 = arith.mulf %159, %160 : vector<8x16xf32>
    %c0_134 = arith.constant 0 : index
    %c0_135 = arith.constant 0 : index
    %162 = vector.load %arg16[%c0_134, %c0_135] : memref<64x16xf32, #tpu.memory_space<vmem>>, vector<8x16xf32>
    tpu.vector_store %arg16[%c0_134, %c0_135], %161 {strides = array<i32>} : memref<64x16xf32, #tpu.memory_space<vmem>>, vector<8x16xf32>,
    %c16_136 = arith.constant 16 : index
    %c0_137 = arith.constant 0 : index
    %163 = vector.load %arg15[%c16_136, %c0_137] : memref<128x16xf32, #tpu.memory_space<vmem>>, vector<8x16xf32>
    %c24_138 = arith.constant 24 : index
    %c0_139 = arith.constant 0 : index
    %164 = vector.load %arg15[%c24_138, %c0_139] : memref<128x16xf32, #tpu.memory_space<vmem>>, vector<8x16xf32>
    %165 = arith.addf %163, %164 : vector<8x16xf32>
    %cst_140 = arith.constant 2.500000e-01 : f32
    %166 = vector.broadcast %cst_140 : f32 to vector<8x16xf32>
    %167 = arith.mulf %165, %166 : vector<8x16xf32>
    %c8_141 = arith.constant 8 : index
    %c0_142 = arith.constant 0 : index
    %168 = vector.load %arg16[%c8_141, %c0_142] : memref<64x16xf32, #tpu.memory_space<vmem>>, vector<8x16xf32>
    tpu.vector_store %arg16[%c8_141, %c0_142], %167 {strides = array<i32>} : memref<64x16xf32, #tpu.memory_space<vmem>>, vector<8x16xf32>,
    %c32_143 = arith.constant 32 : index
    %c0_144 = arith.constant 0 : index
    %169 = vector.load %arg15[%c32_143, %c0_144] : memref<128x16xf32, #tpu.memory_space<vmem>>, vector<8x16xf32>
    %c40_145 = arith.constant 40 : index
    %c0_146 = arith.constant 0 : index
    %170 = vector.load %arg15[%c40_145, %c0_146] : memref<128x16xf32, #tpu.memory_space<vmem>>, vector<8x16xf32>
    %171 = arith.addf %169, %170 : vector<8x16xf32>
    %cst_147 = arith.constant 2.500000e-01 : f32
    %172 = vector.broadcast %cst_147 : f32 to vector<8x16xf32>
    %173 = arith.mulf %171, %172 : vector<8x16xf32>
    %c16_148 = arith.constant 16 : index
    %c0_149 = arith.constant 0 : index
    %174 = vector.load %arg16[%c16_148, %c0_149] : memref<64x16xf32, #tpu.memory_space<vmem>>, vector<8x16xf32>
    tpu.vector_store %arg16[%c16_148, %c0_149], %173 {strides = array<i32>} : memref<64x16xf32, #tpu.memory_space<vmem>>, vector<8x16xf32>,
    %c48_150 = arith.constant 48 : index
    %c0_151 = arith.constant 0 : index
    %175 = vector.load %arg15[%c48_150, %c0_151] : memref<128x16xf32, #tpu.memory_space<vmem>>, vector<8x16xf32>
    %c56_152 = arith.constant 56 : index
    %c0_153 = arith.constant 0 : index
    %176 = vector.load %arg15[%c56_152, %c0_153] : memref<128x16xf32, #tpu.memory_space<vmem>>, vector<8x16xf32>
    %177 = arith.addf %175, %176 : vector<8x16xf32>
    %cst_154 = arith.constant 2.500000e-01 : f32
    %178 = vector.broadcast %cst_154 : f32 to vector<8x16xf32>
    %179 = arith.mulf %177, %178 : vector<8x16xf32>
    %c24_155 = arith.constant 24 : index
    %c0_156 = arith.constant 0 : index
    %180 = vector.load %arg16[%c24_155, %c0_156] : memref<64x16xf32, #tpu.memory_space<vmem>>, vector<8x16xf32>
    tpu.vector_store %arg16[%c24_155, %c0_156], %179 {strides = array<i32>} : memref<64x16xf32, #tpu.memory_space<vmem>>, vector<8x16xf32>,
    %c64_157 = arith.constant 64 : index
    %c0_158 = arith.constant 0 : index
    %181 = vector.load %arg15[%c64_157, %c0_158] : memref<128x16xf32, #tpu.memory_space<vmem>>, vector<8x16xf32>
    %c72_159 = arith.constant 72 : index
    %c0_160 = arith.constant 0 : index
    %182 = vector.load %arg15[%c72_159, %c0_160] : memref<128x16xf32, #tpu.memory_space<vmem>>, vector<8x16xf32>
    %183 = arith.addf %181, %182 : vector<8x16xf32>
    %cst_161 = arith.constant 2.500000e-01 : f32
    %184 = vector.broadcast %cst_161 : f32 to vector<8x16xf32>
    %185 = arith.mulf %183, %184 : vector<8x16xf32>
    %c32_162 = arith.constant 32 : index
    %c0_163 = arith.constant 0 : index
    %186 = vector.load %arg16[%c32_162, %c0_163] : memref<64x16xf32, #tpu.memory_space<vmem>>, vector<8x16xf32>
    tpu.vector_store %arg16[%c32_162, %c0_163], %185 {strides = array<i32>} : memref<64x16xf32, #tpu.memory_space<vmem>>, vector<8x16xf32>,
    %c80_164 = arith.constant 80 : index
    %c0_165 = arith.constant 0 : index
    %187 = vector.load %arg15[%c80_164, %c0_165] : memref<128x16xf32, #tpu.memory_space<vmem>>, vector<8x16xf32>
    %c88_166 = arith.constant 88 : index
    %c0_167 = arith.constant 0 : index
    %188 = vector.load %arg15[%c88_166, %c0_167] : memref<128x16xf32, #tpu.memory_space<vmem>>, vector<8x16xf32>
    %189 = arith.addf %187, %188 : vector<8x16xf32>
    %cst_168 = arith.constant 2.500000e-01 : f32
    %190 = vector.broadcast %cst_168 : f32 to vector<8x16xf32>
    %191 = arith.mulf %189, %190 : vector<8x16xf32>
    %c40_169 = arith.constant 40 : index
    %c0_170 = arith.constant 0 : index
    %192 = vector.load %arg16[%c40_169, %c0_170] : memref<64x16xf32, #tpu.memory_space<vmem>>, vector<8x16xf32>
    tpu.vector_store %arg16[%c40_169, %c0_170], %191 {strides = array<i32>} : memref<64x16xf32, #tpu.memory_space<vmem>>, vector<8x16xf32>,
    %c96_171 = arith.constant 96 : index
    %c0_172 = arith.constant 0 : index
    %193 = vector.load %arg15[%c96_171, %c0_172] : memref<128x16xf32, #tpu.memory_space<vmem>>, vector<8x16xf32>
    %c104_173 = arith.constant 104 : index
    %c0_174 = arith.constant 0 : index
    %194 = vector.load %arg15[%c104_173, %c0_174] : memref<128x16xf32, #tpu.memory_space<vmem>>, vector<8x16xf32>
    %195 = arith.addf %193, %194 : vector<8x16xf32>
    %cst_175 = arith.constant 2.500000e-01 : f32
    %196 = vector.broadcast %cst_175 : f32 to vector<8x16xf32>
    %197 = arith.mulf %195, %196 : vector<8x16xf32>
    %c48_176 = arith.constant 48 : index
    %c0_177 = arith.constant 0 : index
    %198 = vector.load %arg16[%c48_176, %c0_177] : memref<64x16xf32, #tpu.memory_space<vmem>>, vector<8x16xf32>
    tpu.vector_store %arg16[%c48_176, %c0_177], %197 {strides = array<i32>} : memref<64x16xf32, #tpu.memory_space<vmem>>, vector<8x16xf32>,
    %c112_178 = arith.constant 112 : index
    %c0_179 = arith.constant 0 : index
    %199 = vector.load %arg15[%c112_178, %c0_179] : memref<128x16xf32, #tpu.memory_space<vmem>>, vector<8x16xf32>
    %c120_180 = arith.constant 120 : index
    %c0_181 = arith.constant 0 : index
    %200 = vector.load %arg15[%c120_180, %c0_181] : memref<128x16xf32, #tpu.memory_space<vmem>>, vector<8x16xf32>
    %201 = arith.addf %199, %200 : vector<8x16xf32>
    %cst_182 = arith.constant 2.500000e-01 : f32
    %202 = vector.broadcast %cst_182 : f32 to vector<8x16xf32>
    %203 = arith.mulf %201, %202 : vector<8x16xf32>
    %c56_183 = arith.constant 56 : index
    %c0_184 = arith.constant 0 : index
    %204 = vector.load %arg16[%c56_183, %c0_184] : memref<64x16xf32, #tpu.memory_space<vmem>>, vector<8x16xf32>
    tpu.vector_store %arg16[%c56_183, %c0_184], %203 {strides = array<i32>} : memref<64x16xf32, #tpu.memory_space<vmem>>, vector<8x16xf32>,
    %c0_185 = arith.constant 0 : index
    %c0_186 = arith.constant 0 : index
    %205 = vector.load %arg16[%c0_185, %c0_186] : memref<64x16xf32, #tpu.memory_space<vmem>>, vector<64x16xf32>
    %c0_187 = arith.constant 0 : index
    %c0_188 = arith.constant 0 : index
    %206 = vector.load %arg8[%c0_187, %c0_188] : memref<16x32xf32, #tpu.memory_space<vmem>>, vector<16x32xf32>
    %cst_189 = arith.constant dense<0.000000e+00> : vector<64x32xf32>
    %207 = tpu.matmul %205, %206, %cst_189 {dimension_numbers = #tpu.dot_dimension_numbers<[1], [0], [0], [1], [0, 0, 1, 1], [], []>} : vector<64x16xf32>, vector<16x32xf32>, vector<64x32xf32> -> vector<64x32xf32>
    %c0_190 = arith.constant 0 : index
    %c0_191 = arith.constant 0 : index
    %208 = vector.load %arg9[%c0_190, %c0_191] : memref<1x32xf32, #tpu.memory_space<vmem>>, vector<1x32xf32>
    %209 = vector.broadcast %208 : vector<1x32xf32> to vector<64x32xf32>
    %210 = arith.addf %207, %209 : vector<64x32xf32>
    %211 = arith.addf %150, %210 : vector<64x32xf32>
    %cst_192 = arith.constant 0.000000e+00 : f32
    %212 = vector.broadcast %cst_192 : f32 to vector<64x32xf32>
    %213 = arith.maximumf %211, %212 : vector<64x32xf32>
    %c0_193 = arith.constant 0 : index
    %c0_194 = arith.constant 0 : index
    %c0_195 = arith.constant 0 : index
    %214 = vector.load %arg10[%c0_193, %c0_194, %c0_195] : memref<1x64x32xf32, #tpu.memory_space<vmem>>, vector<1x64x32xf32>
    %215 = vector.shape_cast %214 : vector<1x64x32xf32> to vector<64x32xf32>
    %216 = vector.shape_cast %213 : vector<64x32xf32> to vector<1x64x32xf32>
    tpu.vector_store %arg10[%c0_193, %c0_194, %c0_195], %216 {strides = array<i32>} : memref<1x64x32xf32, #tpu.memory_space<vmem>>, vector<1x64x32xf32>,
    return
  }
  func.func @transform_0(%arg0: i32) -> (i32, i32, i32) {
    %c0_i32 = arith.constant 0 : i32
    %c0_i32_0 = arith.constant 0 : i32
    %c0_i32_1 = arith.constant 0 : i32
    return %arg0, %c0_i32, %c0_i32_0 : i32, i32, i32
  }
  func.func @transform_1(%arg0: i32) -> (i32, i32) {
    %c0_i32 = arith.constant 0 : i32
    %c0_i32_0 = arith.constant 0 : i32
    %c0_i32_1 = arith.constant 0 : i32
    return %c0_i32, %c0_i32_0 : i32, i32
  }
  func.func @transform_2(%arg0: i32) -> (i32, i32) {
    %c0_i32 = arith.constant 0 : i32
    %c0_i32_0 = arith.constant 0 : i32
    %c0_i32_1 = arith.constant 0 : i32
    return %c0_i32, %c0_i32_0 : i32, i32
  }
  func.func @transform_3(%arg0: i32) -> (i32, i32, i32) {
    %c0_i32 = arith.constant 0 : i32
    %c0_i32_0 = arith.constant 0 : i32
    %c0_i32_1 = arith.constant 0 : i32
    %c0_i32_2 = arith.constant 0 : i32
    return %c0_i32, %c0_i32_0, %c0_i32_1 : i32, i32, i32
  }
  func.func @transform_4(%arg0: i32) -> (i32, i32) {
    %c0_i32 = arith.constant 0 : i32
    %c0_i32_0 = arith.constant 0 : i32
    %c0_i32_1 = arith.constant 0 : i32
    return %c0_i32, %c0_i32_0 : i32, i32
  }
  func.func @transform_5(%arg0: i32) -> (i32, i32) {
    %c0_i32 = arith.constant 0 : i32
    %c0_i32_0 = arith.constant 0 : i32
    %c0_i32_1 = arith.constant 0 : i32
    return %c0_i32, %c0_i32_0 : i32, i32
  }
  func.func @transform_6(%arg0: i32) -> (i32, i32) {
    %c0_i32 = arith.constant 0 : i32
    %c0_i32_0 = arith.constant 0 : i32
    %c0_i32_1 = arith.constant 0 : i32
    return %c0_i32, %c0_i32_0 : i32, i32
  }
  func.func @transform_7(%arg0: i32) -> (i32, i32) {
    %c0_i32 = arith.constant 0 : i32
    %c0_i32_0 = arith.constant 0 : i32
    %c0_i32_1 = arith.constant 0 : i32
    return %c0_i32, %c0_i32_0 : i32, i32
  }
  func.func @transform_8(%arg0: i32) -> (i32, i32) {
    %c0_i32 = arith.constant 0 : i32
    %c0_i32_0 = arith.constant 0 : i32
    %c0_i32_1 = arith.constant 0 : i32
    return %c0_i32, %c0_i32_0 : i32, i32
  }
  func.func @transform_9(%arg0: i32) -> (i32, i32, i32) {
    %c0_i32 = arith.constant 0 : i32
    %c0_i32_0 = arith.constant 0 : i32
    %c0_i32_1 = arith.constant 0 : i32
    return %arg0, %c0_i32, %c0_i32_0 : i32, i32, i32
  }
}

</mosaic_0001>

<bundles_post_ra>
// kernel: tpu_custom_call.1
= control target key start
LH: loop header
LB: loop body
LE: loop exit
PB: predicated region body
PF: predicated region fallthrough
CT: control target
= control target key end

     0   :  { %s6746_s30 = smov 0   ;;  %s8289_s0 = inlined_call_operand.vmem [shape: f32[2,256,16], index: 0, kind: input, shape index: {}]   ;;  %s8290_s1 = inlined_call_operand.vmem [shape: f32[16,8], index: 1, kind: input, shape index: {}]   ;;  %s8291_s2 = inlined_call_operand.vmem [shape: f32[1,8], index: 2, kind: input, shape index: {}]   ;;  %s8292_s3 = inlined_call_operand.vmem [shape: f32[9,8,8], index: 3, kind: input, shape index: {}]   ;;  %s8293_s4 = inlined_call_operand.vmem [shape: f32[1,8], index: 4, kind: input, shape index: {}]   ;;  %s8294_s5 = inlined_call_operand.vmem [shape: f32[8,32], index: 5, kind: input, shape index: {}]   ;;  %s8295_s6 = inlined_call_operand.vmem [shape: f32[1,32], index: 6, kind: input, shape index: {}]   ;;  %s8296_s7 = inlined_call_operand.vmem [shape: f32[16,32], index: 7, kind: input, shape index: {}]   ;;  %s8297_s8 = inlined_call_operand.vmem [shape: f32[1,32], index: 8, kind: input, shape index: {}]   ;;  %s8298_s9 = inlined_call_operand.vmem [shape: f32[2,64,32], index: 9, kind: output, shape index: {}]  }
   0x1 LB: > { %s5178_s10 = sadd.s32 4294967295, %s6693_s30   ;;  %p5182_p0 = scmp.ge.s32.totalorder %s6693_s30, 1  ;;  %s6693_s30 = sphi %s6746_s30, %s19_s30  }
   0x2   : > { %p287_p1 = scmp.lt.s32.totalorder %s6693_s30, 3 }
   0x4   : > { %p288_p2 = pnand %p5182_p0, %p287_p1 }
   0x6   : > { %291 = sbr.rel (%p288_p2) target bundleno = 1109 (0x455), region = 56 }
   0xd   : > { %v365_v0 = vld [vmem:[%s8290_s1] sm:$0xff]  ;;  %v366_v1 = vld [vmem:[%s8290_s1 + $0x8] sm:$0xff]  ;;  %p323_p3 = scmp.lt.s32.totalorder %s5178_s10, 1  ;;  %vm374_vm0 = vcmask 130048   ;;  %vm728_vm1 = vcmask 64512   ;;  %v6695_v35 = vmov 0.0  }
   0xe   : > { %v6452_v2 = vpack.c.bf16 %v366_v1, %v365_v0  ;;  %731 = vst.msk [vmem:[#allocation2 + $0x10] sm:$0xff] %vm728_vm1, %v6695_v35  ;;  %729 = vst.msk [vmem:[#allocation2] sm:$0xff] %vm728_vm1, %v6695_v35  ;;  %v5221_v36 = vld [vmem:[%s8292_s3 + $0x20] sm:$0xff]  ;;  %v5319_v37 = vld [vmem:[%s8292_s3 + $0x18] sm:$0xff] }
   0xf   : > { %s8334_s10 = smov (!%p323_p3, %s5178_s10), 1  ;;  %730 = vst.msk [vmem:[#allocation2 + $0x8] sm:$0xff] %vm728_vm1, %v6695_v35  ;;  %764 = vst.msk [vmem:[#allocation2 + $0x118] sm:$0xff] %vm728_vm1, %v6695_v35  ;;  %6460 = vmatprep.subr.mxu1 %v5221_v36  ;;  %v6847_v38 = vld [vmem:[%s8292_s3 + $0x8] sm:$0xff]  ;;  %v6853_v39 = vld [vmem:[%s8291_s2] ss:$0 sm:$0xff] }
  0x10   : > { %6453 = vmatprep.subr.bf16.mxu0 %v6452_v2  ;;  %s5568_s15 = sshll.u32 %s8334_s10, 8  ;;  %765 = vst.msk [vmem:[#allocation2 + $0x120] sm:$0xff] %vm728_vm1, %v6695_v35  ;;  %766 = vst.msk [vmem:[#allocation2 + $0x128] sm:$0xff] %vm728_vm1, %v6695_v35  ;;  %6461 = vmatpush3.msra.mxu1 %v5221_v36  ;;  %v6878_v0 = vld [vmem:[%s8292_s3] sm:$0xff]  ;;  %s5569_s13 = sshll.u32 %s8334_s10, 6 }
  0x11   : > { %6455 = vmatpush3.bf16.msra.mxu0 %v6452_v2  ;;  %s6766_s18 = scalar_lea.vmem %s8289_s0, %s5568_s15  ;;  %6022 = vmatprep.subr.mxu1 %v6847_v38  ;;  %s332_s16 = scalar_lea.vmem %s8298_s9, %s5569_s13 }
  0x12   : > { %v333_v3 = vld [vmem:[%s6766_s18] sm:$0xff]  ;;  %v334_v4 = vld [vmem:[%s6766_s18 + $0x8] sm:$0xff]  ;;  %v335_v5 = vld [vmem:[%s6766_s18 + $0x10] sm:$0xff]  ;;  %5972 = vmatprep.subr.mxu0 %v5221_v36 }
  0x13   : > { %5924 = vmatprep.mubr.msk.f32.mxu0 %vm374_vm0, %v333_v3  ;;  %v336_v6 = vld [vmem:[%s6766_s18 + $0x18] sm:$0xff]  ;;  %v337_v7 = vld [vmem:[%s6766_s18 + $0x20] sm:$0xff]  ;;  %v338_v8 = vld [vmem:[%s6766_s18 + $0x28] sm:$0xff] }
  0x14   : > { %5925 = vmatmul.mubr.msk.f32.vlgmr.msra.gmra.mrb[0].mxu0 %vm374_vm0, %v334_v4  ;;  %v339_v9 = vld [vmem:[%s6766_s18 + $0x30] sm:$0xff]  ;;  %v340_v10 = vld [vmem:[%s6766_s18 + $0x38] sm:$0xff]  ;;  %v341_v11 = vld [vmem:[%s6766_s18 + $0x40] sm:$0xff] }
  0x15   : > { %5927 = vmatprep.mubr.msk.f32.mxu0 %vm374_vm0, %v335_v5  ;;  %v342_v12 = vld [vmem:[%s6766_s18 + $0x48] sm:$0xff]  ;;  %v343_v13 = vld [vmem:[%s6766_s18 + $0x50] sm:$0xff]  ;;  %v344_v14 = vld [vmem:[%s6766_s18 + $0x58] sm:$0xff]  ;;  %5973 = vmatpush3.msra.mxu0 %v5221_v36 }
  0x16   : > { %v345_v15 = vld [vmem:[%s6766_s18 + $0x60] sm:$0xff]  ;;  %v346_v16 = vld [vmem:[%s6766_s18 + $0x68] sm:$0xff]  ;;  %v347_v17 = vld [vmem:[%s6766_s18 + $0x70] sm:$0xff]  ;;  %6122 = vmatprep.subr.mxu0 %v5319_v37 }
  0x17   : > { %v348_v18 = vld [vmem:[%s6766_s18 + $0x78] sm:$0xff]  ;;  %v349_v19 = vld [vmem:[%s6766_s18 + $0x80] sm:$0xff]  ;;  %v350_v20 = vld [vmem:[%s6766_s18 + $0x88] sm:$0xff] }
  0x18   : > { %5928 = vmatmul.mubr.msk.f32.gmra.mrb[2].mxu0 %vm374_vm0, %v336_v6  ;;  %v351_v21 = vld [vmem:[%s6766_s18 + $0x90] sm:$0xff]  ;;  %v352_v22 = vld [vmem:[%s6766_s18 + $0x98] sm:$0xff]  ;;  %v353_v23 = vld [vmem:[%s6766_s18 + $0xa0] sm:$0xff] }
  0x19   : > { %5930 = vmatprep.mubr.msk.f32.mxu0 %vm374_vm0, %v337_v7  ;;  %v354_v24 = vld [vmem:[%s6766_s18 + $0xa8] sm:$0xff]  ;;  %v355_v25 = vld [vmem:[%s6766_s18 + $0xb0] sm:$0xff]  ;;  %v356_v26 = vld [vmem:[%s6766_s18 + $0xb8] sm:$0xff] }
  0x1a   : > { %v357_v27 = vld [vmem:[%s6766_s18 + $0xc0] sm:$0xff]  ;;  %v358_v28 = vld [vmem:[%s6766_s18 + $0xc8] sm:$0xff]  ;;  %v359_v29 = vld [vmem:[%s6766_s18 + $0xd0] sm:$0xff] }
  0x1b   : > { %v360_v30 = vld [vmem:[%s6766_s18 + $0xd8] sm:$0xff]  ;;  %v361_v31 = vld [vmem:[%s6766_s18 + $0xe0] sm:$0xff]  ;;  %v362_v32 = vld [vmem:[%s6766_s18 + $0xe8] sm:$0xff] }
  0x1c   : > { %5931 = vmatmul.mubr.msk.f32.gmra.mrb[4].mxu0 %vm374_vm0, %v338_v8  ;;  %v363_v33 = vld [vmem:[%s6766_s18 + $0xf0] sm:$0xff]  ;;  %v364_v34 = vld [vmem:[%s6766_s18 + $0xf8] sm:$0xff] }
  0x1d   : > { %5933 = vmatprep.mubr.msk.f32.mxu0 %vm374_vm0, %v339_v9 }
  0x20   : > { %5934 = vmatmul.mubr.msk.f32.gmra.mrb[6].mxu0 %vm374_vm0, %v340_v10 }
  0x21   : > { %5936 = vmatprep.mubr.msk.f32.mxu0 %vm374_vm0, %v341_v11 }
  0x24   : > { %5937 = vmatmul.mubr.msk.f32.gmra.mrb[8].mxu0 %vm374_vm0, %v342_v12 }
  0x25   : > { %5939 = vmatprep.mubr.msk.f32.mxu0 %vm374_vm0, %v343_v13 }
  0x28   : > { %5940 = vmatmul.mubr.msk.f32.gmra.mrb[10].mxu0 %vm374_vm0, %v344_v14 }
  0x29   : > { %5942 = vmatprep.mubr.msk.f32.mxu0 %vm374_vm0, %v345_v15 }
  0x2c   : > { %5943 = vmatmul.mubr.msk.f32.gmra.mrb[12].mxu0 %vm374_vm0, %v346_v16 }
  0x2d   : > { %5945 = vmatprep.mubr.msk.f32.mxu0 %vm374_vm0, %v347_v17 }
  0x30   : > { %5946 = vmatmul.mubr.msk.f32.gmra.mrb[14].mxu0 %vm374_vm0, %v348_v18 }
  0x31   : > { %5948 = vmatprep.mubr.msk.f32.mxu0 %vm374_vm0, %v349_v19 }
  0x34   : > { %5949 = vmatmul.mubr.msk.f32.gmra.mrb[16].mxu0 %vm374_vm0, %v350_v20 }
  0x35   : > { %5951 = vmatprep.mubr.msk.f32.mxu0 %vm374_vm0, %v351_v21 }
  0x38   : > { %5952 = vmatmul.mubr.msk.f32.gmra.mrb[18].mxu0 %vm374_vm0, %v352_v22 }
  0x39   : > { %5954 = vmatprep.mubr.msk.f32.mxu0 %vm374_vm0, %v353_v23 }
  0x3c   : > { %5955 = vmatmul.mubr.msk.f32.gmra.mrb[20].mxu0 %vm374_vm0, %v354_v24 }
  0x3d   : > { %5957 = vmatprep.mubr.msk.f32.mxu0 %vm374_vm0, %v355_v25 }
  0x40   : > { %5958 = vmatmul.mubr.msk.f32.gmra.mrb[22].mxu0 %vm374_vm0, %v356_v26 }
  0x41   : > { %5960 = vmatprep.mubr.msk.f32.mxu0 %vm374_vm0, %v357_v27 }
  0x44   : > { %5961 = vmatmul.mubr.msk.f32.gmra.mrb[24].mxu0 %vm374_vm0, %v358_v28 }
  0x45   : > { %5963 = vmatprep.mubr.msk.f32.mxu0 %vm374_vm0, %v359_v29 }
  0x48   : > { %5964 = vmatmul.mubr.msk.f32.gmra.mrb[26].mxu0 %vm374_vm0, %v360_v30 }
  0x49   : > { %5966 = vmatprep.mubr.msk.f32.mxu0 %vm374_vm0, %v361_v31 }
  0x4c   : > { %5967 = vmatmul.mubr.msk.f32.gmra.mrb[28].mxu0 %vm374_vm0, %v362_v32 }
  0x4d   : > { %5969 = vmatprep.mubr.msk.f32.mxu0 %vm374_vm0, %v363_v33 }
  0x50   : > { %5970 = vmatmul.mubr.msk.f32.gmra.mrb[30].mxu0 %vm374_vm0, %v364_v34 }
  0xe7   : > { %v5926_v40 = vpop.f32.mrb[0].mxu0 }
  0xe8   : > { %v543_v41 = vadd.f32 %v5926_v40, %v6853_v39  ;;  %v537_v42 = vpop.f32.mrb[1].mxu0 }
  0xe9   : > { %v538_v43 = vadd.f32 %v6853_v39, %v537_v42 }
  0xea   : > { %v697_v44 = vmax.f32 %v543_v41, 0.0 }
  0xeb   : > { %v696_v45 = vmax.f32 %v538_v43, 0.0  ;;  %v5929_v46 = vpop.f32.mrb[2].mxu0 }
  0xec   : > { %733 = vst.msk [vmem:[#allocation2 + $0x20] sm:$0xff] %vm728_vm1, %v697_v44  ;;  %v553_v47 = vadd.f32 %v5929_v46, %v6853_v39  ;;  %v547_v48 = vpop.f32.mrb[3].mxu0 }
  0xed   : > { %732 = vst.msk [vmem:[#allocation2 + $0x18] sm:$0xff] %vm728_vm1, %v696_v45  ;;  %v548_v49 = vadd.f32 %v6853_v39, %v547_v48 }
  0xee   : > { %v699_v50 = vmax.f32 %v553_v47, 0.0 }
  0xef   : > { %v698_v51 = vmax.f32 %v548_v49, 0.0  ;;  %v5932_v52 = vpop.f32.mrb[4].mxu0 }
  0xf0   : > { %735 = vst.msk [vmem:[#allocation2 + $0x30] sm:$0xff] %vm728_vm1, %v699_v50  ;;  %v563_v53 = vadd.f32 %v5932_v52, %v6853_v39  ;;  %v557_v54 = vpop.f32.mrb[5].mxu0 }
  0xf1   : > { %734 = vst.msk [vmem:[#allocation2 + $0x28] sm:$0xff] %vm728_vm1, %v698_v51  ;;  %v558_v55 = vadd.f32 %v6853_v39, %v557_v54 }
  0xf2   : > { %v701_v56 = vmax.f32 %v563_v53, 0.0 }
  0xf3   : > { %v700_v57 = vmax.f32 %v558_v55, 0.0  ;;  %v5935_v58 = vpop.f32.mrb[6].mxu0  ;;  %v6873_v63 = vld [vmem:[#allocation2 + $0x20] sm:$0xff] }
  0xf4   : > { %737 = vst.msk [vmem:[#allocation2 + $0x40] sm:$0xff] %vm728_vm1, %v701_v56  ;;  %v573_v59 = vadd.f32 %v5935_v58, %v6853_v39  ;;  %v567_v60 = vpop.f32.mrb[7].mxu0  ;;  %v6867_v61 = vld [vmem:[#allocation2 + $0x18] sm:$0xff] }
  0xf5   : > { %736 = vst.msk [vmem:[#allocation2 + $0x38] sm:$0xff] %vm728_vm1, %v700_v57  ;;  %v568_v62 = vadd.f32 %v6853_v39, %v567_v60  ;;  %5974 = vmatprep.mubr.msk.f32.mxu0 %vm728_vm1, %v6867_v61 }
  0xf6   : > { %v703_v1 = vmax.f32 %v573_v59, 0.0  ;;  %5975 = vmatmul.mubr.msk.f32.vlgmr.msra.gmra.mrb[32].mxu0 %vm728_vm1, %v6873_v63 }
  0xf7   : > { %v702_v2 = vmax.f32 %v568_v62, 0.0  ;;  %v5938_v3 = vpop.f32.mrb[8].mxu0  ;;  %6123 = vmatpush3.msra.mxu0 %v5319_v37  ;;  %v6891_v8 = vld [vmem:[#allocation2 + $0x30] sm:$0xff] }
  0xf8   : > { %739 = vst.msk [vmem:[#allocation2 + $0x50] sm:$0xff] %vm728_vm1, %v703_v1  ;;  %v583_v4 = vadd.f32 %v5938_v3, %v6853_v39  ;;  %v577_v5 = vpop.f32.mrb[9].mxu0  ;;  %v6884_v6 = vld [vmem:[#allocation2 + $0x28] sm:$0xff]  ;;  %6172 = vmatprep.subr.mxu0 %v6878_v0 }
  0xf9   : > { %738 = vst.msk [vmem:[#allocation2 + $0x48] sm:$0xff] %vm728_vm1, %v702_v2  ;;  %v578_v7 = vadd.f32 %v6853_v39, %v577_v5  ;;  %5977 = vmatprep.mubr.msk.f32.mxu0 %vm728_vm1, %v6884_v6 }
  0xfa   : > { %v705_v9 = vmax.f32 %v583_v4, 0.0  ;;  %5978 = vmatmul.mubr.msk.f32.gmra.mrb[34].mxu0 %vm728_vm1, %v6891_v8 }
  0xfb   : > { %v704_v10 = vmax.f32 %v578_v7, 0.0  ;;  %v5941_v11 = vpop.f32.mrb[10].mxu0  ;;  %v6903_v16 = vld [vmem:[#allocation2 + $0x40] sm:$0xff] }
  0xfc   : > { %741 = vst.msk [vmem:[#allocation2 + $0x60] sm:$0xff] %vm728_vm1, %v705_v9  ;;  %v593_v12 = vadd.f32 %v5941_v11, %v6853_v39  ;;  %v587_v13 = vpop.f32.mrb[11].mxu0  ;;  %v6897_v14 = vld [vmem:[#allocation2 + $0x38] sm:$0xff] }
  0xfd   : > { %740 = vst.msk [vmem:[#allocation2 + $0x58] sm:$0xff] %vm728_vm1, %v704_v10  ;;  %v588_v15 = vadd.f32 %v6853_v39, %v587_v13  ;;  %5980 = vmatprep.mubr.msk.f32.mxu0 %vm728_vm1, %v6897_v14 }
  0xfe   : > { %v707_v17 = vmax.f32 %v593_v12, 0.0  ;;  %5981 = vmatmul.mubr.msk.f32.gmra.mrb[36].mxu0 %vm728_vm1, %v6903_v16 }
  0xff   : > { %v706_v18 = vmax.f32 %v588_v15, 0.0  ;;  %v5944_v19 = vpop.f32.mrb[12].mxu0  ;;  %v6915_v24 = vld [vmem:[#allocation2 + $0x50] sm:$0xff] }
 0x100   : > { %743 = vst.msk [vmem:[#allocation2 + $0x70] sm:$0xff] %vm728_vm1, %v707_v17  ;;  %v603_v20 = vadd.f32 %v5944_v19, %v6853_v39  ;;  %v597_v21 = vpop.f32.mrb[13].mxu0  ;;  %v6909_v22 = vld [vmem:[#allocation2 + $0x48] sm:$0xff] }
 0x101   : > { %742 = vst.msk [vmem:[#allocation2 + $0x68] sm:$0xff] %vm728_vm1, %v706_v18  ;;  %v598_v23 = vadd.f32 %v6853_v39, %v597_v21  ;;  %5983 = vmatprep.mubr.msk.f32.mxu0 %vm728_vm1, %v6909_v22 }
 0x102   : > { %v709_v25 = vmax.f32 %v603_v20, 0.0  ;;  %5984 = vmatmul.mubr.msk.f32.gmra.mrb[38].mxu0 %vm728_vm1, %v6915_v24 }
 0x103   : > { %v708_v26 = vmax.f32 %v598_v23, 0.0  ;;  %v5947_v27 = vpop.f32.mrb[14].mxu0  ;;  %v6927_v32 = vld [vmem:[#allocation2 + $0x60] sm:$0xff] }
 0x104   : > { %745 = vst.msk [vmem:[#allocation2 + $0x80] sm:$0xff] %vm728_vm1, %v709_v25  ;;  %v613_v28 = vadd.f32 %v5947_v27, %v6853_v39  ;;  %v607_v29 = vpop.f32.mrb[15].mxu0  ;;  %v6921_v30 = vld [vmem:[#allocation2 + $0x58] sm:$0xff] }
 0x105   : > { %744 = vst.msk [vmem:[#allocation2 + $0x78] sm:$0xff] %vm728_vm1, %v708_v26  ;;  %v608_v31 = vadd.f32 %v6853_v39, %v607_v29  ;;  %5986 = vmatprep.mubr.msk.f32.mxu0 %vm728_vm1, %v6921_v30  ;;  %v7003_v29 = vld [vmem:[#allocation2 + $0x17] sm:$0xff] }
 0x106   : > { %v711_v33 = vmax.f32 %v613_v28, 0.0  ;;  %5987 = vmatmul.mubr.msk.f32.gmra.mrb[40].mxu0 %vm728_vm1, %v6927_v32 }
 0x107   : > { %v710_v34 = vmax.f32 %v608_v31, 0.0  ;;  %v5950_v35 = vpop.f32.mrb[16].mxu0  ;;  %v6939_v42 = vld [vmem:[#allocation2 + $0x70] sm:$0xff] }
 0x108   : > { %747 = vst.msk [vmem:[#allocation2 + $0x90] sm:$0xff] %vm728_vm1, %v711_v33  ;;  %v623_v36 = vadd.f32 %v5950_v35, %v6853_v39  ;;  %v617_v37 = vpop.f32.mrb[17].mxu0  ;;  %v6933_v40 = vld [vmem:[#allocation2 + $0x68] sm:$0xff] }
 0x109   : > { %746 = vst.msk [vmem:[#allocation2 + $0x88] sm:$0xff] %vm728_vm1, %v710_v34  ;;  %v618_v41 = vadd.f32 %v6853_v39, %v617_v37  ;;  %5989 = vmatprep.mubr.msk.f32.mxu0 %vm728_vm1, %v6933_v40 }
 0x10a   : > { %v713_v43 = vmax.f32 %v623_v36, 0.0  ;;  %5990 = vmatmul.mubr.msk.f32.gmra.mrb[42].mxu0 %vm728_vm1, %v6939_v42 }
 0x10b   : > { %v712_v44 = vmax.f32 %v618_v41, 0.0  ;;  %v5953_v45 = vpop.f32.mrb[18].mxu0  ;;  %v6951_v50 = vld [vmem:[#allocation2 + $0x80] sm:$0xff] }
 0x10c   : > { %749 = vst.msk [vmem:[#allocation2 + $0xa0] sm:$0xff] %vm728_vm1, %v713_v43  ;;  %v633_v46 = vadd.f32 %v5953_v45, %v6853_v39  ;;  %v627_v47 = vpop.f32.mrb[19].mxu0  ;;  %v6945_v48 = vld [vmem:[#allocation2 + $0x78] sm:$0xff] }
 0x10d   : > { %748 = vst.msk [vmem:[#allocation2 + $0x98] sm:$0xff] %vm728_vm1, %v712_v44  ;;  %v628_v49 = vadd.f32 %v6853_v39, %v627_v47  ;;  %5992 = vmatprep.mubr.msk.f32.mxu0 %vm728_vm1, %v6945_v48  ;;  %v7017_v43 = vld [vmem:[#allocation2 + $0x1f] sm:$0xff]  ;;  %v7031_v47 = vld [vmem:[%s8292_s3 + $0x30] sm:$0xff] }
 0x10e   : > { %v715_v51 = vmax.f32 %v633_v46, 0.0  ;;  %5993 = vmatmul.mubr.msk.f32.gmra.mrb[44].mxu0 %vm728_vm1, %v6951_v50  ;;  %v5286_v44 = vld [vmem:[%s8292_s3 + $0x38] sm:$0xff]  ;;  %v7026_v46 = vld [vmem:[#allocation2 + $0x27] sm:$0xff] }
 0x10f   : > { %v714_v52 = vmax.f32 %v628_v49, 0.0  ;;  %v5956_v53 = vpop.f32.mrb[20].mxu0  ;;  %v6963_v58 = vld [vmem:[#allocation2 + $0x90] sm:$0xff] }
 0x110   : > { %751 = vst.msk [vmem:[#allocation2 + $0xb0] sm:$0xff] %vm728_vm1, %v715_v51  ;;  %v643_v54 = vadd.f32 %v5956_v53, %v6853_v39  ;;  %v637_v55 = vpop.f32.mrb[21].mxu0  ;;  %v6957_v56 = vld [vmem:[#allocation2 + $0x88] sm:$0xff] }
 0x111   : > { %750 = vst.msk [vmem:[#allocation2 + $0xa8] sm:$0xff] %vm728_vm1, %v714_v52  ;;  %v638_v57 = vadd.f32 %v6853_v39, %v637_v55  ;;  %5995 = vmatprep.mubr.msk.f32.mxu0 %vm728_vm1, %v6957_v56 }
 0x112   : > { %v717_v59 = vmax.f32 %v643_v54, 0.0  ;;  %5996 = vmatmul.mubr.msk.f32.gmra.mrb[46].mxu0 %vm728_vm1, %v6963_v58 }
 0x113   : > { %v716_v60 = vmax.f32 %v638_v57, 0.0  ;;  %v5959_v62 = vpop.f32.mrb[22].mxu0  ;;  %v6975_v5 = vld [vmem:[#allocation2 + $0xa0] sm:$0xff]  ;;  %v7047_v57 = vld [vmem:[#allocation2 + $0x2f] sm:$0xff] }
 0x114   : > { %753 = vst.msk [vmem:[#allocation2 + $0xc0] sm:$0xff] %vm728_vm1, %v717_v59  ;;  %v653_v1 = vadd.f32 %v5959_v62, %v6853_v39  ;;  %v647_v2 = vpop.f32.mrb[23].mxu0  ;;  %v6969_v3 = vld [vmem:[#allocation2 + $0x98] sm:$0xff] }
 0x115   : > { %752 = vst.msk [vmem:[#allocation2 + $0xb8] sm:$0xff] %vm728_vm1, %v716_v60  ;;  %v648_v4 = vadd.f32 %v6853_v39, %v647_v2  ;;  %5998 = vmatprep.mubr.msk.f32.mxu0 %vm728_vm1, %v6969_v3  ;;  %v7072_v2 = vld [vmem:[#allocation2 + $0x47] sm:$0xff] }
 0x116   : > { %v719_v7 = vmax.f32 %v653_v1, 0.0  ;;  %5999 = vmatmul.mubr.msk.f32.gmra.mrb[48].mxu0 %vm728_vm1, %v6975_v5  ;;  %v7066_v1 = vld [vmem:[#allocation2 + $0x3f] sm:$0xff] }
 0x117   : > { %v718_v9 = vmax.f32 %v648_v4, 0.0  ;;  %v5962_v10 = vpop.f32.mrb[24].mxu0  ;;  %v6987_v17 = vld [vmem:[#allocation2 + $0xb0] sm:$0xff] }
 0x118   : > { %755 = vst.msk [vmem:[#allocation2 + $0xd0] sm:$0xff] %vm728_vm1, %v719_v7  ;;  %v663_v11 = vadd.f32 %v5962_v10, %v6853_v39  ;;  %v657_v12 = vpop.f32.mrb[25].mxu0  ;;  %v6981_v13 = vld [vmem:[#allocation2 + $0xa8] sm:$0xff]  ;;  %v7088_v10 = vld [vmem:[#allocation2 + $0x57] sm:$0xff] }
 0x119   : > { %754 = vst.msk [vmem:[#allocation2 + $0xc8] sm:$0xff] %vm728_vm1, %v718_v9  ;;  %v658_v15 = vadd.f32 %v6853_v39, %v657_v12  ;;  %6001 = vmatprep.mubr.msk.f32.mxu0 %vm728_vm1, %v6981_v13  ;;  %v7082_v9 = vld [vmem:[#allocation2 + $0x4f] sm:$0xff] }
 0x11a   : > { %v721_v18 = vmax.f32 %v663_v11, 0.0  ;;  %6002 = vmatmul.mubr.msk.f32.gmra.mrb[50].mxu0 %vm728_vm1, %v6987_v17  ;;  %v767_v12 = vld [vmem:[#allocation2 + $0x8] sm:$0xff] }
 0x11b   : > { %v720_v19 = vmax.f32 %v658_v15, 0.0  ;;  %v5965_v20 = vpop.f32.mrb[26].mxu0  ;;  %v6999_v27 = vld [vmem:[#allocation2 + $0xc0] sm:$0xff] }
 0x11c   : > { %757 = vst.msk [vmem:[#allocation2 + $0xe0] sm:$0xff] %vm728_vm1, %v721_v18  ;;  %v673_v21 = vadd.f32 %v5965_v20, %v6853_v39  ;;  %v667_v23 = vpop.f32.mrb[27].mxu0  ;;  %v6993_v25 = vld [vmem:[#allocation2 + $0xb8] sm:$0xff]  ;;  %v768_v20 = vld [vmem:[#allocation2 + $0x10] sm:$0xff] }
 0x11d   : > { %756 = vst.msk [vmem:[#allocation2 + $0xd8] sm:$0xff] %vm728_vm1, %v720_v19  ;;  %v668_v26 = vadd.f32 %v6853_v39, %v667_v23  ;;  %6004 = vmatprep.mubr.msk.f32.mxu0 %vm728_vm1, %v6993_v25  ;;  %v7098_v18 = vld [vmem:[#allocation2 + $0x5f] sm:$0xff]  ;;  %v7104_v19 = vld [vmem:[#allocation2 + $0x67] sm:$0xff] }
 0x11e   : > { %v723_v28 = vmax.f32 %v673_v21, 0.0  ;;  %6005 = vmatmul.mubr.msk.f32.gmra.mrb[52].mxu0 %vm728_vm1, %v6999_v27  ;;  %v7109_v21 = vld [vmem:[#allocation2 + $0x6f] sm:$0xff] }
 0x11f   : > { %v722_v31 = vmax.f32 %v668_v26, 0.0  ;;  %v5968_v33 = vpop.f32.mrb[28].mxu0  ;;  %6124 = vmatprep.mubr.msk.f32.mxu0 %vm728_vm1, %v7003_v29  ;;  %v7015_v41 = vld [vmem:[#allocation2 + $0xd0] sm:$0xff]  ;;  %v7114_v23 = vld [vmem:[%s8292_s3 + $0x28] sm:$0xff] }
 0x120   : > { %759 = vst.msk [vmem:[#allocation2 + $0xf0] sm:$0xff] %vm728_vm1, %v723_v28  ;;  %v683_v34 = vadd.f32 %v5968_v33, %v6853_v39  ;;  %v677_v35 = vpop.f32.mrb[29].mxu0  ;;  %v7009_v36 = vld [vmem:[#allocation2 + $0xc8] sm:$0xff]  ;;  %v7121_v26 = vld [vmem:[#allocation2 + $0x77] sm:$0xff]  ;;  %v7126_v28 = vld [vmem:[#allocation2 + $0x7f] sm:$0xff] }
 0x121   : > { %758 = vst.msk [vmem:[#allocation2 + $0xe8] sm:$0xff] %vm728_vm1, %v722_v31  ;;  %v678_v37 = vadd.f32 %v6853_v39, %v677_v35  ;;  %6007 = vmatprep.mubr.msk.f32.mxu1 %vm728_vm1, %v7009_v36  ;;  %v7132_v31 = vld [vmem:[#allocation2 + $0x87] sm:$0xff]  ;;  %v7150_v33 = vld [vmem:[#allocation2 + $0x9f] sm:$0xff]  ;;  %v7162_v35 = vld [vmem:[#allocation2 + $0xaf] sm:$0xff] }
 0x122   : > { %v725_v45 = vmax.f32 %v683_v34, 0.0  ;;  %6008 = vmatmul.mubr.msk.f32.vlgmr.msra.gmra.mrb[0].mxu1 %vm728_vm1, %v7015_v41  ;;  %6125 = vmatmul.mubr.msk.f32.vlgmr.msra.gmra.mrb[54].mxu0 %vm728_vm1, %v7017_v43  ;;  %v7156_v34 = vld [vmem:[#allocation2 + $0xa7] sm:$0xff] }
 0x123   : > { %v724_v49 = vmax.f32 %v678_v37, 0.0  ;;  %6023 = vmatpush3.msra.mxu1 %v6847_v38  ;;  %v5971_v51 = vpop.f32.mrb[30].mxu0  ;;  %6127 = vmatprep.mubr.msk.f32.mxu0 %vm728_vm1, %v7026_v46  ;;  %v7045_v38 = vld [vmem:[#allocation2 + $0xe0] sm:$0xff]  ;;  %v7168_v37 = vld [vmem:[#allocation2 + $0xb7] sm:$0xff] }
 0x124   : > { %761 = vst.msk [vmem:[#allocation2 + $0x100] sm:$0xff] %vm728_vm1, %v725_v45  ;;  %v693_v52 = vadd.f32 %v5971_v51, %v6853_v39  ;;  %v687_v53 = vpop.f32.mrb[31].mxu0  ;;  %v7038_v54 = vld [vmem:[#allocation2 + $0xd8] sm:$0xff]  ;;  %6072 = vmatprep.subr.mxu1 %v5286_v44  ;;  %6173 = vmatpush3.msra.mxu0 %v6878_v0  ;;  %v7180_v45 = vld [vmem:[#allocation2 + $0xc7] sm:$0xff] }
 0x125   : > { %760 = vst.msk [vmem:[#allocation2 + $0xf8] sm:$0xff] %vm728_vm1, %v724_v49  ;;  %v688_v55 = vadd.f32 %v6853_v39, %v687_v53  ;;  %6010 = vmatprep.mubr.msk.f32.mxu1 %vm728_vm1, %v7038_v54  ;;  %6222 = vmatprep.subr.mxu0 %v7031_v47  ;;  %v7054_v0 = vld [vmem:[#allocation2 + $0x37] sm:$0xff]  ;;  %v7186_v49 = vld [vmem:[#allocation2 + $0xcf] sm:$0xff] }
 0x126   : > { %v727_v59 = vmax.f32 %v693_v52, 0.0  ;;  %6011 = vmatmul.mubr.msk.f32.gmra.mrb[2].mxu1 %vm728_vm1, %v7045_v38  ;;  %6128 = vmatmul.mubr.msk.f32.gmra.mrb[56].mxu0 %vm728_vm1, %v7047_v57  ;;  %v7192_v51 = vld [vmem:[#allocation2 + $0xd7] sm:$0xff]  ;;  %v7198_v52 = vld [vmem:[#allocation2 + $0xdf] sm:$0xff] }
 0x127   : > { %v726_v60 = vmax.f32 %v688_v55, 0.0  ;;  %6130 = vmatprep.mubr.msk.f32.mxu0 %vm728_vm1, %v7054_v0  ;;  %v7064_v62 = vld [vmem:[#allocation2 + $0xf0] sm:$0xff] }
 0x128   : > { %763 = vst.msk [vmem:[#allocation2 + $0x110] sm:$0xff] %vm728_vm1, %v727_v59  ;;  %v7059_v39 = vld [vmem:[#allocation2 + $0xe8] sm:$0xff] }
 0x129   : > { %762 = vst.msk [vmem:[#allocation2 + $0x108] sm:$0xff] %vm728_vm1, %v726_v60  ;;  %6013 = vmatprep.mubr.msk.f32.mxu1 %vm728_vm1, %v7059_v39  ;;  %v7204_v53 = vld [vmem:[#allocation2 + $0xe7] sm:$0xff]  ;;  %v7210_v55 = vld [vmem:[#allocation2 + $0xef] sm:$0xff] }
 0x12a   : > { %6014 = vmatmul.mubr.msk.f32.gmra.mrb[4].mxu1 %vm728_vm1, %v7064_v62  ;;  %6131 = vmatmul.mubr.msk.f32.gmra.mrb[58].mxu0 %vm728_vm1, %v7066_v1 }
 0x12b   : > { %6133 = vmatprep.mubr.msk.f32.mxu0 %vm728_vm1, %v7072_v2  ;;  %v7080_v7 = vld [vmem:[#allocation2 + $0x100] sm:$0xff] }
 0x12c   : > { %v7076_v4 = vld [vmem:[#allocation2 + $0xf8] sm:$0xff] }
 0x12d   : > { %6016 = vmatprep.mubr.msk.f32.mxu1 %vm728_vm1, %v7076_v4  ;;  %v7216_v59 = vld [vmem:[#allocation2 + $0xf7] sm:$0xff]  ;;  %v7222_v60 = vld [vmem:[#allocation2 + $0xff] sm:$0xff] }
 0x12e   : > { %6017 = vmatmul.mubr.msk.f32.gmra.mrb[6].mxu1 %vm728_vm1, %v7080_v7  ;;  %6134 = vmatmul.mubr.msk.f32.gmra.mrb[60].mxu0 %vm728_vm1, %v7082_v9 }
 0x12f   : > { %6136 = vmatprep.mubr.msk.f32.mxu0 %vm728_vm1, %v7088_v10  ;;  %v7096_v15 = vld [vmem:[#allocation2 + $0x110] sm:$0xff] }
 0x130   : > { %v7092_v11 = vld [vmem:[#allocation2 + $0x108] sm:$0xff]  ;;  %8302 = vst [vmem:[#allocation9_spill] sm:$0xff] %v7096_v15 }
 0x131   : > { %8301 = vst [vmem:[#allocation8_spill] sm:$0xff] %v7092_v11  ;;  %6019 = vmatprep.mubr.msk.f32.mxu1 %vm728_vm1, %v7092_v11  ;;  %v1745_v11 = vld [vmem:[#allocation2 + $0xf] sm:$0xff] }
 0x132   : > { %6020 = vmatmul.mubr.msk.f32.gmra.mrb[8].mxu1 %vm728_vm1, %v7096_v15  ;;  %6137 = vmatmul.mubr.msk.f32.gmra.mrb[62].mxu0 %vm728_vm1, %v7098_v18  ;;  %v7234_v15 = vld [vmem:[#allocation2 + $0x10f] sm:$0xff] }
 0x133   : > { %6139 = vmatprep.mubr.msk.f32.mxu0 %vm728_vm1, %v7104_v19  ;;  %6024 = vmatprep.mubr.msk.f32.mxu1 %vm728_vm1, %v767_v12  ;;  %v7228_v12 = vld [vmem:[#allocation2 + $0x107] sm:$0xff] }
 0x136   : > { %6025 = vmatmul.mubr.msk.f32.vlgmr.msra.gmra.mrb[10].mxu1 %vm728_vm1, %v768_v20  ;;  %6140 = vmatmul.mubr.msk.f32.gmra.mrb[64].mxu0 %vm728_vm1, %v7109_v21  ;;  %v1744_v20 = vld [vmem:[#allocation2 + $0x7] sm:$0xff] }
 0x137   : > { %6073 = vmatpush3.msra.mxu1 %v5286_v44  ;;  %6027 = vmatprep.mubr.msk.f32.mxu1 %vm728_vm1, %v6867_v61  ;;  %v7138_v61 = vld [vmem:[#allocation2 + $0x8f] sm:$0xff]  ;;  %v7174_v44 = vld [vmem:[#allocation2 + $0xbf] sm:$0xff] }
 0x138   : > { %6142 = vmatprep.mubr.msk.f32.mxu0 %vm728_vm1, %v7121_v26  ;;  %6272 = vmatprep.subr.mxu1 %v7114_v23 }
 0x13a   : > { %6028 = vmatmul.mubr.msk.f32.gmra.mrb[12].mxu1 %vm728_vm1, %v6873_v63  ;;  %6143 = vmatmul.mubr.msk.f32.gmra.mrb[66].mxu0 %vm728_vm1, %v7126_v28  ;;  %v7144_v63 = vld [vmem:[#allocation2 + $0x97] sm:$0xff] }
 0x13b   : > { %6030 = vmatprep.mubr.msk.f32.mxu1 %vm728_vm1, %v6884_v6  ;;  %6145 = vmatprep.mubr.msk.f32.mxu0 %vm728_vm1, %v7132_v31 }
 0x13e   : > { %6031 = vmatmul.mubr.msk.f32.gmra.mrb[14].mxu1 %vm728_vm1, %v6891_v8  ;;  %6146 = vmatmul.mubr.msk.f32.gmra.mrb[68].mxu0 %vm728_vm1, %v7138_v61 }
 0x13f   : > { %6033 = vmatprep.mubr.msk.f32.mxu1 %vm728_vm1, %v6897_v14  ;;  %6148 = vmatprep.mubr.msk.f32.mxu0 %vm728_vm1, %v7144_v63 }
 0x142   : > { %6034 = vmatmul.mubr.msk.f32.gmra.mrb[16].mxu1 %vm728_vm1, %v6903_v16  ;;  %6149 = vmatmul.mubr.msk.f32.gmra.mrb[70].mxu0 %vm728_vm1, %v7150_v33 }
 0x143   : > { %6036 = vmatprep.mubr.msk.f32.mxu1 %vm728_vm1, %v6909_v22  ;;  %6151 = vmatprep.mubr.msk.f32.mxu0 %vm728_vm1, %v7156_v34 }
 0x146   : > { %6037 = vmatmul.mubr.msk.f32.gmra.mrb[18].mxu1 %vm728_vm1, %v6915_v24  ;;  %6152 = vmatmul.mubr.msk.f32.gmra.mrb[72].mxu0 %vm728_vm1, %v7162_v35 }
 0x147   : > { %6039 = vmatprep.mubr.msk.f32.mxu1 %vm728_vm1, %v6921_v30  ;;  %6154 = vmatprep.mubr.msk.f32.mxu0 %vm728_vm1, %v7168_v37 }
 0x14a   : > { %6040 = vmatmul.mubr.msk.f32.gmra.mrb[20].mxu1 %vm728_vm1, %v6927_v32  ;;  %6155 = vmatmul.mubr.msk.f32.gmra.mrb[74].mxu0 %vm728_vm1, %v7174_v44 }
 0x14b   : > { %6042 = vmatprep.mubr.msk.f32.mxu1 %vm728_vm1, %v6933_v40  ;;  %6157 = vmatprep.mubr.msk.f32.mxu0 %vm728_vm1, %v7180_v45 }
 0x14e   : > { %6043 = vmatmul.mubr.msk.f32.gmra.mrb[22].mxu1 %vm728_vm1, %v6939_v42  ;;  %6158 = vmatmul.mubr.msk.f32.gmra.mrb[76].mxu0 %vm728_vm1, %v7186_v49 }
 0x14f   : > { %6045 = vmatprep.mubr.msk.f32.mxu1 %vm728_vm1, %v6945_v48  ;;  %6160 = vmatprep.mubr.msk.f32.mxu0 %vm728_vm1, %v7192_v51 }
 0x152   : > { %6046 = vmatmul.mubr.msk.f32.gmra.mrb[24].mxu1 %vm728_vm1, %v6951_v50  ;;  %6161 = vmatmul.mubr.msk.f32.gmra.mrb[78].mxu0 %vm728_vm1, %v7198_v52 }
 0x153   : > { %6048 = vmatprep.mubr.msk.f32.mxu1 %vm728_vm1, %v6957_v56  ;;  %6163 = vmatprep.mubr.msk.f32.mxu0 %vm728_vm1, %v7204_v53 }
 0x156   : > { %6049 = vmatmul.mubr.msk.f32.gmra.mrb[26].mxu1 %vm728_vm1, %v6963_v58  ;;  %6164 = vmatmul.mubr.msk.f32.gmra.mrb[80].mxu0 %vm728_vm1, %v7210_v55 }
 0x157   : > { %6051 = vmatprep.mubr.msk.f32.mxu1 %vm728_vm1, %v6969_v3  ;;  %6166 = vmatprep.mubr.msk.f32.mxu0 %vm728_vm1, %v7216_v59 }
 0x15a   : > { %6052 = vmatmul.mubr.msk.f32.gmra.mrb[28].mxu1 %vm728_vm1, %v6975_v5  ;;  %6167 = vmatmul.mubr.msk.f32.gmra.mrb[82].mxu0 %vm728_vm1, %v7222_v60 }
 0x15b   : > { %6054 = vmatprep.mubr.msk.f32.mxu1 %vm728_vm1, %v6981_v13  ;;  %6169 = vmatprep.mubr.msk.f32.mxu0 %vm728_vm1, %v7228_v12 }
 0x15e   : > { %6055 = vmatmul.mubr.msk.f32.gmra.mrb[30].mxu1 %vm728_vm1, %v6987_v17  ;;  %6170 = vmatmul.mubr.msk.f32.gmra.mrb[84].mxu0 %vm728_vm1, %v7234_v15 }
 0x15f   : > { %6057 = vmatprep.mubr.msk.f32.mxu1 %vm728_vm1, %v6993_v25  ;;  %6174 = vmatprep.mubr.msk.f32.mxu0 %vm728_vm1, %v1744_v20  ;;  %v2721_v20 = vld [vmem:[#allocation2 + $0x11] sm:$0xff] }
 0x162   : > { %6058 = vmatmul.mubr.msk.f32.gmra.mrb[0].mxu1 %vm728_vm1, %v6999_v27  ;;  %6175 = vmatmul.mubr.msk.f32.vlgmr.msra.gmra.mrb[54].mxu0 %vm728_vm1, %v1745_v11  ;;  %v2364_v11 = vld [vmem:[#allocation2 + $0x11f] sm:$0xff] }
 0x163   : > { %6060 = vmatprep.mubr.msk.f32.mxu1 %vm728_vm1, %v7009_v36  ;;  %6177 = vmatprep.mubr.msk.f32.mxu0 %vm728_vm1, %v7003_v29  ;;  %v7286_v29 = vld [vmem:[%s8292_s3 + $0x10] sm:$0xff] }
 0x164   : > { %6223 = vmatpush3.msra.mxu0 %v7031_v47 }
 0x166   : > { %6061 = vmatmul.mubr.msk.f32.gmra.mrb[2].mxu1 %vm728_vm1, %v7015_v41  ;;  %6178 = vmatmul.mubr.msk.f32.gmra.mrb[56].mxu0 %vm728_vm1, %v7017_v43 }
 0x167   : > { %6063 = vmatprep.mubr.msk.f32.mxu1 %vm728_vm1, %v7038_v54  ;;  %6180 = vmatprep.mubr.msk.f32.mxu0 %vm728_vm1, %v7026_v46 }
 0x16a   : > { %6064 = vmatmul.mubr.msk.f32.gmra.mrb[4].mxu1 %vm728_vm1, %v7045_v38  ;;  %6181 = vmatmul.mubr.msk.f32.gmra.mrb[58].mxu0 %vm728_vm1, %v7047_v57 }
 0x16b   : > { %6066 = vmatprep.mubr.msk.f32.mxu1 %vm728_vm1, %v7059_v39  ;;  %6183 = vmatprep.mubr.msk.f32.mxu0 %vm728_vm1, %v7054_v0 }
 0x16e   : > { %6067 = vmatmul.mubr.msk.f32.gmra.mrb[6].mxu1 %vm728_vm1, %v7064_v62  ;;  %6184 = vmatmul.mubr.msk.f32.gmra.mrb[60].mxu0 %vm728_vm1, %v7066_v1 }
 0x16f   : > { %6069 = vmatprep.mubr.msk.f32.mxu1 %vm728_vm1, %v7076_v4  ;;  %6186 = vmatprep.mubr.msk.f32.mxu0 %vm728_vm1, %v7072_v2 }
 0x172   : > { %6070 = vmatmul.mubr.msk.f32.gmra.mrb[8].mxu1 %vm728_vm1, %v7080_v7  ;;  %6187 = vmatmul.mubr.msk.f32.gmra.mrb[62].mxu0 %vm728_vm1, %v7082_v9 }
 0x173   : > { %6074 = vmatprep.mubr.msk.f32.mxu1 %vm728_vm1, %v6884_v6  ;;  %6189 = vmatprep.mubr.msk.f32.mxu0 %vm728_vm1, %v7088_v10  ;;  %v8303_v6 = vld [vmem:[#allocation8_spill] sm:$0xff] }
 0x176   : > { %6075 = vmatmul.mubr.msk.f32.vlgmr.msra.gmra.mrb[10].mxu1 %vm728_vm1, %v6891_v8  ;;  %6190 = vmatmul.mubr.msk.f32.gmra.mrb[64].mxu0 %vm728_vm1, %v7098_v18  ;;  %v1387_v8 = vld [vmem:[#allocation2 + $0x118] sm:$0xff] }
 0x177   : > { %6273 = vmatpush3.msra.mxu1 %v7114_v23  ;;  %6077 = vmatprep.mubr.msk.f32.mxu1 %vm728_vm1, %v6897_v14  ;;  %v8304_v14 = vld [vmem:[#allocation9_spill] sm:$0xff] }
 0x178   : > { %6192 = vmatprep.mubr.msk.f32.mxu0 %vm728_vm1, %v7104_v19  ;;  %6322 = vmatprep.subr.mxu1 %v7286_v29 }
 0x17a   : > { %6078 = vmatmul.mubr.msk.f32.gmra.mrb[12].mxu1 %vm728_vm1, %v6903_v16  ;;  %6193 = vmatmul.mubr.msk.f32.gmra.mrb[66].mxu0 %vm728_vm1, %v7109_v21  ;;  %v1388_v16 = vld [vmem:[#allocation2 + $0x120] sm:$0xff] }
 0x17b   : > { %6080 = vmatprep.mubr.msk.f32.mxu1 %vm728_vm1, %v6909_v22  ;;  %6195 = vmatprep.mubr.msk.f32.mxu0 %vm728_vm1, %v7121_v26  ;;  %v7412_v22 = vld [vmem:[#allocation2 + $0x19] sm:$0xff] }
 0x17e   : > { %6081 = vmatmul.mubr.msk.f32.gmra.mrb[14].mxu1 %vm728_vm1, %v6915_v24  ;;  %6196 = vmatmul.mubr.msk.f32.gmra.mrb[68].mxu0 %vm728_vm1, %v7126_v28  ;;  %v7418_v24 = vld [vmem:[#allocation2 + $0x21] sm:$0xff] }
 0x17f   : > { %6083 = vmatprep.mubr.msk.f32.mxu1 %vm728_vm1, %v6921_v30  ;;  %6198 = vmatprep.mubr.msk.f32.mxu0 %vm728_vm1, %v7132_v31  ;;  %v7423_v30 = vld [vmem:[%s8292_s3 + $0x40] sm:$0xff] }
 0x182   : > { %6084 = vmatmul.mubr.msk.f32.gmra.mrb[16].mxu1 %vm728_vm1, %v6927_v32  ;;  %6199 = vmatmul.mubr.msk.f32.gmra.mrb[70].mxu0 %vm728_vm1, %v7138_v61  ;;  %v7432_v32 = vld [vmem:[#allocation2 + $0x29] sm:$0xff] }
 0x183   : > { %6086 = vmatprep.mubr.msk.f32.mxu1 %vm728_vm1, %v6933_v40  ;;  %6201 = vmatprep.mubr.msk.f32.mxu0 %vm728_vm1, %v7144_v63  ;;  %v7437_v40 = vld [vmem:[#allocation2 + $0x31] sm:$0xff] }
 0x186   : > { %6087 = vmatmul.mubr.msk.f32.gmra.mrb[18].mxu1 %vm728_vm1, %v6939_v42  ;;  %6202 = vmatmul.mubr.msk.f32.gmra.mrb[72].mxu0 %vm728_vm1, %v7150_v33  ;;  %v7443_v42 = vld [vmem:[#allocation2 + $0x39] sm:$0xff] }
 0x187   : > { %6089 = vmatprep.mubr.msk.f32.mxu1 %vm728_vm1, %v6945_v48  ;;  %6204 = vmatprep.mubr.msk.f32.mxu0 %vm728_vm1, %v7156_v34  ;;  %v7449_v48 = vld [vmem:[#allocation2 + $0x41] sm:$0xff] }
 0x18a   : > { %6090 = vmatmul.mubr.msk.f32.gmra.mrb[20].mxu1 %vm728_vm1, %v6951_v50  ;;  %6205 = vmatmul.mubr.msk.f32.gmra.mrb[74].mxu0 %vm728_vm1, %v7162_v35  ;;  %v7455_v50 = vld [vmem:[#allocation2 + $0x49] sm:$0xff] }
 0x18b   : > { %6092 = vmatprep.mubr.msk.f32.mxu1 %vm728_vm1, %v6957_v56  ;;  %6207 = vmatprep.mubr.msk.f32.mxu0 %vm728_vm1, %v7168_v37  ;;  %v7461_v56 = vld [vmem:[#allocation2 + $0x51] sm:$0xff] }
 0x18e   : > { %6093 = vmatmul.mubr.msk.f32.gmra.mrb[22].mxu1 %vm728_vm1, %v6963_v58  ;;  %6208 = vmatmul.mubr.msk.f32.gmra.mrb[76].mxu0 %vm728_vm1, %v7174_v44  ;;  %v7467_v58 = vld [vmem:[#allocation2 + $0x59] sm:$0xff] }
 0x18f   : > { %6095 = vmatprep.mubr.msk.f32.mxu1 %vm728_vm1, %v6969_v3  ;;  %6210 = vmatprep.mubr.msk.f32.mxu0 %vm728_vm1, %v7180_v45  ;;  %v7473_v3 = vld [vmem:[#allocation2 + $0x61] sm:$0xff] }
 0x192   : > { %6096 = vmatmul.mubr.msk.f32.gmra.mrb[24].mxu1 %vm728_vm1, %v6975_v5  ;;  %6211 = vmatmul.mubr.msk.f32.gmra.mrb[78].mxu0 %vm728_vm1, %v7186_v49  ;;  %v7479_v5 = vld [vmem:[#allocation2 + $0x69] sm:$0xff] }
 0x193   : > { %6098 = vmatprep.mubr.msk.f32.mxu1 %vm728_vm1, %v6981_v13  ;;  %6213 = vmatprep.mubr.msk.f32.mxu0 %vm728_vm1, %v7192_v51 }
 0x196   : > { %6099 = vmatmul.mubr.msk.f32.gmra.mrb[26].mxu1 %vm728_vm1, %v6987_v17  ;;  %6214 = vmatmul.mubr.msk.f32.gmra.mrb[80].mxu0 %vm728_vm1, %v7198_v52  ;;  %v7487_v17 = vld [vmem:[#allocation2 + $0x71] sm:$0xff] }
 0x197   : > { %6101 = vmatprep.mubr.msk.f32.mxu1 %vm728_vm1, %v6993_v25  ;;  %6216 = vmatprep.mubr.msk.f32.mxu0 %vm728_vm1, %v7204_v53 }
 0x19a   : > { %6102 = vmatmul.mubr.msk.f32.gmra.mrb[28].mxu1 %vm728_vm1, %v6999_v27  ;;  %6217 = vmatmul.mubr.msk.f32.gmra.mrb[82].mxu0 %vm728_vm1, %v7210_v55  ;;  %v7495_v27 = vld [vmem:[#allocation2 + $0x79] sm:$0xff] }
 0x19b   : > { %6104 = vmatprep.mubr.msk.f32.mxu1 %vm728_vm1, %v7009_v36  ;;  %6219 = vmatprep.mubr.msk.f32.mxu0 %vm728_vm1, %v7216_v59 }
 0x19e   : > { %6105 = vmatmul.mubr.msk.f32.gmra.mrb[30].mxu1 %vm728_vm1, %v7015_v41  ;;  %6220 = vmatmul.mubr.msk.f32.gmra.mrb[84].mxu0 %vm728_vm1, %v7222_v60  ;;  %v7503_v41 = vld [vmem:[#allocation2 + $0x81] sm:$0xff] }
 0x19f   : > { %6107 = vmatprep.mubr.msk.f32.mxu1 %vm728_vm1, %v7038_v54  ;;  %6224 = vmatprep.mubr.msk.f32.mxu0 %vm728_vm1, %v7026_v46  ;;  %v7511_v46 = vld [vmem:[#allocation2 + $0x89] sm:$0xff]  ;;  %v7519_v54 = vld [vmem:[#allocation2 + $0x91] sm:$0xff] }
 0x1a2   : > { %6108 = vmatmul.mubr.msk.f32.gmra.mrb[0].mxu1 %vm728_vm1, %v7045_v38  ;;  %6225 = vmatmul.mubr.msk.f32.vlgmr.msra.gmra.mrb[54].mxu0 %vm728_vm1, %v7047_v57  ;;  %v7527_v57 = vld [vmem:[#allocation2 + $0x99] sm:$0xff] }
 0x1a3   : > { %6110 = vmatprep.mubr.msk.f32.mxu1 %vm728_vm1, %v7059_v39  ;;  %6227 = vmatprep.mubr.msk.f32.mxu0 %vm728_vm1, %v7054_v0  ;;  %v7535_v39 = vld [vmem:[#allocation2 + $0xa1] sm:$0xff] }
 0x1a6   : > { %6111 = vmatmul.mubr.msk.f32.gmra.mrb[2].mxu1 %vm728_vm1, %v7064_v62  ;;  %6228 = vmatmul.mubr.msk.f32.gmra.mrb[56].mxu0 %vm728_vm1, %v7066_v1  ;;  %v7543_v1 = vld [vmem:[#allocation2 + $0xa9] sm:$0xff] }
 0x1a7   : > { %6113 = vmatprep.mubr.msk.f32.mxu1 %vm728_vm1, %v7076_v4  ;;  %6230 = vmatprep.mubr.msk.f32.mxu0 %vm728_vm1, %v7072_v2  ;;  %v7551_v4 = vld [vmem:[#allocation2 + $0xb1] sm:$0xff] }
 0x1aa   : > { %6114 = vmatmul.mubr.msk.f32.gmra.mrb[4].mxu1 %vm728_vm1, %v7080_v7  ;;  %6231 = vmatmul.mubr.msk.f32.gmra.mrb[58].mxu0 %vm728_vm1, %v7082_v9  ;;  %v2363_v9 = vld [vmem:[#allocation2 + $0x117] sm:$0xff] }
 0x1ab   : > { %6116 = vmatprep.mubr.msk.f32.mxu1 %vm728_vm1, %v8303_v6  ;;  %6233 = vmatprep.mubr.msk.f32.mxu0 %vm728_vm1, %v7088_v10  ;;  %v7559_v10 = vld [vmem:[#allocation2 + $0xb9] sm:$0xff] }
 0x1ae   : > { %6117 = vmatmul.mubr.msk.f32.gmra.mrb[6].mxu1 %vm728_vm1, %v8304_v14  ;;  %6234 = vmatmul.mubr.msk.f32.gmra.mrb[60].mxu0 %vm728_vm1, %v7098_v18 }
 0x1af   : > { %6236 = vmatprep.mubr.msk.f32.mxu0 %vm728_vm1, %v7104_v19  ;;  %6119 = vmatprep.mubr.msk.f32.mxu1 %vm728_vm1, %v1387_v8  ;;  %v7566_v19 = vld [vmem:[#allocation2 + $0xc1] sm:$0xff] }
 0x1b2   : > { %6120 = vmatmul.mubr.msk.f32.gmra.mrb[8].mxu1 %vm728_vm1, %v1388_v16  ;;  %6237 = vmatmul.mubr.msk.f32.gmra.mrb[62].mxu0 %vm728_vm1, %v7109_v21 }
 0x1b3   : > { %6239 = vmatprep.mubr.msk.f32.mxu0 %vm728_vm1, %v7121_v26  ;;  %6274 = vmatprep.mubr.msk.f32.mxu1 %vm728_vm1, %v7412_v22  ;;  %v7579_v26 = vld [vmem:[#allocation2 + $0xd1] sm:$0xff] }
 0x1b6   : > { %6240 = vmatmul.mubr.msk.f32.gmra.mrb[64].mxu0 %vm728_vm1, %v7126_v28  ;;  %6275 = vmatmul.mubr.msk.f32.vlgmr.msra.gmra.mrb[32].mxu1 %vm728_vm1, %v7418_v24 }
 0x1b7   : > { %6323 = vmatpush3.msra.mxu1 %v7286_v29  ;;  %6242 = vmatprep.mubr.msk.f32.mxu0 %vm728_vm1, %v7132_v31  ;;  %v7585_v31 = vld [vmem:[#allocation2 + $0xd9] sm:$0xff] }
 0x1b8   : > { %6277 = vmatprep.mubr.msk.f32.mxu1 %vm728_vm1, %v7432_v32  ;;  %6372 = vmatprep.subr.mxu1 %v7423_v30 }
 0x1ba   : > { %6243 = vmatmul.mubr.msk.f32.gmra.mrb[66].mxu0 %vm728_vm1, %v7138_v61  ;;  %6278 = vmatmul.mubr.msk.f32.gmra.mrb[34].mxu1 %vm728_vm1, %v7437_v40 }
 0x1bb   : > { %6245 = vmatprep.mubr.msk.f32.mxu0 %vm728_vm1, %v7144_v63  ;;  %6280 = vmatprep.mubr.msk.f32.mxu1 %vm728_vm1, %v7443_v42  ;;  %v7591_v63 = vld [vmem:[#allocation2 + $0xe1] sm:$0xff] }
 0x1be   : > { %6246 = vmatmul.mubr.msk.f32.gmra.mrb[68].mxu0 %vm728_vm1, %v7150_v33  ;;  %6281 = vmatmul.mubr.msk.f32.gmra.mrb[36].mxu1 %vm728_vm1, %v7449_v48 }
 0x1bf   : > { %6248 = vmatprep.mubr.msk.f32.mxu0 %vm728_vm1, %v7156_v34  ;;  %6283 = vmatprep.mubr.msk.f32.mxu1 %vm728_vm1, %v7455_v50  ;;  %v7597_v34 = vld [vmem:[#allocation2 + $0xe9] sm:$0xff] }
 0x1c2   : > { %6249 = vmatmul.mubr.msk.f32.gmra.mrb[70].mxu0 %vm728_vm1, %v7162_v35  ;;  %6284 = vmatmul.mubr.msk.f32.gmra.mrb[38].mxu1 %vm728_vm1, %v7461_v56 }
 0x1c3   : > { %6251 = vmatprep.mubr.msk.f32.mxu0 %vm728_vm1, %v7168_v37  ;;  %6286 = vmatprep.mubr.msk.f32.mxu1 %vm728_vm1, %v7467_v58  ;;  %v7603_v37 = vld [vmem:[#allocation2 + $0xf1] sm:$0xff] }
 0x1c6   : > { %6252 = vmatmul.mubr.msk.f32.gmra.mrb[72].mxu0 %vm728_vm1, %v7174_v44  ;;  %6287 = vmatmul.mubr.msk.f32.gmra.mrb[40].mxu1 %vm728_vm1, %v7473_v3 }
 0x1c7   : > { %6254 = vmatprep.mubr.msk.f32.mxu0 %vm728_vm1, %v7180_v45  ;;  %6289 = vmatprep.mubr.msk.f32.mxu1 %vm728_vm1, %v7479_v5  ;;  %v7609_v45 = vld [vmem:[#allocation2 + $0xf9] sm:$0xff] }
 0x1c9   : > { %v7485_v13 = vpop.f32.mrb[32].mxu0 }
 0x1ca   : > { %v7489_v25 = vpop.f32.mrb[33].mxu0  ;;  %6255 = vmatmul.mubr.msk.f32.gmra.mrb[74].mxu0 %vm728_vm1, %v7186_v49  ;;  %6290 = vmatmul.mubr.msk.f32.gmra.mrb[42].mxu1 %vm728_vm1, %v7487_v17 }
 0x1cb   : > { %6257 = vmatprep.mubr.msk.f32.mxu0 %vm728_vm1, %v7192_v51  ;;  %6292 = vmatprep.mubr.msk.f32.mxu1 %vm728_vm1, %v7495_v27  ;;  %v7615_v51 = vld [vmem:[#allocation2 + $0x101] sm:$0xff] }
 0x1cd   : > { %v7501_v36 = vpop.f32.mrb[34].mxu0 }
 0x1ce   : > { %v7505_v43 = vpop.f32.mrb[35].mxu0  ;;  %6258 = vmatmul.mubr.msk.f32.gmra.mrb[76].mxu0 %vm728_vm1, %v7198_v52  ;;  %6293 = vmatmul.mubr.msk.f32.gmra.mrb[44].mxu1 %vm728_vm1, %v7503_v41 }
 0x1cf   : > { %6260 = vmatprep.mubr.msk.f32.mxu0 %vm728_vm1, %v7204_v53  ;;  %6295 = vmatprep.mubr.msk.f32.mxu1 %vm728_vm1, %v7511_v46  ;;  %v7621_v53 = vld [vmem:[#allocation2 + $0x109] sm:$0xff] }
 0x1d1   : > { %v7517_v47 = vpop.f32.mrb[36].mxu0 }
 0x1d2   : > { %v7521_v38 = vpop.f32.mrb[37].mxu0  ;;  %6261 = vmatmul.mubr.msk.f32.gmra.mrb[78].mxu0 %vm728_vm1, %v7210_v55  ;;  %6296 = vmatmul.mubr.msk.f32.gmra.mrb[46].mxu1 %vm728_vm1, %v7519_v54  ;;  %v2720_v55 = vld [vmem:[#allocation2 + $0x9] sm:$0xff] }
 0x1d3   : > { %6263 = vmatprep.mubr.msk.f32.mxu0 %vm728_vm1, %v7216_v59  ;;  %6298 = vmatprep.mubr.msk.f32.mxu1 %vm728_vm1, %v7527_v57 }
 0x1d5   : > { %v7533_v0 = vpop.f32.mrb[38].mxu0 }
 0x1d6   : > { %v7537_v62 = vpop.f32.mrb[39].mxu0  ;;  %6264 = vmatmul.mubr.msk.f32.gmra.mrb[80].mxu0 %vm728_vm1, %v7222_v60  ;;  %6299 = vmatmul.mubr.msk.f32.gmra.mrb[48].mxu1 %vm728_vm1, %v7535_v39  ;;  %v7627_v60 = vld [vmem:[#allocation2 + $0x111] sm:$0xff] }
 0x1d7   : > { %6266 = vmatprep.mubr.msk.f32.mxu0 %vm728_vm1, %v7228_v12  ;;  %6301 = vmatprep.mubr.msk.f32.mxu1 %vm728_vm1, %v7543_v1 }
 0x1d9   : > { %v7549_v2 = vpop.f32.mrb[40].mxu0 }
 0x1da   : > { %v7553_v7 = vpop.f32.mrb[41].mxu0  ;;  %6267 = vmatmul.mubr.msk.f32.gmra.mrb[82].mxu0 %vm728_vm1, %v7234_v15  ;;  %6302 = vmatmul.mubr.msk.f32.gmra.mrb[50].mxu1 %vm728_vm1, %v7551_v4  ;;  %v7573_v15 = vld [vmem:[#allocation2 + $0xc9] sm:$0xff] }
 0x1db   : > { %6269 = vmatprep.mubr.msk.f32.mxu0 %vm728_vm1, %v2363_v9  ;;  %6304 = vmatprep.mubr.msk.f32.mxu1 %vm728_vm1, %v7559_v10 }
 0x1dd   : > { %v7564_v18 = vpop.f32.mrb[42].mxu0 }
 0x1de   : > { %v7568_v21 = vpop.f32.mrb[43].mxu0  ;;  %6270 = vmatmul.mubr.msk.f32.gmra.mrb[84].mxu0 %vm728_vm1, %v2364_v11  ;;  %6305 = vmatmul.mubr.msk.f32.gmra.mrb[52].mxu1 %vm728_vm1, %v7566_v19 }
 0x1df   : > { %6307 = vmatprep.mubr.msk.f32.mxu1 %vm728_vm1, %v7573_v15 }
 0x1e1   : > { %v7577_v23 = vpop.f32.mrb[44].mxu0 }
 0x1e2   : > { %v7581_v28 = vpop.f32.mrb[45].mxu0  ;;  %6308 = vmatmul.mubr.msk.f32.gmra.mrb[54].mxu1 %vm728_vm1, %v7579_v26 }
 0x1e3   : > { %6310 = vmatprep.mubr.msk.f32.mxu1 %vm728_vm1, %v7585_v31 }
 0x1e5   : > { %v7589_v61 = vpop.f32.mrb[46].mxu0 }
 0x1e6   : > { %v7593_v33 = vpop.f32.mrb[47].mxu0  ;;  %6311 = vmatmul.mubr.msk.f32.gmra.mrb[56].mxu1 %vm728_vm1, %v7591_v63 }
 0x1e7   : > { %6313 = vmatprep.mubr.msk.f32.mxu1 %vm728_vm1, %v7597_v34 }
 0x1e9   : > { %v7601_v35 = vpop.f32.mrb[48].mxu0 }
 0x1ea   : > { %v7605_v44 = vpop.f32.mrb[49].mxu0  ;;  %6314 = vmatmul.mubr.msk.f32.gmra.mrb[58].mxu1 %vm728_vm1, %v7603_v37 }
 0x1eb   : > { %6316 = vmatprep.mubr.msk.f32.mxu1 %vm728_vm1, %v7609_v45 }
 0x1ed   : > { %v7613_v49 = vpop.f32.mrb[50].mxu0 }
 0x1ee   : > { %v7617_v52 = vpop.f32.mrb[51].mxu0  ;;  %6317 = vmatmul.mubr.msk.f32.gmra.mrb[60].mxu1 %vm728_vm1, %v7615_v51 }
 0x1ef   : > { %6319 = vmatprep.mubr.msk.f32.mxu1 %vm728_vm1, %v7621_v53 }
 0x1f1   : > { %v7625_v59 = vpop.f32.mrb[52].mxu0 }
 0x1f2   : > { %v7629_v12 = vpop.f32.mrb[53].mxu0  ;;  %6320 = vmatmul.mubr.msk.f32.gmra.mrb[62].mxu1 %vm728_vm1, %v7627_v60 }
 0x1f3   : > { %6324 = vmatprep.mubr.msk.f32.mxu1 %vm728_vm1, %v2720_v55 }
 0x1f6   : > { %6325 = vmatmul.mubr.msk.f32.vlgmr.msra.gmra.mrb[32].mxu1 %vm728_vm1, %v2721_v20 }
 0x1f7   : > { %6373 = vmatpush3.msra.mxu1 %v7423_v30  ;;  %6327 = vmatprep.mubr.msk.f32.mxu1 %vm728_vm1, %v7412_v22 }
 0x1fa   : > { %6328 = vmatmul.mubr.msk.f32.gmra.mrb[34].mxu1 %vm728_vm1, %v7418_v24 }
 0x1fb   : > { %6330 = vmatprep.mubr.msk.f32.mxu1 %vm728_vm1, %v7432_v32 }
 0x1fe   : > { %6331 = vmatmul.mubr.msk.f32.gmra.mrb[36].mxu1 %vm728_vm1, %v7437_v40 }
 0x1ff   : > { %6333 = vmatprep.mubr.msk.f32.mxu1 %vm728_vm1, %v7443_v42 }
 0x202   : > { %6334 = vmatmul.mubr.msk.f32.gmra.mrb[38].mxu1 %vm728_vm1, %v7449_v48 }
 0x203   : > { %6336 = vmatprep.mubr.msk.f32.mxu1 %vm728_vm1, %v7455_v50 }
 0x206   : > { %6337 = vmatmul.mubr.msk.f32.gmra.mrb[40].mxu1 %vm728_vm1, %v7461_v56 }
 0x207   : > { %6339 = vmatprep.mubr.msk.f32.mxu1 %vm728_vm1, %v7467_v58 }
 0x20a   : > { %6340 = vmatmul.mubr.msk.f32.gmra.mrb[42].mxu1 %vm728_vm1, %v7473_v3 }
 0x20b   : > { %6342 = vmatprep.mubr.msk.f32.mxu1 %vm728_vm1, %v7479_v5 }
 0x20e   : > { %6343 = vmatmul.mubr.msk.f32.gmra.mrb[44].mxu1 %vm728_vm1, %v7487_v17 }
 0x20f   : > { %6345 = vmatprep.mubr.msk.f32.mxu1 %vm728_vm1, %v7495_v27 }
 0x212   : > { %6346 = vmatmul.mubr.msk.f32.gmra.mrb[46].mxu1 %vm728_vm1, %v7503_v41 }
 0x213   : > { %6348 = vmatprep.mubr.msk.f32.mxu1 %vm728_vm1, %v7511_v46 }
 0x216   : > { %6349 = vmatmul.mubr.msk.f32.gmra.mrb[48].mxu1 %vm728_vm1, %v7519_v54 }
 0x217   : > { %6351 = vmatprep.mubr.msk.f32.mxu1 %vm728_vm1, %v7527_v57 }
 0x21a   : > { %6352 = vmatmul.mubr.msk.f32.gmra.mrb[50].mxu1 %vm728_vm1, %v7535_v39 }
 0x21b   : > { %6354 = vmatprep.mubr.msk.f32.mxu1 %vm728_vm1, %v7543_v1 }
 0x21e   : > { %6355 = vmatmul.mubr.msk.f32.gmra.mrb[52].mxu1 %vm728_vm1, %v7551_v4 }
 0x21f   : > { %6357 = vmatprep.mubr.msk.f32.mxu1 %vm728_vm1, %v7559_v10 }
 0x222   : > { %6358 = vmatmul.mubr.msk.f32.gmra.mrb[54].mxu1 %vm728_vm1, %v7566_v19 }
 0x223   : > { %6360 = vmatprep.mubr.msk.f32.mxu1 %vm728_vm1, %v7573_v15 }
 0x226   : > { %6361 = vmatmul.mubr.msk.f32.gmra.mrb[56].mxu1 %vm728_vm1, %v7579_v26 }
 0x227   : > { %6363 = vmatprep.mubr.msk.f32.mxu1 %vm728_vm1, %v7585_v31 }
 0x22a   : > { %6364 = vmatmul.mubr.msk.f32.gmra.mrb[58].mxu1 %vm728_vm1, %v7591_v63 }
 0x22b   : > { %6366 = vmatprep.mubr.msk.f32.mxu1 %vm728_vm1, %v7597_v34 }
 0x22e   : > { %6367 = vmatmul.mubr.msk.f32.gmra.mrb[60].mxu1 %vm728_vm1, %v7603_v37 }
 0x22f   : > { %6369 = vmatprep.mubr.msk.f32.mxu1 %vm728_vm1, %v7609_v45 }
 0x232   : > { %6370 = vmatmul.mubr.msk.f32.gmra.mrb[62].mxu1 %vm728_vm1, %v7615_v51 }
 0x233   : > { %6374 = vmatprep.mubr.msk.f32.mxu1 %vm728_vm1, %v7432_v32 }
 0x236   : > { %6375 = vmatmul.mubr.msk.f32.vlgmr.msra.gmra.mrb[32].mxu1 %vm728_vm1, %v7437_v40 }
 0x237   : > { %6377 = vmatprep.mubr.msk.f32.mxu1 %vm728_vm1, %v7443_v42 }
 0x23a   : > { %6378 = vmatmul.mubr.msk.f32.gmra.mrb[34].mxu1 %vm728_vm1, %v7449_v48 }
 0x23b   : > { %6380 = vmatprep.mubr.msk.f32.mxu1 %vm728_vm1, %v7455_v50 }
 0x23e   : > { %6381 = vmatmul.mubr.msk.f32.gmra.mrb[36].mxu1 %vm728_vm1, %v7461_v56 }
 0x23f   : > { %6383 = vmatprep.mubr.msk.f32.mxu1 %vm728_vm1, %v7467_v58 }
 0x242   : > { %6384 = vmatmul.mubr.msk.f32.gmra.mrb[38].mxu1 %vm728_vm1, %v7473_v3 }
 0x243   : > { %6386 = vmatprep.mubr.msk.f32.mxu1 %vm728_vm1, %v7479_v5 }
 0x246   : > { %6387 = vmatmul.mubr.msk.f32.gmra.mrb[40].mxu1 %vm728_vm1, %v7487_v17 }
 0x247   : > { %6389 = vmatprep.mubr.msk.f32.mxu1 %vm728_vm1, %v7495_v27 }
 0x249   : > { %v6076_v29 = vpop.f32.mrb[10].mxu1 }
 0x24a   : > { %v7719_v6 = vadd.f32 %v6076_v29, %v7485_v13  ;;  %v1553_v8 = vpop.f32.mrb[11].mxu1  ;;  %6390 = vmatmul.mubr.msk.f32.gmra.mrb[42].mxu1 %vm728_vm1, %v7503_v41 }
 0x24b   : > { %v7724_v14 = vadd.f32 %v1553_v8, %v7489_v25  ;;  %6392 = vmatprep.mubr.msk.f32.mxu1 %vm728_vm1, %v7511_v46 }
 0x24d   : > { %v6079_v16 = vpop.f32.mrb[12].mxu1 }
 0x24e   : > { %v7729_v22 = vadd.f32 %v6079_v16, %v7501_v36  ;;  %v1563_v24 = vpop.f32.mrb[13].mxu1  ;;  %6393 = vmatmul.mubr.msk.f32.gmra.mrb[44].mxu1 %vm728_vm1, %v7519_v54 }
 0x24f   : > { %v7734_v30 = vadd.f32 %v1563_v24, %v7505_v43  ;;  %6395 = vmatprep.mubr.msk.f32.mxu1 %vm728_vm1, %v7527_v57 }
 0x251   : > { %v6082_v32 = vpop.f32.mrb[14].mxu1 }
 0x252   : > { %v7739_v40 = vadd.f32 %v6082_v32, %v7517_v47  ;;  %v1573_v42 = vpop.f32.mrb[15].mxu1  ;;  %6396 = vmatmul.mubr.msk.f32.gmra.mrb[46].mxu1 %vm728_vm1, %v7535_v39 }
 0x253   : > { %v7744_v48 = vadd.f32 %v1573_v42, %v7521_v38  ;;  %6398 = vmatprep.mubr.msk.f32.mxu1 %vm728_vm1, %v7543_v1  ;;  %v3697_v1 = vlaneseq }
 0x255   : > { %v6085_v50 = vpop.f32.mrb[16].mxu1  ;;  %v7808_v11 = vshrl.u32 %v3697_v1, 7 }
 0x256   : > { %v7749_v56 = vadd.f32 %v6085_v50, %v7533_v0  ;;  %v1583_v58 = vpop.f32.mrb[17].mxu1  ;;  %6399 = vmatmul.mubr.msk.f32.gmra.mrb[48].mxu1 %vm728_vm1, %v7551_v4 }
 0x257   : > { %v7754_v3 = vadd.f32 %v1583_v58, %v7537_v62  ;;  %6401 = vmatprep.mubr.msk.f32.mxu1 %vm728_vm1, %v7559_v10  ;;  %v3340_v10 = vld [vmem:[#allocation2 + $0x119] sm:$0xff]  ;;  %v3706_v24 = vadd.s32 64, %v7808_v11 }
 0x259   : > { %v6088_v5 = vpop.f32.mrb[18].mxu1 }
 0x25a   : > { %v7759_v13 = vadd.f32 %v6088_v5, %v7549_v2  ;;  %v1593_v17 = vpop.f32.mrb[19].mxu1  ;;  %6402 = vmatmul.mubr.msk.f32.gmra.mrb[50].mxu1 %vm728_vm1, %v7566_v19 }
 0x25b   : > { %v7764_v25 = vadd.f32 %v1593_v17, %v7553_v7  ;;  %6404 = vmatprep.mubr.msk.f32.mxu1 %vm728_vm1, %v7573_v15 }
 0x25d   : > { %v6091_v27 = vpop.f32.mrb[20].mxu1 }
 0x25e   : > { %v7769_v36 = vadd.f32 %v6091_v27, %v7564_v18  ;;  %v1603_v41 = vpop.f32.mrb[21].mxu1  ;;  %6405 = vmatmul.mubr.msk.f32.gmra.mrb[52].mxu1 %vm728_vm1, %v7579_v26  ;;  %v3734_v26 = vand.u32 15, %v7808_v11  ;;  %v3708_v27 = vadd.s32 80, %v7808_v11 }
 0x25f   : > { %v7774_v43 = vadd.f32 %v1603_v41, %v7568_v21  ;;  %6407 = vmatprep.mubr.msk.f32.mxu1 %vm728_vm1, %v7585_v31 }
 0x260   : > { %vm4114_vm2 = vcmp.eq.s32.totalorder %v3734_v26, 0 }
 0x261   : > { %v6094_v46 = vpop.f32.mrb[22].mxu1 }
 0x262   : > { %v7779_v47 = vadd.f32 %v6094_v46, %v7577_v23  ;;  %v1613_v54 = vpop.f32.mrb[23].mxu1  ;;  %6408 = vmatmul.mubr.msk.f32.gmra.mrb[54].mxu1 %vm728_vm1, %v7591_v63  ;;  %v3341_v23 = vld [vmem:[#allocation2 + $0x121] sm:$0xff] }
 0x263   : > { %v7784_v38 = vadd.f32 %v1613_v54, %v7581_v28  ;;  %6410 = vmatprep.mubr.msk.f32.mxu1 %vm728_vm1, %v7597_v34  ;;  %v3700_v28 = vadd.s32 16, %v7808_v11 }
 0x265   : > { %v6097_v57 = vpop.f32.mrb[24].mxu1  ;;  %v3748_v34 = vand.u32 15, %v3700_v28  ;;  %v3712_v28 = vadd.s32 112, %v7808_v11 }
 0x266   : > { %v7789_v0 = vadd.f32 %v6097_v57, %v7589_v61  ;;  %v1623_v39 = vpop.f32.mrb[25].mxu1  ;;  %6411 = vmatmul.mubr.msk.f32.gmra.mrb[56].mxu1 %vm728_vm1, %v7603_v37 }
 0x267   : > { %v7794_v62 = vadd.f32 %v1623_v39, %v7593_v33  ;;  %6413 = vmatprep.mubr.msk.f32.mxu1 %vm728_vm1, %v7609_v45  ;;  %vm4116_vm3 = vcmp.eq.s32.totalorder %v3748_v34, 0 }
 0x269   : > { %v6100_v2 = vpop.f32.mrb[26].mxu1 }
 0x26a   : > { %v7799_v4 = vadd.f32 %v6100_v2, %v7601_v35  ;;  %v1633_v7 = vpop.f32.mrb[27].mxu1  ;;  %6414 = vmatmul.mubr.msk.f32.gmra.mrb[58].mxu1 %vm728_vm1, %v7615_v51  ;;  %v3702_v35 = vadd.s32 32, %v7808_v11  ;;  %v3710_v2 = vadd.s32 96, %v7808_v11 }
 0x26b   : > { %v7804_v9 = vadd.f32 %v1633_v7, %v7605_v44  ;;  %6416 = vmatprep.mubr.msk.f32.mxu1 %vm728_vm1, %v7621_v53 }
 0x26c   : > { %v3762_v55 = vand.u32 15, %v3702_v35 }
 0x26d   : > { %v6103_v18 = vpop.f32.mrb[28].mxu1 }
 0x26e   : > { %v7811_v19 = vadd.f32 %v6103_v18, %v7613_v49  ;;  %v1643_v21 = vpop.f32.mrb[29].mxu1  ;;  %6417 = vmatmul.mubr.msk.f32.gmra.mrb[60].mxu1 %vm728_vm1, %v7627_v60  ;;  %vm4118_vm4 = vcmp.eq.s32.totalorder %v3762_v55, 0 }
 0x26f   : > { %v7816_v15 = vadd.f32 %v1643_v21, %v7617_v52  ;;  %6419 = vmatprep.mubr.msk.f32.mxu1 %vm728_vm1, %v3340_v10 }
 0x271   : > { %v6106_v31 = vpop.f32.mrb[30].mxu1 }
 0x272   : > { %v7822_v61 = vadd.f32 %v6106_v31, %v7625_v59  ;;  %v1653_v63 = vpop.f32.mrb[31].mxu1  ;;  %6420 = vmatmul.mubr.msk.f32.gmra.mrb[62].mxu1 %vm728_vm1, %v3341_v23  ;;  %v3704_v59 = vadd.s32 48, %v7808_v11 }
 0x273   : > { %v7826_v33 = vadd.f32 %v1653_v63, %v7629_v12 }
 0x275   : > { %v7829_v37 = vpop.f32.mrb[0].mxu1  ;;  %v6226_v44 = vpop.f32.mrb[54].mxu0 }
 0x276   : > { %v7832_v45 = vadd.f32 %v7719_v6, %v6226_v44  ;;  %v7834_v49 = vpop.f32.mrb[1].mxu1  ;;  %v2529_v51 = vpop.f32.mrb[55].mxu0  ;;  %v3832_v44 = vand.u32 15, %v3712_v28 }
 0x277   : > { %v4210_v52 = vsel %vm4114_vm2, 0.0, %v2529_v51  ;;  %v3714_v51 = vadd.s32 128, %v7808_v11 }
 0x278   : > { %v7837_v53 = vadd.f32 %v7724_v14, %v4210_v52  ;;  %v3776_v14 = vand.u32 15, %v3704_v59  ;;  %vm4128_vm9 = vcmp.eq.s32.totalorder %v3832_v44, 0 }
 0x279   : > { %v7840_v60 = vpop.f32.mrb[2].mxu1  ;;  %v6229_v12 = vpop.f32.mrb[56].mxu0 }
 0x27a   : > { %v7843_v20 = vadd.f32 %v7729_v22, %v6229_v12  ;;  %v7845_v29 = vpop.f32.mrb[3].mxu1  ;;  %v2539_v6 = vpop.f32.mrb[57].mxu0  ;;  %vm4120_vm5 = vcmp.eq.s32.totalorder %v3776_v14, 0 }
 0x27b   : > { %v4212_v8 = vsel %vm4116_vm3, 0.0, %v2539_v6  ;;  %v3716_v6 = vadd.s32 144, %v7808_v11 }
 0x27c   : > { %v7848_v16 = vadd.f32 %v7734_v30, %v4212_v8  ;;  %v3790_v30 = vand.u32 15, %v3706_v24 }
 0x27d   : > { %v7851_v32 = vpop.f32.mrb[4].mxu1  ;;  %v6232_v42 = vpop.f32.mrb[58].mxu0 }
 0x27e   : > { %v7854_v50 = vadd.f32 %v7739_v40, %v6232_v42  ;;  %v7856_v58 = vpop.f32.mrb[5].mxu1  ;;  %v2549_v22 = vpop.f32.mrb[59].mxu0  ;;  %vm4122_vm6 = vcmp.eq.s32.totalorder %v3790_v30, 0 }
 0x27f   : > { %v4214_v5 = vsel %vm4118_vm4, 0.0, %v2549_v22  ;;  %v3718_v22 = vadd.s32 160, %v7808_v11 }
 0x280   : > { %v7859_v17 = vadd.f32 %v7744_v48, %v4214_v5  ;;  %v3804_v48 = vand.u32 15, %v3708_v27 }
 0x281   : > { %v7862_v41 = vpop.f32.mrb[6].mxu1  ;;  %v6235_v46 = vpop.f32.mrb[60].mxu0 }
 0x282   : > { %v7865_v54 = vadd.f32 %v7749_v56, %v6235_v46  ;;  %v7867_v57 = vpop.f32.mrb[7].mxu1  ;;  %v2559_v40 = vpop.f32.mrb[61].mxu0  ;;  %vm4124_vm7 = vcmp.eq.s32.totalorder %v3804_v48, 0 }
 0x283   : > { %v4216_v39 = vsel %vm4120_vm5, 0.0, %v2559_v40  ;;  %v3720_v40 = vadd.s32 176, %v7808_v11 }
 0x284   : > { %v7870_v1 = vadd.f32 %v7754_v3, %v4216_v39  ;;  %v3818_v3 = vand.u32 15, %v3710_v2 }
 0x285   : > { %v7873_v7 = vpop.f32.mrb[8].mxu1  ;;  %v6238_v10 = vpop.f32.mrb[62].mxu0 }
 0x286   : > { %v7876_v18 = vadd.f32 %v7759_v13, %v6238_v10  ;;  %v7878_v21 = vpop.f32.mrb[9].mxu1  ;;  %v2569_v56 = vpop.f32.mrb[63].mxu0  ;;  %vm4126_vm8 = vcmp.eq.s32.totalorder %v3818_v3, 0 }
 0x287   : > { %v4218_v23 = vsel %vm4122_vm6, 0.0, %v2569_v56  ;;  %v3722_v56 = vadd.s32 192, %v7808_v11 }
 0x288   : > { %v7881_v26 = vadd.f32 %v7764_v25, %v4218_v23 }
 0x289   : > { %v6241_v31 = vpop.f32.mrb[64].mxu0 }
 0x28a   : > { %v7885_v63 = vadd.f32 %v7769_v36, %v6241_v31  ;;  %v2579_v34 = vpop.f32.mrb[65].mxu0  ;;  %v3846_v36 = vand.u32 15, %v3714_v51 }
 0x28b   : > { %v4220_v35 = vsel %vm4124_vm7, 0.0, %v2579_v34  ;;  %v3724_v34 = vadd.s32 208, %v7808_v11 }
 0x28c   : > { %v7888_v13 = vadd.f32 %v7774_v43, %v4220_v35  ;;  %vm4130_vm10 = vcmp.eq.s32.totalorder %v3846_v36, 0 }
 0x28d   : > { %v6244_v52 = vpop.f32.mrb[66].mxu0 }
 0x28e   : > { %v7892_v25 = vadd.f32 %v7779_v47, %v6244_v52  ;;  %v2589_v55 = vpop.f32.mrb[67].mxu0  ;;  %v3860_v47 = vand.u32 15, %v3716_v6 }
 0x28f   : > { %v4222_v59 = vsel %vm4126_vm8, 0.0, %v2589_v55  ;;  %v3726_v55 = vadd.s32 224, %v7808_v11 }
 0x290   : > { %v7895_v12 = vadd.f32 %v7784_v38, %v4222_v59  ;;  %vm4132_vm11 = vcmp.eq.s32.totalorder %v3860_v47, 0 }
 0x291   : > { %v6247_v8 = vpop.f32.mrb[68].mxu0 }
 0x292   : > { %v7899_v43 = vadd.f32 %v7789_v0, %v6247_v8  ;;  %v2599_v14 = vpop.f32.mrb[69].mxu0  ;;  %v3874_v0 = vand.u32 15, %v3718_v22 }
 0x293   : > { %v4224_v24 = vsel %vm4128_vm9, 0.0, %v2599_v14  ;;  %v3728_v14 = vadd.s32 240, %v7808_v11 }
 0x294   : > { %v7902_v42 = vadd.f32 %v7794_v62, %v4224_v24  ;;  %vm4134_vm12 = vcmp.eq.s32.totalorder %v3874_v0, 0 }
 0x295   : > { %v6250_v5 = vpop.f32.mrb[70].mxu0 }
 0x296   : > { %v7906_v38 = vadd.f32 %v7799_v4, %v6250_v5  ;;  %v2609_v30 = vpop.f32.mrb[71].mxu0  ;;  %v3888_v4 = vand.u32 15, %v3720_v40 }
 0x297   : > { %v4226_v27 = vsel %vm4130_vm10, 0.0, %v2609_v30 }
 0x298   : > { %v7909_v46 = vadd.f32 %v7804_v9, %v4226_v27  ;;  %vm4136_vm13 = vcmp.eq.s32.totalorder %v3888_v4, 0  ;;  %v4817_v4 = vld [vmem:[%s6766_s18] ss:$2 sm:$0xff] }
 0x299   : > { %v6253_v39 = vpop.f32.mrb[72].mxu0 }
 0x29a   : > { %v7913_v62 = vadd.f32 %v7811_v19, %v6253_v39  ;;  %v2619_v48 = vpop.f32.mrb[73].mxu0  ;;  %v3902_v19 = vand.u32 15, %v3722_v56  ;;  %v5526_v56 = vld [vmem:[%s6766_s18 + $0x10] ss:$2 sm:$0xff] }
 0x29b   : > { %v4228_v2 = vsel %vm4132_vm11, 0.0, %v2619_v48 }
 0x29c   : > { %v7916_v10 = vadd.f32 %v7816_v15, %v4228_v2  ;;  %vm4138_vm14 = vcmp.eq.s32.totalorder %v3902_v19, 0 }
 0x29d   : > { %v6256_v23 = vpop.f32.mrb[74].mxu0 }
 0x29e   : > { %v7920_v9 = vadd.f32 %v7822_v61, %v6256_v23  ;;  %v2629_v3 = vpop.f32.mrb[75].mxu0  ;;  %v3916_v61 = vand.u32 15, %v3724_v34  ;;  %v4960_v23 = vld [vmem:[%s8296_s7] sm:$0xff] }
 0x29f   : > { %v4230_v28 = vsel %vm4134_vm12, 0.0, %v2629_v3  ;;  %v5542_v3 = vld [vmem:[%s6766_s18 + $0x11] ss:$2 sm:$0xff]  ;;  %v5527_v34 = vld [vmem:[%s6766_s18 + $0x20] ss:$2 sm:$0xff] }
 0x2a0   : > { %v7923_v31 = vadd.f32 %v7826_v33, %v4230_v28  ;;  %vm4140_vm15 = vcmp.eq.s32.totalorder %v3916_v61, 0 }
 0x2a1   : > { %v6259_v35 = vpop.f32.mrb[76].mxu0 }
 0x2a2   : > { %v7927_v15 = vadd.f32 %v6259_v35, %v7829_v37  ;;  %v2639_v44 = vpop.f32.mrb[77].mxu0  ;;  %v3930_v37 = vand.u32 15, %v3726_v55  ;;  %v5528_v35 = vld [vmem:[%s6766_s18 + $0x30] ss:$2 sm:$0xff] }
 0x2a3   : > { %v4232_v51 = vsel %vm4136_vm13, 0.0, %v2639_v44  ;;  %v5543_v44 = vld [vmem:[%s6766_s18 + $0x21] ss:$2 sm:$0xff] }
 0x2a4   : > { %v7930_v52 = vadd.f32 %v4232_v51, %v7834_v49  ;;  %vm4142_vm2 = vcmp.eq.s32.totalorder %v3930_v37, 0  ;;  %v5544_v51 = vld [vmem:[%s6766_s18 + $0x31] ss:$2 sm:$0xff]  ;;  %v4882_v61 = vadd.f32 %v5543_v44, %v5527_v34 }
 0x2a5   : > { %v6262_v59 = vpop.f32.mrb[78].mxu0  ;;  %v4883_v55 = vadd.f32 %v5544_v51, %v5528_v35  ;;  %v5546_v37 = vld [vmem:[%s6766_s18 + $0x51] ss:$2 sm:$0xff] }
 0x2a6   : > { %v7934_v33 = vadd.f32 %v6262_v59, %v7840_v60  ;;  %v2649_v36 = vpop.f32.mrb[79].mxu0  ;;  %v3944_v60 = vand.u32 15, %v3728_v14  ;;  %v5529_v59 = vld [vmem:[%s6766_s18 + $0x40] ss:$2 sm:$0xff]  ;;  %4898 = vst.msk [vmem:[#allocation6 + $0x10] sm:$0xff] %vm374_vm0, %v4882_v61 }
 0x2a7   : > { %v4234_v6 = vsel %vm4138_vm14, 0.0, %v2649_v36  ;;  %v5530_v36 = vld [vmem:[%s6766_s18 + $0x50] ss:$2 sm:$0xff]  ;;  %4899 = vst.msk [vmem:[#allocation6 + $0x18] sm:$0xff] %vm374_vm0, %v4883_v55  ;;  %v5537_v61 = vld [vmem:[%s6766_s18 + $0xc0] ss:$2 sm:$0xff] }
 0x2a8   : > { %v7937_v8 = vadd.f32 %v4234_v6, %v7845_v29  ;;  %vm4144_vm3 = vcmp.eq.s32.totalorder %v3944_v60, 0  ;;  %v5545_v6 = vld [vmem:[%s6766_s18 + $0x41] ss:$2 sm:$0xff]  ;;  %v5538_v55 = vld [vmem:[%s6766_s18 + $0xd0] ss:$2 sm:$0xff] }
 0x2a9   : > { %v6265_v24 = vpop.f32.mrb[80].mxu0  ;;  %v4884_v14 = vadd.f32 %v5545_v6, %v5529_v59  ;;  %v5547_v60 = vld [vmem:[%s6766_s18 + $0x61] ss:$2 sm:$0xff]  ;;  %v5554_v6 = vld [vmem:[%s6766_s18 + $0xd1] ss:$2 sm:$0xff] }
 0x2aa   : > { %v7941_v49 = vadd.f32 %v6265_v24, %v7851_v32  ;;  %v2659_v47 = vpop.f32.mrb[81].mxu0  ;;  %v4680_v32 = vld [vmem:[%s8294_s5] sm:$0xff] }
 0x2ab   : > { %v4236_v22 = vsel %vm4140_vm15, 0.0, %v2659_v47  ;;  %6422 = vmatprep.subr.mxu0 %v4680_v32  ;;  %v5531_v24 = vld [vmem:[%s6766_s18 + $0x60] ss:$2 sm:$0xff]  ;;  %v5532_v47 = vld [vmem:[%s6766_s18 + $0x70] ss:$2 sm:$0xff]  ;;  %4900 = vst.msk [vmem:[#allocation6 + $0x20] sm:$0xff] %vm374_vm0, %v4884_v14 }
 0x2ac   : > { %v7944_v5 = vadd.f32 %v4236_v22, %v7856_v58  ;;  %6423 = vmatpush3.msra.mxu0 %v4680_v32  ;;  %v4885_v22 = vadd.f32 %v5546_v37, %v5530_v36  ;;  %v5533_v32 = vld [vmem:[%s6766_s18 + $0x80] ss:$2 sm:$0xff]  ;;  %v5553_v36 = vld [vmem:[%s6766_s18 + $0xc1] ss:$2 sm:$0xff] }
 0x2ad   : > { %v6268_v30 = vpop.f32.mrb[82].mxu0  ;;  %v4917_v51 = vld [vmem:[#allocation6 + $0x10] sm:$0xff] }
 0x2ae   : > { %v7947_v29 = vadd.f32 %v6268_v30, %v7862_v41  ;;  %v2669_v27 = vpop.f32.mrb[83].mxu0  ;;  %v5548_v30 = vld [vmem:[%s6766_s18 + $0x71] ss:$2 sm:$0xff]  ;;  %4901 = vst.msk [vmem:[#allocation6 + $0x28] sm:$0xff] %vm374_vm0, %v4885_v22  ;;  %v4918_v59 = vld [vmem:[#allocation6 + $0x18] sm:$0xff]  ;;  %v4893_v22 = vadd.f32 %v5554_v6, %v5538_v55 }
 0x2af   : > { %v4238_v0 = vsel %vm4142_vm2, 0.0, %v2669_v27  ;;  %v4886_v27 = vadd.f32 %v5547_v60, %v5531_v24  ;;  %v4919_v14 = vadd.f32 %v4918_v59, %v4917_v51  ;;  %v5539_v60 = vld [vmem:[%s6766_s18 + $0xe0] ss:$2 sm:$0xff] }
 0x2b0   : > { %v7953_v40 = vadd.f32 %v4238_v0, %v7867_v57  ;;  %v5541_v57 = vld [vmem:[%s6766_s18 + $0x1] ss:$2 sm:$0xff]  ;;  %v4887_v0 = vadd.f32 %v5548_v30, %v5532_v47  ;;  %v4892_v47 = vadd.f32 %v5553_v36, %v5537_v61  ;;  %v5540_v30 = vld [vmem:[%s6766_s18 + $0xf0] ss:$2 sm:$0xff]  ;;  %4909 = vst.msk [vmem:[#allocation6 + $0x68] sm:$0xff] %vm374_vm0, %v4893_v22 }
 0x2b1   : > { %v6271_v58 = vpop.f32.mrb[84].mxu0  ;;  %v4880_v28 = vadd.f32 %v5541_v57, %v4817_v4  ;;  %4902 = vst.msk [vmem:[#allocation6 + $0x30] sm:$0xff] %vm374_vm0, %v4886_v27  ;;  %v5536_v57 = vld [vmem:[%s6766_s18 + $0xb0] ss:$2 sm:$0xff] }
 0x2b2   : > { %v7956_v41 = vadd.f32 %v6271_v58, %v7873_v7  ;;  %v2679_v39 = vpop.f32.mrb[85].mxu0  ;;  %v4961_v7 = vld [vmem:[%s8296_s7 + $0x8] sm:$0xff]  ;;  %v5534_v58 = vld [vmem:[%s6766_s18 + $0x90] ss:$2 sm:$0xff]  ;;  %4903 = vst.msk [vmem:[#allocation6 + $0x38] sm:$0xff] %vm374_vm0, %v4887_v0  ;;  %4908 = vst.msk [vmem:[#allocation6 + $0x60] sm:$0xff] %vm374_vm0, %v4892_v47 }
 0x2b3   : > { %v4240_v48 = vsel %vm4144_vm3, 0.0, %v2679_v39  ;;  %v7971_v19 = vpack.c.bf16 %v4961_v7, %v4960_v23  ;;  %4896 = vst.msk [vmem:[#allocation6] sm:$0xff] %vm374_vm0, %v4880_v28  ;;  %v5549_v39 = vld [vmem:[%s6766_s18 + $0x81] ss:$2 sm:$0xff]  ;;  %v5552_v28 = vld [vmem:[%s6766_s18 + $0xb1] ss:$2 sm:$0xff] }
 0x2b4   : > { %v7959_v2 = vadd.f32 %v4240_v48, %v7878_v21  ;;  %v4881_v21 = vadd.f32 %v5542_v3, %v5526_v56  ;;  %v5550_v48 = vld [vmem:[%s6766_s18 + $0x91] ss:$2 sm:$0xff]  ;;  %v4888_v4 = vadd.f32 %v5549_v39, %v5533_v32  ;;  %v5535_v56 = vld [vmem:[%s6766_s18 + $0xa0] ss:$2 sm:$0xff]  ;;  %v5551_v3 = vld [vmem:[%s6766_s18 + $0xa1] ss:$2 sm:$0xff]  ;;  %v4891_v35 = vadd.f32 %v5552_v28, %v5536_v57 }
 0x2b5   : > { %6457 = vmatprep.subr.bf16.mxu0 %v7971_v19  ;;  %v4889_v7 = vadd.f32 %v5550_v48, %v5534_v58  ;;  %v4890_v34 = vadd.f32 %v5551_v3, %v5535_v56  ;;  %v4922_v24 = vld [vmem:[#allocation6 + $0x20] sm:$0xff]  ;;  %v4923_v27 = vld [vmem:[#allocation6 + $0x28] sm:$0xff]  ;;  %v5555_v0 = vld [vmem:[%s6766_s18 + $0xe1] ss:$2 sm:$0xff]  ;;  %v4920_v58 = vmul.f32 0.25, %v4919_v14 }
 0x2b6   : > { %4897 = vst.msk [vmem:[#allocation6 + $0x8] sm:$0xff] %vm374_vm0, %v4881_v21  ;;  %4904 = vst.msk [vmem:[#allocation6 + $0x40] sm:$0xff] %vm374_vm0, %v4888_v4  ;;  %v5556_v32 = vld [vmem:[%s6766_s18 + $0xf1] ss:$2 sm:$0xff]  ;;  %v4924_v39 = vadd.f32 %v4923_v27, %v4922_v24  ;;  %v4894_v56 = vadd.f32 %v5555_v0, %v5539_v60  ;;  %v3699_v60 = vadd.s32 8, %v7808_v11  ;;  %v3701_v27 = vadd.s32 24, %v7808_v11 }
 0x2b7   : > { %4905 = vst.msk [vmem:[#allocation6 + $0x48] sm:$0xff] %vm374_vm0, %v4889_v7  ;;  %4906 = vst.msk [vmem:[#allocation6 + $0x50] sm:$0xff] %vm374_vm0, %v4890_v34  ;;  %v4895_v57 = vadd.f32 %v5556_v32, %v5540_v30  ;;  %v4943_v36 = vld [vmem:[#allocation6 + $0x68] sm:$0xff]  ;;  %v3703_v0 = vadd.s32 40, %v7808_v11 }
 0x2b8   : > { %4907 = vst.msk [vmem:[#allocation6 + $0x58] sm:$0xff] %vm374_vm0, %v4891_v35  ;;  %v4927_v48 = vld [vmem:[#allocation6 + $0x30] sm:$0xff]  ;;  %4921 = vst.msk [vmem:[#allocation7 + $0x8] sm:$0xff] %vm374_vm0, %v4920_v58  ;;  %v4925_v7 = vmul.f32 0.25, %v4924_v39  ;;  %v3741_v30 = vand.u32 15, %v3699_v60  ;;  %v3755_v32 = vand.u32 15, %v3701_v27 }
 0x2b9   : > { %v4928_v4 = vld [vmem:[#allocation6 + $0x38] sm:$0xff]  ;;  %4910 = vst.msk [vmem:[#allocation6 + $0x70] sm:$0xff] %vm374_vm0, %v4894_v56  ;;  %4911 = vst.msk [vmem:[#allocation6 + $0x78] sm:$0xff] %vm374_vm0, %v4895_v57  ;;  %v4942_v59 = vld [vmem:[#allocation6 + $0x60] sm:$0xff]  ;;  %v3769_v56 = vand.u32 15, %v3703_v0  ;;  %v3705_v57 = vadd.s32 56, %v7808_v11 }
 0x2ba   : > { %v4912_v23 = vld [vmem:[#allocation6] sm:$0xff]  ;;  %4926 = vst.msk [vmem:[#allocation7 + $0x10] sm:$0xff] %vm374_vm0, %v4925_v7  ;;  %v4944_v6 = vadd.f32 %v4943_v36, %v4942_v59  ;;  %vm4275_vm4 = vcmp.eq.s32.totalorder %v3741_v30, 15  ;;  %vm4277_vm5 = vcmp.eq.s32.totalorder %v3755_v32, 15 }
 0x2bb   : > { %vm8039_vm6 = vcmp.eq.s32.totalorder %v3769_v56, 15 }
 0x2bc   : > { %v4945_v24 = vmul.f32 0.25, %v4944_v6 }
 0x2bd   : > { %v4913_v21 = vld [vmem:[#allocation6 + $0x8] sm:$0xff]  ;;  %v4932_v3 = vld [vmem:[#allocation6 + $0x40] sm:$0xff] }
 0x2be   : > { %v4914_v44 = vadd.f32 %v4913_v21, %v4912_v23  ;;  %v4929_v23 = vadd.f32 %v4928_v4, %v4927_v48  ;;  %v4933_v21 = vld [vmem:[#allocation6 + $0x48] sm:$0xff]  ;;  %v4937_v35 = vld [vmem:[#allocation6 + $0x50] sm:$0xff]  ;;  %4946 = vst.msk [vmem:[#allocation7 + $0x30] sm:$0xff] %vm374_vm0, %v4945_v24 }
 0x2bf   : > { %v4934_v34 = vadd.f32 %v4933_v21, %v4932_v3  ;;  %v8032_v48 = vld [vmem:[%s8293_s4] ss:$0 sm:$0xff] }
 0x2c0   : > { %v4915_v37 = vmul.f32 0.25, %v4914_v44  ;;  %v4930_v28 = vmul.f32 0.25, %v4929_v23  ;;  %v4938_v44 = vld [vmem:[#allocation6 + $0x58] sm:$0xff] }
 0x2c1   : > { %v4939_v51 = vadd.f32 %v4938_v44, %v4937_v35  ;;  %v4935_v61 = vmul.f32 0.25, %v4934_v34  ;;  %v4948_v14 = vld [vmem:[#allocation6 + $0x78] sm:$0xff] }
 0x2c2   : > { %4916 = vst.msk [vmem:[#allocation7] sm:$0xff] %vm374_vm0, %v4915_v37  ;;  %4931 = vst.msk [vmem:[#allocation7 + $0x18] sm:$0xff] %vm374_vm0, %v4930_v28  ;;  %v4947_v37 = vld [vmem:[#allocation6 + $0x70] sm:$0xff] }
 0x2c3   : > { %v4940_v55 = vmul.f32 0.25, %v4939_v51  ;;  %4936 = vst.msk [vmem:[#allocation7 + $0x20] sm:$0xff] %vm374_vm0, %v4935_v61  ;;  %v4949_v47 = vadd.f32 %v4948_v14, %v4947_v37  ;;  %v3783_v51 = vand.u32 15, %v3705_v57  ;;  %v3707_v61 = vadd.s32 72, %v7808_v11 }
 0x2c5   : > { %4941 = vst.msk [vmem:[#allocation7 + $0x28] sm:$0xff] %vm374_vm0, %v4940_v55  ;;  %v4950_v22 = vmul.f32 0.25, %v4949_v47  ;;  %vm8052_vm7 = vcmp.eq.s32.totalorder %v3783_v51, 15 }
 0x2c7   : > { %4951 = vst.msk [vmem:[#allocation7 + $0x38] sm:$0xff] %vm374_vm0, %v4950_v22 }
 0x309   : > { %v6376_v58 = vpop.f32.mrb[32].mxu1 }
 0x30a   : > { %v4371_v39 = vsel %vm4275_vm4, 0.0, %v6376_v58  ;;  %v3506_v4 = vpop.f32.mrb[33].mxu1 }
 0x30b   : > { %v4403_v23 = vadd.f32 %v4371_v39, %v7832_v45  ;;  %v4402_v7 = vadd.f32 %v7837_v53, %v3506_v4 }
 0x30d   : > { %v4442_v3 = vadd.f32 %v8032_v48, %v4403_v23  ;;  %v4441_v28 = vadd.f32 %v8032_v48, %v4402_v7  ;;  %v6379_v21 = vpop.f32.mrb[34].mxu1 }
 0x30e   : > { %v4373_v34 = vsel %vm4277_vm5, 0.0, %v6379_v21  ;;  %v3516_v35 = vpop.f32.mrb[35].mxu1 }
 0x30f   : > { %v4474_v55 = vmax.f32 %v4442_v3, 0.0  ;;  %v4473_v59 = vmax.f32 %v4441_v28, 0.0  ;;  %v4405_v45 = vadd.f32 %v4373_v34, %v7843_v20  ;;  %v4404_v53 = vadd.f32 %v7848_v16, %v3516_v35 }
 0x310   : > { %v3797_v20 = vand.u32 15, %v3707_v61  ;;  %v3709_v16 = vadd.s32 88, %v7808_v11 }
 0x311   : > { %4506 = vst.msk [vmem:[#allocation3 + $0x8] sm:$0xff] %vm728_vm1, %v4474_v55  ;;  %4505 = vst.msk [vmem:[#allocation3] sm:$0xff] %vm728_vm1, %v4473_v59  ;;  %v4444_v36 = vadd.f32 %v8032_v48, %v4405_v45  ;;  %v4443_v6 = vadd.f32 %v8032_v48, %v4404_v53  ;;  %v6382_v37 = vpop.f32.mrb[36].mxu1  ;;  %v3713_v59 = vadd.s32 120, %v7808_v11 }
 0x312   : > { %v4375_v14 = vsel %vm8039_vm6, 0.0, %v6382_v37  ;;  %v3526_v24 = vpop.f32.mrb[37].mxu1  ;;  %vm8065_vm8 = vcmp.eq.s32.totalorder %v3797_v20, 15 }
 0x313   : > { %v4476_v22 = vmax.f32 %v4444_v36, 0.0  ;;  %v4475_v60 = vmax.f32 %v4443_v6, 0.0  ;;  %v4407_v30 = vadd.f32 %v4375_v14, %v7854_v50  ;;  %v4406_v27 = vadd.f32 %v7859_v17, %v3526_v24 }
 0x314   : > { %v3811_v50 = vand.u32 15, %v3709_v16  ;;  %v3711_v17 = vadd.s32 104, %v7808_v11 }
 0x315   : > { %4508 = vst.msk [vmem:[#allocation3 + $0x18] sm:$0xff] %vm728_vm1, %v4476_v22  ;;  %4507 = vst.msk [vmem:[#allocation3 + $0x10] sm:$0xff] %vm728_vm1, %v4475_v60  ;;  %v4446_v0 = vadd.f32 %v8032_v48, %v4407_v30  ;;  %v4445_v32 = vadd.f32 %v8032_v48, %v4406_v27  ;;  %v6385_v58 = vpop.f32.mrb[38].mxu1  ;;  %v3715_v30 = vadd.s32 136, %v7808_v11 }
 0x316   : > { %v4377_v39 = vsel %vm8052_vm7, 0.0, %v6385_v58  ;;  %v3536_v4 = vpop.f32.mrb[39].mxu1  ;;  %vm8078_vm9 = vcmp.eq.s32.totalorder %v3811_v50, 15 }
 0x317   : > { %v4478_v57 = vmax.f32 %v4446_v0, 0.0  ;;  %v4477_v23 = vmax.f32 %v4445_v32, 0.0  ;;  %v4409_v7 = vadd.f32 %v4377_v39, %v7865_v54  ;;  %v4408_v3 = vadd.f32 %v7870_v1, %v3536_v4 }
 0x318   : > { %v4537_v28 = vld [vmem:[#allocation3] ss:$2 sm:$0xff]  ;;  %v4569_v21 = vld [vmem:[#allocation3 + $0x1] ss:$2 sm:$0xff]  ;;  %v3825_v1 = vand.u32 15, %v3711_v17 }
 0x319   : > { %v4600_v34 = vadd.f32 %v4569_v21, %v4537_v28  ;;  %4510 = vst.msk [vmem:[#allocation3 + $0x28] sm:$0xff] %vm728_vm1, %v4478_v57  ;;  %4509 = vst.msk [vmem:[#allocation3 + $0x20] sm:$0xff] %vm728_vm1, %v4477_v23  ;;  %v4448_v35 = vadd.f32 %v8032_v48, %v4409_v7  ;;  %v4447_v44 = vadd.f32 %v8032_v48, %v4408_v3  ;;  %v6388_v51 = vpop.f32.mrb[40].mxu1  ;;  %v3717_v23 = vadd.s32 152, %v7808_v11 }
 0x31a   : > { %v4379_v61 = vsel %vm8065_vm8, 0.0, %v6388_v51  ;;  %v3546_v55 = vpop.f32.mrb[41].mxu1  ;;  %vm8092_vm10 = vcmp.eq.s32.totalorder %v3825_v1, 15  ;;  %v3853_v3 = vand.u32 15, %v3715_v30 }
 0x31b   : > { %4616 = vst.msk [vmem:[#allocation4] sm:$0xff] %vm728_vm1, %v4600_v34  ;;  %v4480_v45 = vmax.f32 %v4448_v35, 0.0  ;;  %v4479_v53 = vmax.f32 %v4447_v44, 0.0  ;;  %v4411_v36 = vadd.f32 %v4379_v61, %v7876_v18  ;;  %v4410_v6 = vadd.f32 %v7881_v26, %v3546_v55 }
 0x31c   : > { %v4539_v37 = vld [vmem:[#allocation3 + $0x10] ss:$2 sm:$0xff]  ;;  %v4571_v14 = vld [vmem:[#allocation3 + $0x11] ss:$2 sm:$0xff]  ;;  %v3839_v26 = vand.u32 15, %v3713_v59  ;;  %v3867_v59 = vand.u32 15, %v3717_v23 }
 0x31d   : > { %v4601_v24 = vadd.f32 %v4571_v14, %v4539_v37  ;;  %4512 = vst.msk [vmem:[#allocation3 + $0x38] sm:$0xff] %vm728_vm1, %v4480_v45  ;;  %4511 = vst.msk [vmem:[#allocation3 + $0x30] sm:$0xff] %vm728_vm1, %v4479_v53  ;;  %v4450_v47 = vadd.f32 %v8032_v48, %v4411_v36  ;;  %v4449_v20 = vadd.f32 %v8032_v48, %v4410_v6  ;;  %v6391_v16 = vpop.f32.mrb[42].mxu1  ;;  %vm8120_vm12 = vcmp.eq.s32.totalorder %v3853_v3, 15 }
 0x31e   : > { %v4381_v22 = vsel %vm8078_vm9, 0.0, %v6391_v16  ;;  %v3556_v60 = vpop.f32.mrb[43].mxu1  ;;  %vm8107_vm11 = vcmp.eq.s32.totalorder %v3839_v26, 15  ;;  %vm8132_vm13 = vcmp.eq.s32.totalorder %v3867_v59, 15 }
 0x31f   : > { %4617 = vst.msk [vmem:[#allocation4 + $0x8] sm:$0xff] %vm728_vm1, %v4601_v24  ;;  %v4482_v27 = vmax.f32 %v4450_v47, 0.0  ;;  %v4481_v0 = vmax.f32 %v4449_v20, 0.0  ;;  %v4413_v32 = vadd.f32 %v4381_v22, %v7885_v63  ;;  %v4412_v58 = vadd.f32 %v7888_v13, %v3556_v60 }
 0x320   : > { %v4541_v39 = vld [vmem:[#allocation3 + $0x20] ss:$2 sm:$0xff]  ;;  %v4573_v4 = vld [vmem:[#allocation3 + $0x21] ss:$2 sm:$0xff] }
 0x321   : > { %v4602_v56 = vadd.f32 %v4573_v4, %v4541_v39  ;;  %4514 = vst.msk [vmem:[#allocation3 + $0x48] sm:$0xff] %vm728_vm1, %v4482_v27  ;;  %4513 = vst.msk [vmem:[#allocation3 + $0x40] sm:$0xff] %vm728_vm1, %v4481_v0  ;;  %v4452_v50 = vadd.f32 %v8032_v48, %v4413_v32  ;;  %v4451_v17 = vadd.f32 %v8032_v48, %v4412_v58  ;;  %v6394_v57 = vpop.f32.mrb[44].mxu1  ;;  %v3721_v58 = vadd.s32 184, %v7808_v11 }
 0x322   : > { %v4383_v7 = vsel %vm8092_vm10, 0.0, %v6394_v57  ;;  %v3566_v63 = vpop.f32.mrb[45].mxu1  ;;  %v4632_v47 = vld [vmem:[#allocation4] sm:$0xff] }
 0x323   : > { %4618 = vst.msk [vmem:[#allocation4 + $0x10] sm:$0xff] %vm728_vm1, %v4602_v56  ;;  %v4484_v28 = vmax.f32 %v4452_v50, 0.0  ;;  %v4483_v21 = vmax.f32 %v4451_v17, 0.0  ;;  %v4415_v34 = vadd.f32 %v4383_v7, %v7892_v25  ;;  %v4414_v35 = vadd.f32 %v7895_v12, %v3566_v63 }
 0x324   : > { %v4543_v44 = vld [vmem:[#allocation3 + $0x30] ss:$2 sm:$0xff]  ;;  %v4575_v51 = vld [vmem:[#allocation3 + $0x31] ss:$2 sm:$0xff]  ;;  %v3719_v12 = vadd.s32 168, %v7808_v11 }
 0x325   : > { %v4603_v61 = vadd.f32 %v4575_v51, %v4543_v44  ;;  %4516 = vst.msk [vmem:[#allocation3 + $0x58] sm:$0xff] %vm728_vm1, %v4484_v28  ;;  %4515 = vst.msk [vmem:[#allocation3 + $0x50] sm:$0xff] %vm728_vm1, %v4483_v21  ;;  %v4454_v55 = vadd.f32 %v8032_v48, %v4415_v34  ;;  %v4453_v54 = vadd.f32 %v8032_v48, %v4414_v35  ;;  %v6397_v1 = vpop.f32.mrb[46].mxu1  ;;  %v3895_v28 = vand.u32 15, %v3721_v58 }
 0x326   : > { %v4385_v45 = vsel %vm8107_vm11, 0.0, %v6397_v1  ;;  %v3576_v53 = vpop.f32.mrb[47].mxu1  ;;  %v4633_v36 = vld [vmem:[#allocation4 + $0x8] sm:$0xff]  ;;  %v3881_v0 = vand.u32 15, %v3719_v12  ;;  %v3723_v21 = vadd.s32 200, %v7808_v11 }
 0x327   : > { %4619 = vst.msk [vmem:[#allocation4 + $0x18] sm:$0xff] %vm728_vm1, %v4603_v61  ;;  %v4486_v6 = vmax.f32 %v4454_v55, 0.0  ;;  %v4485_v37 = vmax.f32 %v4453_v54, 0.0  ;;  %v4417_v14 = vadd.f32 %v4385_v45, %v7899_v43  ;;  %v4416_v24 = vadd.f32 %v7902_v42, %v3576_v53 }
 0x328   : > { %v4545_v20 = vld [vmem:[#allocation3 + $0x40] ss:$2 sm:$0xff]  ;;  %v4577_v16 = vld [vmem:[#allocation3 + $0x41] ss:$2 sm:$0xff]  ;;  %v4634_v22 = vadd.f32 %v4633_v36, %v4632_v47  ;;  %vm8149_vm14 = vcmp.eq.s32.totalorder %v3881_v0, 15  ;;  %v3725_v36 = vadd.s32 216, %v7808_v11 }
 0x329   : > { %v4604_v60 = vadd.f32 %v4577_v16, %v4545_v20  ;;  %4518 = vst.msk [vmem:[#allocation3 + $0x68] sm:$0xff] %vm728_vm1, %v4486_v6  ;;  %4517 = vst.msk [vmem:[#allocation3 + $0x60] sm:$0xff] %vm728_vm1, %v4485_v37  ;;  %v4456_v18 = vadd.f32 %v8032_v48, %v4417_v14  ;;  %v4455_v26 = vadd.f32 %v8032_v48, %v4416_v24  ;;  %v6400_v30 = vpop.f32.mrb[48].mxu1  ;;  %vm8164_vm15 = vcmp.eq.s32.totalorder %v3895_v28, 15 }
 0x32a   : > { %v4387_v43 = vsel %vm8120_vm12, 0.0, %v6400_v30  ;;  %v3586_v42 = vpop.f32.mrb[49].mxu1  ;;  %v4635_v32 = vmul.f32 0.25, %v4634_v22  ;;  %v4637_v55 = vld [vmem:[#allocation4 + $0x10] sm:$0xff]  ;;  %v3909_v37 = vand.u32 15, %v3723_v21 }
 0x32b   : > { %4620 = vst.msk [vmem:[#allocation4 + $0x20] sm:$0xff] %vm728_vm1, %v4604_v60  ;;  %v4488_v39 = vmax.f32 %v4456_v18, 0.0  ;;  %v4487_v4 = vmax.f32 %v4455_v26, 0.0  ;;  %v4419_v56 = vadd.f32 %v4387_v43, %v7906_v38  ;;  %v4418_v50 = vadd.f32 %v7909_v46, %v3586_v42 }
 0x32c   : > { %v4547_v17 = vld [vmem:[#allocation3 + $0x50] ss:$2 sm:$0xff]  ;;  %v4579_v57 = vld [vmem:[#allocation3 + $0x51] ss:$2 sm:$0xff]  ;;  %4636 = vst.msk [vmem:[#allocation5] sm:$0xff] %vm728_vm1, %v4635_v32  ;;  %vm8179_vm2 = vcmp.eq.s32.totalorder %v3909_v37, 15 }
 0x32d   : > { %v4605_v23 = vadd.f32 %v4579_v57, %v4547_v17  ;;  %4520 = vst.msk [vmem:[#allocation3 + $0x78] sm:$0xff] %vm728_vm1, %v4488_v39  ;;  %4519 = vst.msk [vmem:[#allocation3 + $0x70] sm:$0xff] %vm728_vm1, %v4487_v4  ;;  %v4458_v7 = vadd.f32 %v8032_v48, %v4419_v56  ;;  %v4457_v63 = vadd.f32 %v8032_v48, %v4418_v50  ;;  %v6403_v13 = vpop.f32.mrb[50].mxu1  ;;  %v3727_v32 = vadd.s32 232, %v7808_v11 }
 0x32e   : > { %v4389_v3 = vsel %vm8132_vm13, 0.0, %v6403_v13  ;;  %v3596_v38 = vpop.f32.mrb[51].mxu1  ;;  %v4638_v34 = vld [vmem:[#allocation4 + $0x18] sm:$0xff] }
 0x32f   : > { %4621 = vst.msk [vmem:[#allocation4 + $0x28] sm:$0xff] %vm728_vm1, %v4605_v23  ;;  %v4490_v35 = vmax.f32 %v4458_v7, 0.0  ;;  %v4489_v44 = vmax.f32 %v4457_v63, 0.0  ;;  %v4421_v51 = vadd.f32 %v4389_v3, %v7913_v62  ;;  %v4420_v61 = vadd.f32 %v7916_v10, %v3596_v38 }
 0x330   : > { %v4549_v54 = vld [vmem:[#allocation3 + $0x60] ss:$2 sm:$0xff]  ;;  %v4581_v1 = vld [vmem:[#allocation3 + $0x61] ss:$2 sm:$0xff]  ;;  %v4639_v59 = vadd.f32 %v4638_v34, %v4637_v55  ;;  %v3937_v28 = vand.u32 15, %v3727_v32  ;;  %v3729_v34 = vadd.s32 248, %v7808_v11 }
 0x331   : > { %v4606_v45 = vadd.f32 %v4581_v1, %v4549_v54  ;;  %4522 = vst.msk [vmem:[#allocation3 + $0x88] sm:$0xff] %vm728_vm1, %v4490_v35  ;;  %4521 = vst.msk [vmem:[#allocation3 + $0x80] sm:$0xff] %vm728_vm1, %v4489_v44  ;;  %v4460_v53 = vadd.f32 %v8032_v48, %v4421_v51  ;;  %v4459_v25 = vadd.f32 %v8032_v48, %v4420_v61  ;;  %v6406_v12 = vpop.f32.mrb[52].mxu1 }
 0x332   : > { %v4391_v62 = vsel %vm8149_vm14, 0.0, %v6406_v12  ;;  %v3606_v10 = vpop.f32.mrb[53].mxu1  ;;  %v4640_v14 = vmul.f32 0.25, %v4639_v59  ;;  %v4642_v17 = vld [vmem:[#allocation4 + $0x20] sm:$0xff]  ;;  %vm8210_vm4 = vcmp.eq.s32.totalorder %v3937_v28, 15  ;;  %v3951_v12 = vand.u32 15, %v3729_v34 }
 0x333   : > { %4622 = vst.msk [vmem:[#allocation4 + $0x30] sm:$0xff] %vm728_vm1, %v4606_v45  ;;  %v4492_v24 = vmax.f32 %v4460_v53, 0.0  ;;  %v4491_v47 = vmax.f32 %v4459_v25, 0.0  ;;  %v4423_v20 = vadd.f32 %v4391_v62, %v7920_v9  ;;  %v4422_v16 = vadd.f32 %v7923_v31, %v3606_v10  ;;  %v4672_v22 = vld [vmem:[#allocation5] sm:$0xff] }
 0x334   : > { %v4551_v60 = vld [vmem:[#allocation3 + $0x70] ss:$2 sm:$0xff]  ;;  %v4583_v18 = vld [vmem:[#allocation3 + $0x71] ss:$2 sm:$0xff]  ;;  %6424 = vmatprep.mubr.msk.f32.mxu0 %vm728_vm1, %v4672_v22  ;;  %4641 = vst.msk [vmem:[#allocation5 + $0x8] sm:$0xff] %vm728_vm1, %v4640_v14  ;;  %v3923_v9 = vand.u32 15, %v3725_v36 }
 0x335   : > { %v4607_v26 = vadd.f32 %v4583_v18, %v4551_v60  ;;  %4524 = vst.msk [vmem:[#allocation3 + $0x98] sm:$0xff] %vm728_vm1, %v4492_v24  ;;  %4523 = vst.msk [vmem:[#allocation3 + $0x90] sm:$0xff] %vm728_vm1, %v4491_v47  ;;  %v4462_v30 = vadd.f32 %v8032_v48, %v4423_v20  ;;  %v4461_v27 = vadd.f32 %v8032_v48, %v4422_v16  ;;  %v6409_v43 = vpop.f32.mrb[54].mxu1  ;;  %vm8223_vm5 = vcmp.eq.s32.totalorder %v3951_v12, 15 }
 0x336   : > { %v4393_v31 = vsel %vm8164_vm15, 0.0, %v6409_v43  ;;  %v3616_v42 = vpop.f32.mrb[55].mxu1  ;;  %v4643_v58 = vld [vmem:[#allocation4 + $0x28] sm:$0xff]  ;;  %vm8191_vm3 = vcmp.eq.s32.totalorder %v3923_v9, 15 }
 0x337   : > { %4623 = vst.msk [vmem:[#allocation4 + $0x38] sm:$0xff] %vm728_vm1, %v4607_v26  ;;  %v4494_v39 = vmax.f32 %v4462_v30, 0.0  ;;  %v4493_v4 = vmax.f32 %v4461_v27, 0.0  ;;  %v4425_v56 = vadd.f32 %v4393_v31, %v7927_v15  ;;  %v4424_v50 = vadd.f32 %v7930_v52, %v3616_v42 }
 0x338   : > { %v4553_v57 = vld [vmem:[#allocation3 + $0x80] ss:$2 sm:$0xff]  ;;  %v4585_v23 = vld [vmem:[#allocation3 + $0x81] ss:$2 sm:$0xff]  ;;  %v4644_v7 = vadd.f32 %v4643_v58, %v4642_v17 }
 0x339   : > { %v4608_v63 = vadd.f32 %v4585_v23, %v4553_v57  ;;  %4526 = vst.msk [vmem:[#allocation3 + $0xa8] sm:$0xff] %vm728_vm1, %v4494_v39  ;;  %4525 = vst.msk [vmem:[#allocation3 + $0xa0] sm:$0xff] %vm728_vm1, %v4493_v4  ;;  %v4464_v13 = vadd.f32 %v8032_v48, %v4425_v56  ;;  %v4463_v3 = vadd.f32 %v8032_v48, %v4424_v50  ;;  %v6412_v38 = vpop.f32.mrb[56].mxu1 }
 0x33a   : > { %v4395_v15 = vsel %vm8179_vm2, 0.0, %v6412_v38  ;;  %v3626_v52 = vpop.f32.mrb[57].mxu1  ;;  %v4645_v21 = vmul.f32 0.25, %v4644_v7  ;;  %v4647_v14 = vld [vmem:[#allocation4 + $0x30] sm:$0xff] }
 0x33b   : > { %4624 = vst.msk [vmem:[#allocation4 + $0x40] sm:$0xff] %vm728_vm1, %v4608_v63  ;;  %v4496_v35 = vmax.f32 %v4464_v13, 0.0  ;;  %v4495_v44 = vmax.f32 %v4463_v3, 0.0  ;;  %v4427_v51 = vadd.f32 %v4395_v15, %v7934_v33  ;;  %v4426_v61 = vadd.f32 %v7937_v8, %v3626_v52  ;;  %v4673_v55 = vld [vmem:[#allocation5 + $0x8] sm:$0xff] }
 0x33c   : > { %v4555_v54 = vld [vmem:[#allocation3 + $0x90] ss:$2 sm:$0xff]  ;;  %v4587_v1 = vld [vmem:[#allocation3 + $0x91] ss:$2 sm:$0xff]  ;;  %6425 = vmatmul.mubr.msk.f32.vlgmr.msra.gmra.mrb[86].mxu0 %vm728_vm1, %v4673_v55  ;;  %4646 = vst.msk [vmem:[#allocation5 + $0x10] sm:$0xff] %vm728_vm1, %v4645_v21 }
 0x33d   : > { %v4609_v59 = vadd.f32 %v4587_v1, %v4555_v54  ;;  %4528 = vst.msk [vmem:[#allocation3 + $0xb8] sm:$0xff] %vm728_vm1, %v4496_v35  ;;  %4527 = vst.msk [vmem:[#allocation3 + $0xb0] sm:$0xff] %vm728_vm1, %v4495_v44  ;;  %v4466_v11 = vadd.f32 %v8032_v48, %v4427_v51  ;;  %v4465_v45 = vadd.f32 %v8032_v48, %v4426_v61  ;;  %v6415_v53 = vpop.f32.mrb[58].mxu1  ;;  %6459 = vmatpush3.bf16.msra.mxu0 %v7971_v19 }
 0x33e   : > { %v4397_v33 = vsel %vm8191_vm3, 0.0, %v6415_v53  ;;  %v3636_v8 = vpop.f32.mrb[59].mxu1  ;;  %v4648_v36 = vld [vmem:[#allocation4 + $0x38] sm:$0xff] }
 0x33f   : > { %4625 = vst.msk [vmem:[#allocation4 + $0x48] sm:$0xff] %vm728_vm1, %v4609_v59  ;;  %v4498_v62 = vmax.f32 %v4466_v11, 0.0  ;;  %v4497_v10 = vmax.f32 %v4465_v45, 0.0  ;;  %v4429_v6 = vadd.f32 %v4397_v33, %v7941_v49  ;;  %v4428_v37 = vadd.f32 %v7944_v5, %v3636_v8  ;;  %v5517_v5 = vld [vmem:[%s8295_s6] ss:$0 sm:$0xff] }
 0x340   : > { %v4557_v19 = vld [vmem:[#allocation3 + $0xa0] ss:$2 sm:$0xff]  ;;  %v4589_v24 = vld [vmem:[#allocation3 + $0xa1] ss:$2 sm:$0xff]  ;;  %v4649_v47 = vadd.f32 %v4648_v36, %v4647_v14 }
 0x341   : > { %v4610_v20 = vadd.f32 %v4589_v24, %v4557_v19  ;;  %4530 = vst.msk [vmem:[#allocation3 + $0xc8] sm:$0xff] %vm728_vm1, %v4498_v62  ;;  %4529 = vst.msk [vmem:[#allocation3 + $0xc0] sm:$0xff] %vm728_vm1, %v4497_v10  ;;  %v4468_v16 = vadd.f32 %v8032_v48, %v4429_v6  ;;  %v4467_v22 = vadd.f32 %v8032_v48, %v4428_v37  ;;  %v6418_v60 = vpop.f32.mrb[60].mxu1  ;;  %v4952_v19 = vld [vmem:[#allocation7] sm:$0xff] }
 0x342   : > { %v4399_v18 = vsel %vm8210_vm4, 0.0, %v6418_v60  ;;  %v3646_v49 = vpop.f32.mrb[61].mxu1  ;;  %v4650_v26 = vmul.f32 0.25, %v4649_v47  ;;  %v4652_v7 = vld [vmem:[#allocation4 + $0x40] sm:$0xff]  ;;  %v4953_v47 = vld [vmem:[#allocation7 + $0x8] sm:$0xff] }
 0x343   : > { %4626 = vst.msk [vmem:[#allocation4 + $0x50] sm:$0xff] %vm728_vm1, %v4610_v20  ;;  %v4500_v30 = vmax.f32 %v4468_v16, 0.0  ;;  %v4499_v27 = vmax.f32 %v4467_v22, 0.0  ;;  %v4431_v43 = vadd.f32 %v4399_v18, %v7947_v29  ;;  %v4430_v9 = vadd.f32 %v7953_v40, %v3646_v49  ;;  %v4674_v31 = vld [vmem:[#allocation5 + $0x10] sm:$0xff]  ;;  %v4955_v16 = vld [vmem:[#allocation7 + $0x18] sm:$0xff]  ;;  %v4956_v22 = vld [vmem:[#allocation7 + $0x20] sm:$0xff] }
 0x344   : > { %v4559_v42 = vld [vmem:[#allocation3 + $0xb0] ss:$2 sm:$0xff]  ;;  %v4591_v0 = vld [vmem:[#allocation3 + $0xb1] ss:$2 sm:$0xff]  ;;  %6427 = vmatprep.mubr.msk.f32.mxu0 %vm728_vm1, %v4674_v31  ;;  %4651 = vst.msk [vmem:[#allocation5 + $0x18] sm:$0xff] %vm728_vm1, %v4650_v26  ;;  %v4957_v60 = vld [vmem:[#allocation7 + $0x28] sm:$0xff] }
 0x345   : > { %v4611_v32 = vadd.f32 %v4591_v0, %v4559_v42  ;;  %4532 = vst.msk [vmem:[#allocation3 + $0xd8] sm:$0xff] %vm728_vm1, %v4500_v30  ;;  %4531 = vst.msk [vmem:[#allocation3 + $0xd0] sm:$0xff] %vm728_vm1, %v4499_v27  ;;  %v4470_v58 = vadd.f32 %v8032_v48, %v4431_v43  ;;  %v4469_v39 = vadd.f32 %v8032_v48, %v4430_v9  ;;  %v6421_v4 = vpop.f32.mrb[62].mxu1  ;;  %v4954_v20 = vld [vmem:[#allocation7 + $0x10] sm:$0xff]  ;;  %v4959_v49 = vld [vmem:[#allocation7 + $0x38] sm:$0xff] }
 0x346   : > { %v4401_v29 = vsel %vm8223_vm5, 0.0, %v6421_v4  ;;  %v3656_v40 = vpop.f32.mrb[63].mxu1  ;;  %v4653_v56 = vld [vmem:[#allocation4 + $0x48] sm:$0xff]  ;;  %v4958_v18 = vld [vmem:[#allocation7 + $0x30] sm:$0xff] }
 0x347   : > { %4627 = vst.msk [vmem:[#allocation4 + $0x58] sm:$0xff] %vm728_vm1, %v4611_v32  ;;  %v4502_v50 = vmax.f32 %v4470_v58, 0.0  ;;  %v4501_v17 = vmax.f32 %v4469_v39, 0.0  ;;  %v4433_v57 = vadd.f32 %v4401_v29, %v7956_v41  ;;  %v4432_v23 = vadd.f32 %v7959_v2, %v3656_v40  ;;  %v5557_v26 = vld [vmem:[%s8297_s8] ss:$0 sm:$0xff] }
 0x348   : > { %v4561_v63 = vld [vmem:[#allocation3 + $0xc0] ss:$2 sm:$0xff]  ;;  %v4593_v13 = vld [vmem:[#allocation3 + $0xc1] ss:$2 sm:$0xff]  ;;  %v4654_v3 = vadd.f32 %v4653_v56, %v4652_v7  ;;  %v6490_v43 = vadd.f32 %v5557_v26, %v5517_v5 }
 0x349   : > { %v4612_v38 = vadd.f32 %v4593_v13, %v4561_v63  ;;  %4534 = vst.msk [vmem:[#allocation3 + $0xe8] sm:$0xff] %vm728_vm1, %v4502_v50  ;;  %4533 = vst.msk [vmem:[#allocation3 + $0xe0] sm:$0xff] %vm728_vm1, %v4501_v17  ;;  %v4472_v46 = vadd.f32 %v8032_v48, %v4433_v57  ;;  %v4471_v15 = vadd.f32 %v8032_v48, %v4432_v23 }
 0x34a   : > { %v4655_v52 = vmul.f32 0.25, %v4654_v3  ;;  %v4657_v44 = vld [vmem:[#allocation4 + $0x50] sm:$0xff] }
 0x34b   : > { %4628 = vst.msk [vmem:[#allocation4 + $0x60] sm:$0xff] %vm728_vm1, %v4612_v38  ;;  %v4504_v28 = vmax.f32 %v4472_v46, 0.0  ;;  %v4503_v41 = vmax.f32 %v4471_v15, 0.0  ;;  %v4675_v21 = vld [vmem:[#allocation5 + $0x18] sm:$0xff] }
 0x34c   : > { %v4563_v2 = vld [vmem:[#allocation3 + $0xd0] ss:$2 sm:$0xff]  ;;  %v4595_v34 = vld [vmem:[#allocation3 + $0xd1] ss:$2 sm:$0xff]  ;;  %6428 = vmatmul.mubr.msk.f32.gmra.mrb[88].mxu0 %vm728_vm1, %v4675_v21  ;;  %4656 = vst.msk [vmem:[#allocation5 + $0x20] sm:$0xff] %vm728_vm1, %v4655_v52 }
 0x34d   : > { %v4613_v35 = vadd.f32 %v4595_v34, %v4563_v2  ;;  %4536 = vst.msk [vmem:[#allocation3 + $0xf8] sm:$0xff] %vm728_vm1, %v4504_v28  ;;  %4535 = vst.msk [vmem:[#allocation3 + $0xf0] sm:$0xff] %vm728_vm1, %v4503_v41 }
 0x34e   : > { %v4658_v51 = vld [vmem:[#allocation4 + $0x58] sm:$0xff] }
 0x34f   : > { %4629 = vst.msk [vmem:[#allocation4 + $0x68] sm:$0xff] %vm728_vm1, %v4613_v35  ;;  %v4659_v48 = vadd.f32 %v4658_v51, %v4657_v44 }
 0x350   : > { %v4565_v61 = vld [vmem:[#allocation3 + $0xe0] ss:$2 sm:$0xff]  ;;  %v4597_v55 = vld [vmem:[#allocation3 + $0xe1] ss:$2 sm:$0xff] }
 0x351   : > { %v4614_v54 = vadd.f32 %v4597_v55, %v4565_v61  ;;  %v4660_v1 = vmul.f32 0.25, %v4659_v48 }
 0x352   : > { %v4662_v33 = vld [vmem:[#allocation4 + $0x60] sm:$0xff] }
 0x353   : > { %4630 = vst.msk [vmem:[#allocation4 + $0x70] sm:$0xff] %vm728_vm1, %v4614_v54  ;;  %v4676_v59 = vld [vmem:[#allocation5 + $0x20] sm:$0xff]  ;;  %4661 = vst.msk [vmem:[#allocation5 + $0x28] sm:$0xff] %vm728_vm1, %v4660_v1 }
 0x354   : > { %v4567_v11 = vld [vmem:[#allocation3 + $0xf0] ss:$2 sm:$0xff]  ;;  %v4599_v45 = vld [vmem:[#allocation3 + $0xf1] ss:$2 sm:$0xff]  ;;  %6430 = vmatprep.mubr.msk.f32.mxu0 %vm728_vm1, %v4676_v59 }
 0x355   : > { %v4615_v53 = vadd.f32 %v4599_v45, %v4567_v11 }
 0x356   : > { %v4663_v8 = vld [vmem:[#allocation4 + $0x68] sm:$0xff] }
 0x357   : > { %4631 = vst.msk [vmem:[#allocation4 + $0x78] sm:$0xff] %vm728_vm1, %v4615_v53  ;;  %v4664_v25 = vadd.f32 %v4663_v8, %v4662_v33 }
 0x359   : > { %v4665_v12 = vmul.f32 0.25, %v4664_v25 }
 0x35a   : > { %v4677_v36 = vld [vmem:[#allocation5 + $0x28] sm:$0xff]  ;;  %v4667_v62 = vld [vmem:[#allocation4 + $0x70] sm:$0xff] }
 0x35b   : > { %6431 = vmatmul.mubr.msk.f32.gmra.mrb[90].mxu0 %vm728_vm1, %v4677_v36  ;;  %4666 = vst.msk [vmem:[#allocation5 + $0x30] sm:$0xff] %vm728_vm1, %v4665_v12 }
 0x35e   : > { %v4668_v10 = vld [vmem:[#allocation4 + $0x78] sm:$0xff] }
 0x35f   : > { %v4669_v6 = vadd.f32 %v4668_v10, %v4667_v62 }
 0x361   : > { %v4670_v37 = vmul.f32 0.25, %v4669_v6 }
 0x362   : > { %v4678_v14 = vld [vmem:[#allocation5 + $0x30] sm:$0xff] }
 0x363   : > { %6433 = vmatprep.mubr.msk.f32.mxu0 %vm728_vm1, %v4678_v14  ;;  %4671 = vst.msk [vmem:[#allocation5 + $0x38] sm:$0xff] %vm728_vm1, %v4670_v37 }
 0x36a   : > { %v4679_v24 = vld [vmem:[#allocation5 + $0x38] sm:$0xff] }
 0x36b   : > { %6434 = vmatmul.mubr.msk.f32.gmra.mrb[92].mxu0 %vm728_vm1, %v4679_v24 }
 0x36c   : > { %6440 = vmatprep.mubr.msk.f32.mxu0 %vm374_vm0, %v4952_v19 }
 0x36f   : > { %6441 = vmatmul.mubr.msk.f32.vlgmr.msra.gmra.mrb[86].mxu0 %vm374_vm0, %v4953_v47 }
 0x370   : > { %6443 = vmatprep.mubr.msk.f32.mxu0 %vm374_vm0, %v4954_v20 }
 0x373   : > { %6444 = vmatmul.mubr.msk.f32.gmra.mrb[88].mxu0 %vm374_vm0, %v4955_v16 }
 0x374   : > { %6446 = vmatprep.mubr.msk.f32.mxu0 %vm374_vm0, %v4956_v22 }
 0x377   : > { %6447 = vmatmul.mubr.msk.f32.gmra.mrb[90].mxu0 %vm374_vm0, %v4957_v60 }
 0x378   : > { %6449 = vmatprep.mubr.msk.f32.mxu0 %vm374_vm0, %v4958_v18 }
 0x37b   : > { %6450 = vmatmul.mubr.msk.f32.gmra.mrb[92].mxu0 %vm374_vm0, %v4959_v49  ;;  %vm5114_vm0 = vcmask 261120  }
 0x442   : > { %v6442_v30 = vpop.f32.mrb[86].mxu0 }
 0x443   : > { %v6484_v27 = vadd.f32 %v6442_v30, %v5517_v5  ;;  %v5059_v9 = vpop.f32.mrb[87].mxu0 }
 0x444   : > { %v6486_v31 = vadd.f32 %v5517_v5, %v5059_v9 }
 0x445   : > { %v6485_v42 = vadd.f32 %v6484_v27, %v5557_v26 }
 0x446   : > { %v6487_v0 = vadd.f32 %v6486_v31, %v5557_v26  ;;  %v6445_v32 = vpop.f32.mrb[88].mxu0 }
 0x447   : > { %v5107_v58 = vmax.f32 %v6485_v42, 0.0  ;;  %v6489_v39 = vadd.f32 %v6490_v43, %v6445_v32  ;;  %v5069_v4 = vpop.f32.mrb[89].mxu0 }
 0x448   : > { %v5106_v29 = vmax.f32 %v6487_v0, 0.0  ;;  %v6491_v40 = vadd.f32 %v6490_v43, %v5069_v4 }
 0x449   : > { %5116 = vst.msk [vmem:[%s332_s16 + $0x8] sm:$0xff] %vm5114_vm0, %v5107_v58  ;;  %v5109_v56 = vmax.f32 %v6489_v39, 0.0 }
 0x44a   : > { %5115 = vst.msk [vmem:[%s332_s16] sm:$0xff] %vm5114_vm0, %v5106_v29  ;;  %v5108_v50 = vmax.f32 %v6491_v40, 0.0  ;;  %v6448_v17 = vpop.f32.mrb[90].mxu0 }
 0x44b   : > { %5118 = vst.msk [vmem:[%s332_s16 + $0x18] sm:$0xff] %vm5114_vm0, %v5109_v56  ;;  %v6493_v57 = vadd.f32 %v6490_v43, %v6448_v17  ;;  %v5079_v23 = vpop.f32.mrb[91].mxu0 }
 0x44c   : > { %5117 = vst.msk [vmem:[%s332_s16 + $0x10] sm:$0xff] %vm5114_vm0, %v5108_v50  ;;  %v6495_v7 = vadd.f32 %v6490_v43, %v5079_v23 }
 0x44d   : > { %v5111_v63 = vmax.f32 %v6493_v57, 0.0 }
 0x44e   : > { %v5110_v13 = vmax.f32 %v6495_v7, 0.0  ;;  %v6451_v3 = vpop.f32.mrb[92].mxu0 }
 0x44f   : > { %5120 = vst.msk [vmem:[%s332_s16 + $0x28] sm:$0xff] %vm5114_vm0, %v5111_v63  ;;  %v6497_v38 = vadd.f32 %v6490_v43, %v6451_v3  ;;  %v5089_v46 = vpop.f32.mrb[93].mxu0 }
 0x450   : > { %5119 = vst.msk [vmem:[%s332_s16 + $0x20] sm:$0xff] %vm5114_vm0, %v5110_v13  ;;  %v6499_v15 = vadd.f32 %v6490_v43, %v5089_v46 }
 0x451   : > { %v5113_v52 = vmax.f32 %v6497_v38, 0.0 }
 0x452   : > { %v5112_v28 = vmax.f32 %v6499_v15, 0.0 }
 0x453   : > { %5122 = vst.msk [vmem:[%s332_s16 + $0x38] sm:$0xff] %vm5114_vm0, %v5113_v52 }
 0x454   : > { %5121 = vst.msk [vmem:[%s332_s16 + $0x30] sm:$0xff] %vm5114_vm0, %v5112_v28 }
 0x455 PF: > { %s19_s30 = sadd.s32 1, %s6693_s30  }
 0x456   : > { %p16_p4 = scmp.ge.s32.totalorder %s19_s30, 4  }
 0x458   :  { %18 = sbr.rel (!%p16_p4) target bundleno = 1 (0x1), region = 156 }

</bundles_post_ra>
